<compile_context>
chip_gen: v5e
topology: v5e:2x2
jax: 0.10.0
libtpu: 0.0.40
codegen_flags: <defaults>
</compile_context>

<pallas_src>
import functools

import jax
import jax.numpy as jnp
from jax import lax
from jax.experimental import pallas as pl
from jax.experimental.pallas import tpu as pltpu

LANE = 128      # TPU lane width (minor vreg dim)
SUBLANE = 8     # TPU sublane width (second-minor vreg dim)


def _round_up(x: int, m: int) -> int:
    return (x + m - 1) // m * m


def _vmem_limit_bytes() -> int:
    """~75% of this chip's physical VMEM (v5e/v6e: 128 MiB, v7x: 64 MiB)."""
    try:
        cap = int(pltpu.get_tpu_info().vmem_capacity_bytes)
    except Exception:
        cap = 64 * 1024 * 1024
    return min(cap * 3 // 4, 100 * 1024 * 1024)


def _pick_row_tile(h, w2p, wt, k1p, cmid_p, cout_p, comp_bytes, out_bytes,
                   vmem_limit):
    """Largest TH (ideally H) whose estimated VMEM footprint fits the budget."""
    def usage(th):
        x_in = 2 * (th + 2) * w2p * k1p * comp_bytes            # dbl-buf input tile
        h1 = (th + 2) * w2p * cmid_p * comp_bytes               # scratch
        out = 2 * th * wt * cout_p * out_bytes                  # dbl-buf output tile
        wts = 2 * (k1p * cmid_p + 9 * cmid_p * cout_p + 2 * (cmid_p + cout_p)) * 4
        tmps = ((th + 2) * w2p * k1p + th * wt * 3 * cmid_p) * comp_bytes \
               + 2 * th * wt * cout_p * 4                       # dot lhs + f32 acc
        return x_in + h1 + out + wts + tmps

    cands = [h] + sorted({h // k for k in (2, 4, 8, 16, 32)
                          if h % k == 0 and (h // k) % SUBLANE == 0},
                         reverse=True)
    for th in cands:
        if usage(th) <= vmem_limit * 7 // 10:
            return th
    return cands[-1]


# ----------------------------------------------------------------------------
# Fused Pallas kernel:  (3x3 conv -> BN -> ReLU) x 2   on one row tile
# ----------------------------------------------------------------------------
def _double_conv_kernel(x_ref, w1_ref, s1_ref, b1_ref, w2_ref, s2_ref, b2_ref,
                        o_ref, h1_ref):
    # x_ref  : (TH+2, W2p, K1p)      im2col'd conv1 input (tile rows + 1-row halo)
    # w1_ref : (K1p, Cmid_p)         conv1 weights, (dy*3+dx)*Cin + cin ordering
    # w2_ref : (3, 3*Cmid_p, Cout_p) conv2 weights, [dy][dx*Cmid_p + c] ordering
    # s*/b*  : (1, C)                folded BatchNorm scale / bias (f32)
    # o_ref  : (TH, W, Cout_p)       output row tile
    # h1_ref : (TH+2, W2p, Cmid_p)   scratch: conv1 output + conv2 zero-pad ring
    TH, W, Cout_p = o_ref.shape
    W2p = h1_ref.shape[1]
    Cmid_p = h1_ref.shape[2]
    K1p = x_ref.shape[-1]
    Wt = W2p - SUBLANE                      # 8-aligned conv2 compute width (>= W)

    t = pl.program_id(1)
    h_total = TH * pl.num_programs(1)
    row0 = t * TH

    # ---- conv1: ONE im2col matmul (MXU accumulates internally), BN + ReLU ---
    lhs1 = x_ref[...].reshape((TH + 2) * W2p, K1p)
    y1 = jnp.dot(lhs1, w1_ref[...], preferred_element_type=jnp.float32)
    y1 = y1.reshape(TH + 2, W2p, Cmid_p) * s1_ref[...] + b1_ref[...]

    # conv2 sees h1 zero-padded by 1 row/col: zero whatever falls outside the
    # valid frame.  Tiny (TH+2, W2p, 1) mask fused with the ReLU select; the
    # halo rows of interior tiles are real h1 values and stay.
    ri = lax.broadcasted_iota(jnp.int32, (TH + 2, W2p, 1), 0)
    ci = lax.broadcasted_iota(jnp.int32, (TH + 2, W2p, 1), 1)
    g_row = ri + (row0 - 1)
    valid = (g_row >= 0) & (g_row < h_total) & (ci >= 1) & (ci <= W)
    h1_ref[...] = jnp.where(valid, jnp.maximum(y1, 0.0), 0.0).astype(h1_ref.dtype)

    # ---- conv2: 3 matmuls (K = 3*Cmid_p), register sum, single store --------
    acc = None
    for dy in range(3):
        rows = h1_ref[pl.ds(dy, TH)]                     # (TH, W2p, Cmid_p)
        lhs2 = jnp.concatenate([rows[:, dx:dx + Wt, :] for dx in range(3)],
                               axis=-1)                  # (TH, Wt, 3*Cmid_p)
        part = jnp.dot(lhs2.reshape(TH * Wt, 3 * Cmid_p), w2_ref[dy],
                       preferred_element_type=jnp.float32)
        acc = part if acc is None else acc + part

    y2 = acc.reshape(TH, Wt, Cout_p) * s2_ref[...] + b2_ref[...]
    o_ref[...] = jnp.maximum(y2, 0.0)[:, :W, :].astype(o_ref.dtype)


def _fused_double_conv(x_tiles, w1, s1, b1, w2, s2, b2, *, width, out_h,
                       out_dtype, vmem_limit, cost):
    """x_tiles: (N, n_tiles, TH+2, W2p, K1p) per-tile im2col'd input windows."""
    N, n_tiles, thp2, w2p, k1p = x_tiles.shape
    TH = thp2 - 2
    cmid_p = w1.shape[-1]
    cout_p = w2.shape[-1]
    W = width

    return pl.pallas_call(
        _double_conv_kernel,
        out_shape=jax.ShapeDtypeStruct((N, out_h, W, cout_p), out_dtype),
        grid_spec=pltpu.PrefetchScalarGridSpec(
            num_scalar_prefetch=0,
            grid=(N, n_tiles),
            in_specs=[
                pl.BlockSpec((None, None, TH + 2, w2p, k1p),
                             lambda b, t: (b, t, 0, 0, 0)),
                pl.BlockSpec((k1p, cmid_p), lambda b, t: (0, 0)),
                pl.BlockSpec((1, cmid_p), lambda b, t: (0, 0)),
                pl.BlockSpec((1, cmid_p), lambda b, t: (0, 0)),
                pl.BlockSpec((3, 3 * cmid_p, cout_p), lambda b, t: (0, 0, 0)),
                pl.BlockSpec((1, cout_p), lambda b, t: (0, 0)),
                pl.BlockSpec((1, cout_p), lambda b, t: (0, 0)),
            ],
            out_specs=pl.BlockSpec((None, TH, W, cout_p),
                                   lambda b, t: (b, t, 0, 0)),
            scratch_shapes=[
                pltpu.VMEM((TH + 2, w2p, cmid_p), x_tiles.dtype),
            ],
        ),
        compiler_params=pltpu.CompilerParams(
            dimension_semantics=("parallel", "parallel"),
            vmem_limit_bytes=vmem_limit,
        ),
        cost_estimate=cost,
    )(x_tiles, w1, s1, b1, w2, s2, b2)


# ----------------------------------------------------------------------------
# Bilinear resize (align_corners=True) via interpolation matrices (JAX glue)
# ----------------------------------------------------------------------------
def _interp_matrix(out_size, in_size):
    if in_size == 1 or out_size == 1:
        m = jnp.zeros((out_size, in_size), jnp.float32)
        return m.at[:, 0].set(1.0)
    idx = jnp.arange(out_size, dtype=jnp.float32)
    src = idx * (in_size - 1) / (out_size - 1)
    lo = jnp.clip(jnp.floor(src).astype(jnp.int32), 0, in_size - 2)
    frac = src - lo.astype(jnp.float32)
    rows = jnp.arange(out_size)
    m = jnp.zeros((out_size, in_size), jnp.float32)
    m = m.at[rows, lo].add(1.0 - frac)
    m = m.at[rows, lo + 1].add(frac)
    return m


def bilinear_resize_nhwc(x, out_h, out_w):
    _, H, W, _ = x.shape
    mh = _interp_matrix(out_h, H)
    mw = _interp_matrix(out_w, W)
    return jnp.einsum("ph,nhwc,qw->npqc", mh, x, mw)


# ----------------------------------------------------------------------------
# DoubleConv forward
# ----------------------------------------------------------------------------
def double_conv_forward(x_nchw, params, *, row_tile=None,
                        compute_dtype=jnp.bfloat16):
    N, C, H, W = x_nchw.shape
    w1, w2 = params["w1"], params["w2"]          # HWIO: (3,3,Cin,Cmid),(3,3,Cmid,Cout)
    c_mid, c_out = w1.shape[-1], w2.shape[-1]

    cmid_p = _round_up(c_mid, LANE)
    cout_p = _round_up(c_out, LANE)
    k1 = 9 * C
    k1p = _round_up(k1, LANE)
    wt = _round_up(W, SUBLANE)                   # conv2 compute width
    w2p = wt + SUBLANE                           # h1 scratch width (>= W+2, 8-aligned)

    x = jnp.transpose(x_nchw, (0, 2, 3, 1))      # NCHW -> NHWC

    inputs = bilinear_resize_nhwc(x, 64, 64)
    # TODO(synk): UVMB block definition is not provided in the source file; it
    # is treated as identity here.
    outputs = inputs
    res = bilinear_resize_nhwc(outputs, H, W) + x

    # Wrapper-side im2col of conv1 (3x3, SAME): the real contraction is 9*Cin
    # padded ONCE to a lane multiple, so the kernel runs a single MXU dot per
    # tile for conv1 (no per-tap lane padding, no RMW accumulation).
    # Note: for very large Cin this multiplies the conv1-input HBM footprint
    # (by up to 9x); an in-kernel tap path would be preferred there.
    xpad = jnp.pad(res, ((0, 0), (1, 1), (1, 1), (0, 0)))
    xim = jnp.concatenate(
        [xpad[:, dy:dy + H, dx:dx + W, :] for dy in range(3) for dx in range(3)],
        axis=-1)                                                  # (N, H, W, 9*Cin)
    # +1 zero row top/bottom (conv2 halo source at the frame boundary), +1 zero
    # col left, right pad to the 8-aligned scratch width, lane-pad channels —
    # one fused pad op.
    xim = jnp.pad(xim, ((0, 0), (1, 1), (1, w2p - 1 - W), (0, k1p - k1)))
    xim = xim.astype(compute_dtype)                               # (N, H+2, w2p, k1p)

    vmem_limit = _vmem_limit_bytes()
    comp_bytes = jnp.dtype(compute_dtype).itemsize
    if row_tile is None:
        row_tile = _pick_row_tile(H, w2p, wt, k1p, cmid_p, cout_p,
                                  comp_bytes, 4, vmem_limit)
    TH = row_tile
    assert H % TH == 0, (H, TH)
    n_tiles = H // TH

    # Per-tile row windows (tile + 1-row halo on each side): the kernel's input
    # block scales with TH (not the whole frame) and pipelines normally.
    x_tiles = jnp.stack(
        [xim[:, t * TH:t * TH + TH + 2] for t in range(n_tiles)], axis=1)

    # Weights / folded BN params (zero padding keeps the math exact).
    w1p = jnp.pad(w1.reshape(k1, c_mid),
                  ((0, k1p - k1), (0, cmid_p - c_mid))).astype(compute_dtype)
    w2q = jnp.pad(w2, ((0, 0), (0, 0), (0, cmid_p - c_mid), (0, cout_p - c_out)))
    w2q = w2q.reshape(3, 3 * cmid_p, cout_p).astype(compute_dtype)
    s1 = jnp.pad(params["scale1"], (0, cmid_p - c_mid)).reshape(1, cmid_p).astype(jnp.float32)
    b1 = jnp.pad(params["bias1"], (0, cmid_p - c_mid)).reshape(1, cmid_p).astype(jnp.float32)
    s2 = jnp.pad(params["scale2"], (0, cout_p - c_out)).reshape(1, cout_p).astype(jnp.float32)
    b2 = jnp.pad(params["bias2"], (0, cout_p - c_out)).reshape(1, cout_p).astype(jnp.float32)

    flops = 2 * N * n_tiles * ((TH + 2) * w2p * k1p * cmid_p
                               + 3 * TH * wt * (3 * cmid_p) * cout_p)
    bytes_accessed = (x_tiles.size * comp_bytes + w1p.size * comp_bytes
                      + w2q.size * comp_bytes + N * H * W * cout_p * 4)
    cost = pl.CostEstimate(flops=flops, transcendentals=0,
                           bytes_accessed=bytes_accessed)

    y = _fused_double_conv(x_tiles, w1p, s1, b1, w2q, s2, b2,
                           width=W, out_h=H, out_dtype=x.dtype,
                           vmem_limit=vmem_limit, cost=cost)
    y = y[..., :c_out]                                            # drop lane padding
    return jnp.transpose(y, (0, 3, 1, 2))                         # NHWC -> NCHW


# ----------------------------------------------------------------------------
# Pure-JAX reference (for correctness check) and parameter init
# ----------------------------------------------------------------------------
def double_conv_reference(x_nchw, params):
    x = jnp.transpose(x_nchw, (0, 2, 3, 1))
    N, H, W, C = x.shape
    inputs = bilinear_resize_nhwc(x, 64, 64)
    outputs = inputs                          # UVMB treated as identity
    res = bilinear_resize_nhwc(outputs, H, W) + x

    def conv_bn_relu(h, w, scale, bias):
        h = lax.conv_general_dilated(
            h, w, window_strides=(1, 1), padding="SAME",
            dimension_numbers=("NHWC", "HWIO", "NHWC"))
        return jnp.maximum(h * scale + bias, 0.0)

    h1 = conv_bn_relu(res, params["w1"], params["scale1"], params["bias1"])
    h2 = conv_bn_relu(h1, params["w2"], params["scale2"], params["bias2"])
    return jnp.transpose(h2, (0, 3, 1, 2))


def init_params(key, in_channels, out_channels, mid_channels=None):
    if not mid_channels:
        mid_channels = out_channels
    k1, k2 = jax.random.split(key)
    eps = 1e-5
    # BatchNorm2d default init (eval semantics): gamma=1, beta=0, mean=0, var=1.
    gamma1 = jnp.ones((mid_channels,), jnp.float32)
    beta1 = jnp.zeros((mid_channels,), jnp.float32)
    mean1 = jnp.zeros((mid_channels,), jnp.float32)
    var1 = jnp.ones((mid_channels,), jnp.float32)
    gamma2 = jnp.ones((out_channels,), jnp.float32)
    beta2 = jnp.zeros((out_channels,), jnp.float32)
    mean2 = jnp.zeros((out_channels,), jnp.float32)
    var2 = jnp.ones((out_channels,), jnp.float32)
    scale1 = gamma1 / jnp.sqrt(var1 + eps)
    bias1 = beta1 - mean1 * scale1
    scale2 = gamma2 / jnp.sqrt(var2 + eps)
    bias2 = beta2 - mean2 * scale2
    return {
        # weights in HWIO layout: (3, 3, Cin, Cout)
        "w1": 0.1 * jax.random.normal(k1, (3, 3, in_channels, mid_channels), jnp.float32),
        "w2": 0.1 * jax.random.normal(k2, (3, 3, mid_channels, out_channels), jnp.float32),
        "scale1": scale1, "bias1": bias1,
        "scale2": scale2, "bias2": bias2,
    }


if __name__ == "__main__":
    key = jax.random.PRNGKey(0)
    k_x, k_p = jax.random.split(key)

    N, C_in, C_out, H, W = 2, 4, 8, 16, 16
    x = jax.random.normal(k_x, (N, C_in, H, W), jnp.float32)
    params = init_params(k_p, C_in, C_out)

    fwd = jax.jit(functools.partial(double_conv_forward, params=params))
    y = fwd(x)
    jax.block_until_ready(y)

    assert y.shape == (N, C_out, H, W), y.shape
    assert y.dtype == jnp.float32
    assert bool(jnp.all(jnp.isfinite(y)))
    assert bool(jnp.all(y >= 0.0))            # final ReLU

    # Correctness vs. pure-JAX reference (tolerance covers bf16 matmul operands
    # with f32 accumulation; real indexing bugs would be O(1)).
    y_ref = jax.jit(functools.partial(double_conv_reference, params=params))(x)
    jax.block_until_ready(y_ref)
    max_err = float(jnp.max(jnp.abs(y - y_ref)))
    assert bool(jnp.allclose(y, y_ref, rtol=4e-2, atol=4e-2)), max_err

    print("KERNEL_OK")
</pallas_src>

<mosaic_0001>
module attributes {stable_mosaic.version = 11 : i64} {
  func.func @_double_conv_kernel(%arg0: i32, %arg1: i32, %arg2: memref<1x1x18x24x128xbf16, #tpu.memory_space<vmem>>, %arg3: memref<128x128xbf16, #tpu.memory_space<vmem>>, %arg4: memref<1x128xf32, #tpu.memory_space<vmem>>, %arg5: memref<1x128xf32, #tpu.memory_space<vmem>>, %arg6: memref<3x384x128xbf16, #tpu.memory_space<vmem>>, %arg7: memref<1x128xf32, #tpu.memory_space<vmem>>, %arg8: memref<1x128xf32, #tpu.memory_space<vmem>>, %arg9: memref<1x16x16x128xf32, #tpu.memory_space<vmem>>, %arg10: memref<18x24x128xbf16, #tpu.memory_space<vmem>>) attributes {dimension_semantics = [#tpu.dimension_semantics<parallel>, #tpu.dimension_semantics<parallel>], iteration_bounds = array<i64: 2, 1>, scalar_prefetch = 0 : i64, scratch_operands = 1 : i64, tpu.core_type = #tpu.core_type<tc>, window_params = [{transform_indices = @transform_0, window_bounds = array<i64: 1, 1, 18, 24, 128>}, {pipeline_mode = #tpu.pipeline_mode<synchronous>, transform_indices = @transform_1, window_bounds = array<i64: 128, 128>}, {pipeline_mode = #tpu.pipeline_mode<synchronous>, transform_indices = @transform_2, window_bounds = array<i64: 1, 128>}, {pipeline_mode = #tpu.pipeline_mode<synchronous>, transform_indices = @transform_3, window_bounds = array<i64: 1, 128>}, {pipeline_mode = #tpu.pipeline_mode<synchronous>, transform_indices = @transform_4, window_bounds = array<i64: 3, 384, 128>}, {pipeline_mode = #tpu.pipeline_mode<synchronous>, transform_indices = @transform_5, window_bounds = array<i64: 1, 128>}, {pipeline_mode = #tpu.pipeline_mode<synchronous>, transform_indices = @transform_6, window_bounds = array<i64: 1, 128>}, {transform_indices = @transform_7, window_bounds = array<i64: 1, 16, 16, 128>}]} {
    %c16_i32 = arith.constant 16 : i32
    %0 = arith.muli %arg1, %c16_i32 : i32
    %c0 = arith.constant 0 : index
    %c0_0 = arith.constant 0 : index
    %c0_1 = arith.constant 0 : index
    %c0_2 = arith.constant 0 : index
    %c0_3 = arith.constant 0 : index
    %1 = vector.load %arg2[%c0, %c0_0, %c0_1, %c0_2, %c0_3] : memref<1x1x18x24x128xbf16, #tpu.memory_space<vmem>>, vector<1x1x18x24x128xbf16>
    %2 = vector.shape_cast %1 : vector<1x1x18x24x128xbf16> to vector<18x24x128xbf16>
    %3 = vector.shape_cast %2 : vector<18x24x128xbf16> to vector<432x128xbf16>
    %c0_4 = arith.constant 0 : index
    %c0_5 = arith.constant 0 : index
    %4 = vector.load %arg3[%c0_4, %c0_5] : memref<128x128xbf16, #tpu.memory_space<vmem>>, vector<128x128xbf16>
    %cst = arith.constant dense<0.000000e+00> : vector<432x128xf32>
    %5 = tpu.matmul %3, %4, %cst {dimension_numbers = #tpu.dot_dimension_numbers<[1], [0], [0], [1], [0, 0, 1, 1], [], []>} : vector<432x128xbf16>, vector<128x128xbf16>, vector<432x128xf32> -> vector<432x128xf32>
    %6 = vector.shape_cast %5 : vector<432x128xf32> to vector<18x24x128xf32>
    %c0_6 = arith.constant 0 : index
    %c0_7 = arith.constant 0 : index
    %7 = vector.load %arg4[%c0_6, %c0_7] : memref<1x128xf32, #tpu.memory_space<vmem>>, vector<1x128xf32>
    %8 = vector.shape_cast %7 : vector<1x128xf32> to vector<1x1x128xf32>
    %9 = vector.broadcast %8 : vector<1x1x128xf32> to vector<18x24x128xf32>
    %10 = arith.mulf %6, %9 : vector<18x24x128xf32>
    %c0_8 = arith.constant 0 : index
    %c0_9 = arith.constant 0 : index
    %11 = vector.load %arg5[%c0_8, %c0_9] : memref<1x128xf32, #tpu.memory_space<vmem>>, vector<1x128xf32>
    %12 = vector.shape_cast %11 : vector<1x128xf32> to vector<1x1x128xf32>
    %13 = vector.broadcast %12 : vector<1x1x128xf32> to vector<18x24x128xf32>
    %14 = arith.addf %10, %13 : vector<18x24x128xf32>
    %15 = tpu.iota {dimensions = array<i32: 0>} : vector<18x24x1xi32>
    %16 = tpu.iota {dimensions = array<i32: 1>} : vector<18x24x1xi32>
    %c1_i32 = arith.constant 1 : i32
    %17 = arith.subi %0, %c1_i32 : i32
    %18 = vector.broadcast %17 : i32 to vector<18x24x1xi32>
    %19 = arith.addi %15, %18 : vector<18x24x1xi32>
    %c0_i32 = arith.constant 0 : i32
    %20 = vector.broadcast %c0_i32 : i32 to vector<18x24x1xi32>
    %21 = arith.cmpi sge, %19, %20 : vector<18x24x1xi32>
    %c16_i32_10 = arith.constant 16 : i32
    %22 = vector.broadcast %c16_i32_10 : i32 to vector<18x24x1xi32>
    %23 = arith.cmpi slt, %19, %22 : vector<18x24x1xi32>
    %24 = arith.andi %21, %23 : vector<18x24x1xi1>
    %c1_i32_11 = arith.constant 1 : i32
    %25 = vector.broadcast %c1_i32_11 : i32 to vector<18x24x1xi32>
    %26 = arith.cmpi sge, %16, %25 : vector<18x24x1xi32>
    %27 = arith.andi %24, %26 : vector<18x24x1xi1>
    %c16_i32_12 = arith.constant 16 : i32
    %28 = vector.broadcast %c16_i32_12 : i32 to vector<18x24x1xi32>
    %29 = arith.cmpi sle, %16, %28 : vector<18x24x1xi32>
    %30 = arith.andi %27, %29 : vector<18x24x1xi1>
    %cst_13 = arith.constant 0.000000e+00 : f32
    %31 = vector.broadcast %cst_13 : f32 to vector<18x24x128xf32>
    %32 = arith.maximumf %14, %31 : vector<18x24x128xf32>
    %cst_14 = arith.constant 0.000000e+00 : f32
    %33 = vector.shape_cast %30 : vector<18x24x1xi1> to vector<18x24x1xi1>
    %34 = vector.broadcast %33 : vector<18x24x1xi1> to vector<18x24x128xi1>
    %35 = vector.broadcast %cst_14 : f32 to vector<18x24x128xf32>
    %36 = arith.select %34, %32, %35 : vector<18x24x128xi1>, vector<18x24x128xf32>
    %37 = arith.truncf %36 : vector<18x24x128xf32> to vector<18x24x128xbf16>
    %c0_15 = arith.constant 0 : index
    %c0_16 = arith.constant 0 : index
    %c0_17 = arith.constant 0 : index
    %38 = vector.load %arg10[%c0_15, %c0_16, %c0_17] : memref<18x24x128xbf16, #tpu.memory_space<vmem>>, vector<18x24x128xbf16>
    tpu.vector_store %arg10[%c0_15, %c0_16, %c0_17], %37 {strides = array<i32>} : memref<18x24x128xbf16, #tpu.memory_space<vmem>>, vector<18x24x128xbf16>,
    %c0_18 = arith.constant 0 : index
    %c0_19 = arith.constant 0 : index
    %c0_20 = arith.constant 0 : index
    %39 = vector.load %arg10[%c0_18, %c0_19, %c0_20] : memref<18x24x128xbf16, #tpu.memory_space<vmem>>, vector<16x24x128xbf16>
    %40 = vector.extract_strided_slice %39 {offsets = [0, 0, 0], sizes = [16, 16, 128], strides = [1, 1, 1]} : vector<16x24x128xbf16> to vector<16x16x128xbf16>
    %41 = vector.extract_strided_slice %39 {offsets = [0, 1, 0], sizes = [16, 16, 128], strides = [1, 1, 1]} : vector<16x24x128xbf16> to vector<16x16x128xbf16>
    %42 = vector.extract_strided_slice %39 {offsets = [0, 2, 0], sizes = [16, 16, 128], strides = [1, 1, 1]} : vector<16x24x128xbf16> to vector<16x16x128xbf16>
    %43 = tpu.concatenate %40, %41, %42 in 2 : vector<16x16x128xbf16>, vector<16x16x128xbf16>, vector<16x16x128xbf16> -> vector<16x16x384xbf16>
    %44 = vector.shape_cast %43 : vector<16x16x384xbf16> to vector<256x384xbf16>
    %c0_21 = arith.constant 0 : index
    %c0_22 = arith.constant 0 : index
    %c0_23 = arith.constant 0 : index
    %45 = vector.load %arg6[%c0_21, %c0_22, %c0_23] : memref<3x384x128xbf16, #tpu.memory_space<vmem>>, vector<1x384x128xbf16>
    %46 = vector.shape_cast %45 : vector<1x384x128xbf16> to vector<384x128xbf16>
    %cst_24 = arith.constant dense<0.000000e+00> : vector<256x128xf32>
    %47 = tpu.matmul %44, %46, %cst_24 {dimension_numbers = #tpu.dot_dimension_numbers<[1], [0], [0], [1], [0, 0, 1, 1], [], []>} : vector<256x384xbf16>, vector<384x128xbf16>, vector<256x128xf32> -> vector<256x128xf32>
    %c1 = arith.constant 1 : index
    %c0_25 = arith.constant 0 : index
    %c0_26 = arith.constant 0 : index
    %48 = vector.load %arg10[%c1, %c0_25, %c0_26] : memref<18x24x128xbf16, #tpu.memory_space<vmem>>, vector<16x24x128xbf16>
    %49 = vector.extract_strided_slice %48 {offsets = [0, 0, 0], sizes = [16, 16, 128], strides = [1, 1, 1]} : vector<16x24x128xbf16> to vector<16x16x128xbf16>
    %50 = vector.extract_strided_slice %48 {offsets = [0, 1, 0], sizes = [16, 16, 128], strides = [1, 1, 1]} : vector<16x24x128xbf16> to vector<16x16x128xbf16>
    %51 = vector.extract_strided_slice %48 {offsets = [0, 2, 0], sizes = [16, 16, 128], strides = [1, 1, 1]} : vector<16x24x128xbf16> to vector<16x16x128xbf16>
    %52 = tpu.concatenate %49, %50, %51 in 2 : vector<16x16x128xbf16>, vector<16x16x128xbf16>, vector<16x16x128xbf16> -> vector<16x16x384xbf16>
    %53 = vector.shape_cast %52 : vector<16x16x384xbf16> to vector<256x384xbf16>
    %c1_27 = arith.constant 1 : index
    %c0_28 = arith.constant 0 : index
    %c0_29 = arith.constant 0 : index
    %54 = vector.load %arg6[%c1_27, %c0_28, %c0_29] : memref<3x384x128xbf16, #tpu.memory_space<vmem>>, vector<1x384x128xbf16>
    %55 = vector.shape_cast %54 : vector<1x384x128xbf16> to vector<384x128xbf16>
    %cst_30 = arith.constant dense<0.000000e+00> : vector<256x128xf32>
    %56 = tpu.matmul %53, %55, %cst_30 {dimension_numbers = #tpu.dot_dimension_numbers<[1], [0], [0], [1], [0, 0, 1, 1], [], []>} : vector<256x384xbf16>, vector<384x128xbf16>, vector<256x128xf32> -> vector<256x128xf32>
    %57 = arith.addf %47, %56 : vector<256x128xf32>
    %c2 = arith.constant 2 : index
    %c0_31 = arith.constant 0 : index
    %c0_32 = arith.constant 0 : index
    %58 = vector.load %arg10[%c2, %c0_31, %c0_32] : memref<18x24x128xbf16, #tpu.memory_space<vmem>>, vector<16x24x128xbf16>
    %59 = vector.extract_strided_slice %58 {offsets = [0, 0, 0], sizes = [16, 16, 128], strides = [1, 1, 1]} : vector<16x24x128xbf16> to vector<16x16x128xbf16>
    %60 = vector.extract_strided_slice %58 {offsets = [0, 1, 0], sizes = [16, 16, 128], strides = [1, 1, 1]} : vector<16x24x128xbf16> to vector<16x16x128xbf16>
    %61 = vector.extract_strided_slice %58 {offsets = [0, 2, 0], sizes = [16, 16, 128], strides = [1, 1, 1]} : vector<16x24x128xbf16> to vector<16x16x128xbf16>
    %62 = tpu.concatenate %59, %60, %61 in 2 : vector<16x16x128xbf16>, vector<16x16x128xbf16>, vector<16x16x128xbf16> -> vector<16x16x384xbf16>
    %63 = vector.shape_cast %62 : vector<16x16x384xbf16> to vector<256x384xbf16>
    %c2_33 = arith.constant 2 : index
    %c0_34 = arith.constant 0 : index
    %c0_35 = arith.constant 0 : index
    %64 = vector.load %arg6[%c2_33, %c0_34, %c0_35] : memref<3x384x128xbf16, #tpu.memory_space<vmem>>, vector<1x384x128xbf16>
    %65 = vector.shape_cast %64 : vector<1x384x128xbf16> to vector<384x128xbf16>
    %cst_36 = arith.constant dense<0.000000e+00> : vector<256x128xf32>
    %66 = tpu.matmul %63, %65, %cst_36 {dimension_numbers = #tpu.dot_dimension_numbers<[1], [0], [0], [1], [0, 0, 1, 1], [], []>} : vector<256x384xbf16>, vector<384x128xbf16>, vector<256x128xf32> -> vector<256x128xf32>
    %67 = arith.addf %57, %66 : vector<256x128xf32>
    %68 = vector.shape_cast %67 : vector<256x128xf32> to vector<16x16x128xf32>
    %c0_37 = arith.constant 0 : index
    %c0_38 = arith.constant 0 : index
    %69 = vector.load %arg7[%c0_37, %c0_38] : memref<1x128xf32, #tpu.memory_space<vmem>>, vector<1x128xf32>
    %70 = vector.shape_cast %69 : vector<1x128xf32> to vector<1x1x128xf32>
    %71 = vector.broadcast %70 : vector<1x1x128xf32> to vector<16x16x128xf32>
    %72 = arith.mulf %68, %71 : vector<16x16x128xf32>
    %c0_39 = arith.constant 0 : index
    %c0_40 = arith.constant 0 : index
    %73 = vector.load %arg8[%c0_39, %c0_40] : memref<1x128xf32, #tpu.memory_space<vmem>>, vector<1x128xf32>
    %74 = vector.shape_cast %73 : vector<1x128xf32> to vector<1x1x128xf32>
    %75 = vector.broadcast %74 : vector<1x1x128xf32> to vector<16x16x128xf32>
    %76 = arith.addf %72, %75 : vector<16x16x128xf32>
    %cst_41 = arith.constant 0.000000e+00 : f32
    %77 = vector.broadcast %cst_41 : f32 to vector<16x16x128xf32>
    %78 = arith.maximumf %76, %77 : vector<16x16x128xf32>
    %c0_42 = arith.constant 0 : index
    %c0_43 = arith.constant 0 : index
    %c0_44 = arith.constant 0 : index
    %c0_45 = arith.constant 0 : index
    %79 = vector.load %arg9[%c0_42, %c0_43, %c0_44, %c0_45] : memref<1x16x16x128xf32, #tpu.memory_space<vmem>>, vector<1x16x16x128xf32>
    %80 = vector.shape_cast %79 : vector<1x16x16x128xf32> to vector<16x16x128xf32>
    %81 = vector.shape_cast %78 : vector<16x16x128xf32> to vector<1x16x16x128xf32>
    tpu.vector_store %arg9[%c0_42, %c0_43, %c0_44, %c0_45], %81 {strides = array<i32>} : memref<1x16x16x128xf32, #tpu.memory_space<vmem>>, vector<1x16x16x128xf32>,
    return
  }
  func.func @transform_0(%arg0: i32, %arg1: i32) -> (i32, i32, i32, i32, i32) {
    %c0_i32 = arith.constant 0 : i32
    %c0_i32_0 = arith.constant 0 : i32
    %c0_i32_1 = arith.constant 0 : i32
    %c0_i32_2 = arith.constant 0 : i32
    return %arg0, %arg1, %c0_i32, %c0_i32_0, %c0_i32_1 : i32, i32, i32, i32, i32
  }
  func.func @transform_1(%arg0: i32, %arg1: i32) -> (i32, i32) {
    %c0_i32 = arith.constant 0 : i32
    %c0_i32_0 = arith.constant 0 : i32
    %c0_i32_1 = arith.constant 0 : i32
    return %c0_i32, %c0_i32_0 : i32, i32
  }
  func.func @transform_2(%arg0: i32, %arg1: i32) -> (i32, i32) {
    %c0_i32 = arith.constant 0 : i32
    %c0_i32_0 = arith.constant 0 : i32
    %c0_i32_1 = arith.constant 0 : i32
    return %c0_i32, %c0_i32_0 : i32, i32
  }
  func.func @transform_3(%arg0: i32, %arg1: i32) -> (i32, i32) {
    %c0_i32 = arith.constant 0 : i32
    %c0_i32_0 = arith.constant 0 : i32
    %c0_i32_1 = arith.constant 0 : i32
    return %c0_i32, %c0_i32_0 : i32, i32
  }
  func.func @transform_4(%arg0: i32, %arg1: i32) -> (i32, i32, i32) {
    %c0_i32 = arith.constant 0 : i32
    %c0_i32_0 = arith.constant 0 : i32
    %c0_i32_1 = arith.constant 0 : i32
    %c0_i32_2 = arith.constant 0 : i32
    return %c0_i32, %c0_i32_0, %c0_i32_1 : i32, i32, i32
  }
  func.func @transform_5(%arg0: i32, %arg1: i32) -> (i32, i32) {
    %c0_i32 = arith.constant 0 : i32
    %c0_i32_0 = arith.constant 0 : i32
    %c0_i32_1 = arith.constant 0 : i32
    return %c0_i32, %c0_i32_0 : i32, i32
  }
  func.func @transform_6(%arg0: i32, %arg1: i32) -> (i32, i32) {
    %c0_i32 = arith.constant 0 : i32
    %c0_i32_0 = arith.constant 0 : i32
    %c0_i32_1 = arith.constant 0 : i32
    return %c0_i32, %c0_i32_0 : i32, i32
  }
  func.func @transform_7(%arg0: i32, %arg1: i32) -> (i32, i32, i32, i32) {
    %c0_i32 = arith.constant 0 : i32
    %c0_i32_0 = arith.constant 0 : i32
    %c0_i32_1 = arith.constant 0 : i32
    return %arg0, %arg1, %c0_i32, %c0_i32_0 : i32, i32, i32, i32
  }
}

</mosaic_0001>

<bundles_post_ra>
// kernel: double_conv_forward.1
= control target key start
LH: loop header
LB: loop body
LE: loop exit
PB: predicated region body
PF: predicated region fallthrough
CT: control target
= control target key end

     0   :  { %s5590_s24 = smov 0   ;;  %s5592_s25 = smov 0   ;;  %s7107_s0 = inlined_call_operand.vmem [shape: bf16[2,1,18,24,128], index: 0, kind: input, shape index: {}]   ;;  %s7108_s1 = inlined_call_operand.vmem [shape: bf16[128,128], index: 1, kind: input, shape index: {}]   ;;  %s7109_s2 = inlined_call_operand.vmem [shape: f32[1,128], index: 2, kind: input, shape index: {}, may-alias: {2,5}]   ;;  %s7110_s3 = inlined_call_operand.vmem [shape: f32[1,128], index: 3, kind: input, shape index: {}, may-alias: {3,6}]   ;;  %s7111_s4 = inlined_call_operand.vmem [shape: bf16[3,384,128], index: 4, kind: input, shape index: {}]   ;;  %s7112_s5 = inlined_call_operand.vmem [shape: f32[1,128], index: 5, kind: input, shape index: {}, may-alias: {2,5}]   ;;  %s7113_s6 = inlined_call_operand.vmem [shape: f32[1,128], index: 6, kind: input, shape index: {}, may-alias: {3,6}]   ;;  %s7114_s7 = inlined_call_operand.vmem [shape: f32[2,16,16,128], index: 7, kind: output, shape index: {}]  }
   0x1   :  { %s5594_s26 = smov 0  }
   0x2 LB: > { %s29_s27 = sadd.s32 1, %s5543_s25  ;;  %p4417_p0 = scmp.ge.s32.totalorder %s5547_s26, 1  ;;  %s5547_s26 = sphi %s5594_s26, %s17_s26   ;;  %s5543_s25 = sphi %s5592_s25, %s7349_s25   ;;  %s5539_s24 = sphi %s5590_s24, %s7348_s24  }
   0x3   : > { %p31_p1 = scmp.ge.s32.totalorder %s29_s27, 2  ;;  %p257_p2 = scmp.lt.s32.totalorder %s5547_s26, 3 }
   0x5   : > { %s7351_s27 = smov (%p31_p1, %s29_s27), 0  ;;  %p258_p3 = pnand %p4417_p0, %p257_p2 }
   0x7   : > { %261 = sbr.rel (%p258_p3) target bundleno = 1322 (0x52a), region = 48 }
   0xc   : > { %v5174_v0 = vld [vmem:[%s7108_s1 + $0x38] sm:$0xff]  ;;  %v5173_v1 = vld [vmem:[%s7108_s1 + $0x30] sm:$0xff]  ;;  %v5172_v2 = vld [vmem:[%s7108_s1 + $0x28] sm:$0xff]  ;;  %p298_p4 = scmp.lt.s32.totalorder %s5539_s24, 1  ;;  %v5549_v17 = vmov 0.0|0.0   ;;  %v859_v36 = vlaneseq  ;;  %vm1775_vm2 = vcmask 1046528  }
   0xd   : > { %599 = vmatpush.bf16.msra.mxu0 %v5174_v0  ;;  %v5171_v3 = vld [vmem:[%s7108_s1 + $0x20] sm:$0xff]  ;;  %v5170_v4 = vld [vmem:[%s7108_s1 + $0x18] sm:$0xff]  ;;  %v5169_v5 = vld [vmem:[%s7108_s1 + $0x10] sm:$0xff]  ;;  %v5651_v18 = vunpack.c.l.bf16 %v5549_v17  ;;  %vm1566_vm3 = vsmask.f32 7424 }
   0xe   : > { %s7353_s24 = smov (!%p298_p4, %s5539_s24), 1  ;;  %v5168_v6 = vld [vmem:[%s7108_s1 + $0x8] sm:$0xff]  ;;  %v5167_v7 = vld [vmem:[%s7108_s1] sm:$0xff]  ;;  %v5238_v16 = vld [vmem:[%s7111_s4 + $0xf8] sm:$0xff]  ;;  %v5706_v42 = vshrl.u32 %v859_v36, 7 }
   0xf   : > { %s5472_s19 = smul.u32 216, %s7353_s24  ;;  %2546 = vmatpush.bf16.msra.mxu1 %v5238_v16  ;;  %5456 = vmatpush.bf16.msra.mxu3 %v5238_v16  ;;  %v5237_v19 = vld [vmem:[%s7111_s4 + $0xf0] sm:$0xff]  ;;  %v5298_v22 = vpack.c.bf16 %v5651_v18, %v5651_v18  ;;  %v5246_v23 = vld [vmem:[%s7111_s4 + $0x138] sm:$0xff]  ;;  %v5236_v24 = vld [vmem:[%s7111_s4 + $0xe8] sm:$0xff]  ;;  %s5139_s14 = sshll.u32 %s7353_s24, 8 }
  0x10   : > { %2635 = vmatpush.bf16.msra.mxu2 %v5246_v23  ;;  %v5245_v25 = vld [vmem:[%s7111_s4 + $0x130] sm:$0xff]  ;;  %v5235_v26 = vld [vmem:[%s7111_s4 + $0xe0] sm:$0xff]  ;;  %v5244_v28 = vld [vmem:[%s7111_s4 + $0x128] sm:$0xff]  ;;  %vm936_vm0 = vcmp.ge.s32.totalorder %v5706_v42, 1  ;;  %v5723_v54 = vadd.s32 16, %v5706_v42  ;;  %s6794_s17 = scalar_lea.vmem %s7114_s7, %s5139_s14 }
  0x11   : > { %600 = vmatpush.bf16.msra.mxu0 %v5173_v1  ;;  %s5638_s28 = scalar_lea.vmem %s7107_s0, %s5472_s19  ;;  %5299 = vst [vmem:[#allocation2] sm:$0xff] %v5298_v22   ;;  %v5234_v29 = vld [vmem:[%s7111_s4 + $0xd8] sm:$0xff]  ;;  %v5243_v30 = vld [vmem:[%s7111_s4 + $0x120] sm:$0xff]  ;;  %v5233_v31 = vld [vmem:[%s7111_s4 + $0xd0] sm:$0xff] }
  0x12   : > { %v5140_v8 = vld [vmem:[%s5638_s28] sm:$0xff]  ;;  %v5141_v9 = vld [vmem:[%s5638_s28 + $0x8] sm:$0xff]  ;;  %v5142_v10 = vld [vmem:[%s5638_s28 + $0x10] sm:$0xff]  ;;  %5455 = vst [vmem:[#allocation2 + $0xd0] sm:$0xff] %v5298_v22   ;;  %vm995_vm1 = vcmp.le.s32.totalorder %v5723_v54, 16 }
  0x13   : > { %v5143_v11 = vld [vmem:[%s5638_s28 + $0x18] sm:$0xff]  ;;  %v5144_v12 = vld [vmem:[%s5638_s28 + $0x20] sm:$0xff]  ;;  %v5145_v13 = vld [vmem:[%s5638_s28 + $0x28] sm:$0xff]  ;;  %2547 = vmatpush.bf16.msra.mxu1 %v5237_v19  ;;  %5457 = vmatpush.bf16.msra.mxu3 %v5237_v19 }
  0x14   : > { %v5146_v14 = vld [vmem:[%s5638_s28 + $0x30] sm:$0xff]  ;;  %v5147_v15 = vld [vmem:[%s5638_s28 + $0x38] sm:$0xff]  ;;  %v5148_v20 = vld [vmem:[%s5638_s28 + $0x40] sm:$0xff]  ;;  %2636 = vmatpush.bf16.msra.mxu2 %v5245_v25 }
  0x15   : > { %601 = vmatpush.bf16.msra.mxu0 %v5172_v2  ;;  %v5149_v32 = vld [vmem:[%s5638_s28 + $0x48] sm:$0xff]  ;;  %v5242_v34 = vld [vmem:[%s7111_s4 + $0x118] sm:$0xff]  ;;  %v5693_v37 = vld [vmem:[%s7109_s2] ss:$0 sm:$0xff] }
  0x16   : > { %v5232_v35 = vld [vmem:[%s7111_s4 + $0xc8] sm:$0xff]  ;;  %v5241_v38 = vld [vmem:[%s7111_s4 + $0x110] sm:$0xff]  ;;  %v5231_v39 = vld [vmem:[%s7111_s4 + $0xc0] sm:$0xff] }
  0x17   : > { %2548 = vmatpush.bf16.msra.mxu1 %v5236_v24  ;;  %5458 = vmatpush.bf16.msra.mxu3 %v5236_v24  ;;  %v5704_v40 = vld [vmem:[%s7110_s3] ss:$0 sm:$0xff]  ;;  %v5240_v44 = vld [vmem:[%s7111_s4 + $0x108] sm:$0xff]  ;;  %v5150_v49 = vld [vmem:[%s5638_s28 + $0x50] sm:$0xff] }
  0x18   : > { %2637 = vmatpush.bf16.msra.mxu2 %v5244_v28  ;;  %v5239_v47 = vld [vmem:[%s7111_s4 + $0x100] sm:$0xff]  ;;  %v5151_v61 = vld [vmem:[%s5638_s28 + $0x58] sm:$0xff]  ;;  %v5153_v36 = vld [vmem:[%s5638_s28 + $0x68] sm:$0xff] }
  0x19   : > { %602 = vmatpush.bf16.msra.mxu0 %v5171_v3 }
  0x1b   : > { %2549 = vmatpush.bf16.msra.mxu1 %v5235_v26  ;;  %5459 = vmatpush.bf16.msra.mxu3 %v5235_v26 }
  0x1c   : > { %2638 = vmatpush.bf16.msra.mxu2 %v5243_v30 }
  0x1d   : > { %603 = vmatpush.bf16.msra.mxu0 %v5170_v4 }
  0x1f   : > { %2550 = vmatpush.bf16.msra.mxu1 %v5234_v29  ;;  %5460 = vmatpush.bf16.msra.mxu3 %v5234_v29 }
  0x20   : > { %2639 = vmatpush.bf16.msra.mxu2 %v5242_v34 }
  0x21   : > { %604 = vmatpush.bf16.msra.mxu0 %v5169_v5 }
  0x23   : > { %2551 = vmatpush.bf16.msra.mxu1 %v5233_v31  ;;  %5461 = vmatpush.bf16.msra.mxu3 %v5233_v31 }
  0x24   : > { %2640 = vmatpush.bf16.msra.mxu2 %v5241_v38 }
  0x25   : > { %605 = vmatpush.bf16.msra.mxu0 %v5168_v6 }
  0x27   : > { %2552 = vmatpush.bf16.msra.mxu1 %v5232_v35  ;;  %5462 = vmatpush.bf16.msra.mxu3 %v5232_v35 }
  0x28   : > { %2641 = vmatpush.bf16.msra.mxu2 %v5240_v44 }
  0x29   : > { %606 = vmatpush.bf16.msra.mxu0 %v5167_v7 }
  0x2b   : > { %2553 = vmatpush.bf16.msra.mxu1 %v5231_v39  ;;  %5463 = vmatpush.bf16.msra.mxu3 %v5231_v39 }
  0x2c   : > { %607 = vmatmul.bf16.vlgmr.msra.gmra.mxu0 %v5140_v8  ;;  %2642 = vmatpush.bf16.msra.mxu2 %v5239_v47 }
  0x2f   : > { %5464 = vmatpush.bf16.msrb.mxu3 %v5246_v23 }
  0x33   : > { %5465 = vmatpush.bf16.msrb.mxu3 %v5245_v25 }
  0x37   : > { %5466 = vmatpush.bf16.msrb.mxu3 %v5244_v28 }
  0x3b   : > { %5467 = vmatpush.bf16.msrb.mxu3 %v5243_v30 }
  0x3c   : > { %612 = vmatmul.bf16.gmra.mxu0 %v5141_v9 }
  0x3f   : > { %5468 = vmatpush.bf16.msrb.mxu3 %v5242_v34 }
  0x43   : > { %5469 = vmatpush.bf16.msrb.mxu3 %v5241_v38 }
  0x47   : > { %5470 = vmatpush.bf16.msrb.mxu3 %v5240_v44 }
  0x4b   : > { %5471 = vmatpush.bf16.msrb.mxu3 %v5239_v47 }
  0x4c   : > { %617 = vmatmul.bf16.gmra.mxu0 %v5142_v10 }
  0x5c   : > { %622 = vmatmul.bf16.gmra.mxu0 %v5143_v11 }
  0x6c   : > { %627 = vmatmul.bf16.gmra.mxu0 %v5144_v12 }
  0x7c   : > { %632 = vmatmul.bf16.gmra.mxu0 %v5145_v13 }
  0x8c   : > { %637 = vmatmul.bf16.gmra.mxu0 %v5146_v14 }
  0x9c   : > { %642 = vmatmul.bf16.gmra.mxu0 %v5147_v15 }
  0xa9   : > { %v608_v21 = vpop.f32.mrf.mxu0 }
  0xac   : > { %647 = vmatmul.bf16.gmra.mxu0 %v5148_v20  ;;  %v5152_v20 = vld [vmem:[%s5638_s28 + $0x60] sm:$0xff] }
  0xb1   : > { %v610_v27 = vpop.f32.mrf.mxu0 }
  0xb9   : > { %v613_v33 = vpop.f32.mrf.mxu0 }
  0xbc   : > { %652 = vmatmul.bf16.gmra.mxu0 %v5149_v32 }
  0xc1   : > { %v615_v41 = vpop.f32.mrf.mxu0 }
  0xc2   : > { %v750_v43 = vmul.f32 %v5693_v37, %v615_v41 }
  0xc4   : > { %v808_v45 = vadd.f32 %v5704_v40, %v750_v43 }
  0xc6   : > { %v1053_v46 = vmax.f32 %v808_v45, 0.0 }
  0xc8   : > { %v1215_v48 = vsel %vm936_vm0, %v1053_v46, 0.0 }
  0xc9   : > { %v5303_v50 = vpack.c.bf16 %v1215_v48, %v5651_v18  ;;  %v618_v51 = vpop.f32.mrf.mxu0 }
  0xca   : > { %v751_v52 = vmul.f32 %v5693_v37, %v618_v51 }
  0xcb   : > { %5430 = vst [vmem:[#allocation2 + $0x8] sm:$0xff] %v5303_v50  }
  0xcc   : > { %657 = vmatmul.bf16.gmra.mxu0 %v5150_v49  ;;  %v809_v56 = vadd.f32 %v5704_v40, %v751_v52 }
  0xce   : > { %v1054_v59 = vmax.f32 %v809_v56, 0.0 }
  0xd1   : > { %v620_v53 = vpop.f32.mrf.mxu0 }
  0xd2   : > { %v752_v55 = vmul.f32 %v5693_v37, %v620_v53 }
  0xd4   : > { %v810_v57 = vadd.f32 %v5704_v40, %v752_v55 }
  0xd6   : > { %v1055_v58 = vmax.f32 %v810_v57, 0.0 }
  0xd8   : > { %v1217_v60 = vsel %vm995_vm1, %v1055_v58, 0.0 }
  0xd9   : > { %v5308_v62 = vpack.c.bf16 %v1217_v60, %v1054_v59  ;;  %v623_v63 = vpop.f32.mrf.mxu0  ;;  %v5154_v60 = vld [vmem:[%s5638_s28 + $0x70] sm:$0xff] }
  0xda   : > { %v753_v0 = vmul.f32 %v5693_v37, %v623_v63 }
  0xdb   : > { %5431 = vst [vmem:[#allocation2 + $0x10] sm:$0xff] %v5308_v62  }
  0xdc   : > { %662 = vmatmul.bf16.gmra.mxu0 %v5151_v61  ;;  %v811_v1 = vadd.f32 %v5704_v40, %v753_v0 }
  0xde   : > { %v1056_v6 = vmax.f32 %v811_v1, 0.0 }
  0xe0   : > { %v1218_v14 = vsel %vm936_vm0, %v1056_v6, 0.0 }
  0xe1   : > { %v625_v2 = vpop.f32.mrf.mxu0 }
  0xe2   : > { %v754_v3 = vmul.f32 %v5693_v37, %v625_v2  ;;  %v5215_v4 = vld [vmem:[#allocation2 + $0xc] sm:$0xff]  ;;  %v1891_v5 = vld [vmem:[#allocation2 + $0x14] sm:$0xf] }
  0xe3   : > { %v2049_v7 = vunpack.c.l.b16 %v1891_v5  ;;  %2554 = vmatmul.bf16.vlgmr.msra.gmra.mxu1 %v5215_v4  ;;  %v2084_v9 = vshll.u32 %v5215_v4, 16  ;;  %v2082_v12 = vshrl.u32 %v5215_v4, 16  ;;  %v2289_v16 = vrot.slane %v5215_v4, 1 }
  0xe4   : > { %v812_v8 = vadd.f32 %v5704_v40, %v754_v3 }
  0xe5   : > { %v2065_v10 = vpack.c.b16 %v2049_v7, %v2049_v7  ;;  %v2086_v13 = vrot.slane %v2084_v9, 1 }
  0xe6   : > { %v1057_v11 = vmax.f32 %v812_v8, 0.0 }
  0xe7   : > { %v2089_v15 = vshll.u32 %v2065_v10, 16  ;;  %v2290_v17 = vrot.slane %v2065_v10, 1  ;;  %v2087_v21 = vor.u32 %v2086_v13, %v2082_v12 }
  0xe8   : > { %v5313_v19 = vpack.c.bf16 %v1057_v11, %v1218_v14 }
  0xe9   : > { %v628_v22 = vpop.f32.mrf.mxu0  ;;  %v2091_v23 = vrot.slane %v2089_v15, 1  ;;  %v5740_v24 = vsel %vm1775_vm2, %v2289_v16, %v2290_v17 }
  0xea   : > { %5432 = vst [vmem:[#allocation2 + $0x18] sm:$0xff] %v5313_v19   ;;  %v755_v26 = vmul.f32 %v5693_v37, %v628_v22 }
  0xeb   : > { %v2092_v25 = vsel %vm1566_vm3, %v2087_v21, %v2091_v23  ;;  %v5155_v23 = vld [vmem:[%s5638_s28 + $0x78] sm:$0xff] }
  0xec   : > { %667 = vmatmul.bf16.gmra.mxu0 %v5152_v20  ;;  %2643 = vmatmul.bf16.vlgmr.msra.gmra.mxu2 %v2092_v25  ;;  %v813_v27 = vadd.f32 %v5704_v40, %v755_v26 }
  0xee   : > { %v1058_v31 = vmax.f32 %v813_v27, 0.0 }
  0xf0   : > { %v1220_v34 = vsel %vm995_vm1, %v1058_v31, 0.0 }
  0xf1   : > { %v630_v28 = vpop.f32.mrf.mxu0  ;;  %v5216_v29 = vld [vmem:[#allocation2 + $0x18] sm:$0xff] }
  0xf2   : > { %v756_v30 = vmul.f32 %v5693_v37, %v630_v28  ;;  %v2096_v44 = vshll.u32 %v5216_v29, 16  ;;  %v2094_v53 = vshrl.u32 %v5216_v29, 16  ;;  %v2292_v57 = vrot.slane %v5216_v29, 1 }
  0xf3   : > { %2559 = vmatmul.bf16.gmra.mxu1 %v5216_v29 }
  0xf4   : > { %v814_v32 = vadd.f32 %v5704_v40, %v756_v30  ;;  %v2098_v51 = vrot.slane %v2096_v44, 1 }
  0xf6   : > { %v1059_v33 = vmax.f32 %v814_v32, 0.0  ;;  %v2099_v63 = vor.u32 %v2098_v51, %v2094_v53 }
  0xf8   : > { %v1221_v35 = vsel %vm936_vm0, %v1059_v33, 0.0 }
  0xf9   : > { %v5318_v38 = vpack.c.bf16 %v1221_v35, %v1220_v34  ;;  %v633_v39 = vpop.f32.mrf.mxu0 }
  0xfa   : > { %v757_v41 = vmul.f32 %v5693_v37, %v633_v39 }
  0xfb   : > { %5433 = vst [vmem:[#allocation2 + $0x20] sm:$0xff] %v5318_v38  }
  0xfc   : > { %672 = vmatmul.bf16.gmra.mxu0 %v5153_v36  ;;  %v815_v47 = vadd.f32 %v5704_v40, %v757_v41 }
  0xfe   : > { %v1060_v55 = vmax.f32 %v815_v47, 0.0 }
 0x101   : > { %v635_v43 = vpop.f32.mrf.mxu0 }
 0x102   : > { %v758_v45 = vmul.f32 %v5693_v37, %v635_v43  ;;  %v1894_v46 = vld [vmem:[#allocation2 + $0x20] sm:$0xf] }
 0x103   : > { %v2050_v48 = vunpack.c.l.b16 %v1894_v46  ;;  %v5156_v43 = vld [vmem:[%s5638_s28 + $0x80] sm:$0xff] }
 0x104   : > { %v816_v49 = vadd.f32 %v5704_v40, %v758_v45 }
 0x105   : > { %v2066_v50 = vpack.c.b16 %v2050_v48, %v2050_v48 }
 0x106   : > { %v1061_v52 = vmax.f32 %v816_v49, 0.0 }
 0x107   : > { %v2101_v56 = vshll.u32 %v2066_v50, 16  ;;  %v2293_v58 = vrot.slane %v2066_v50, 1 }
 0x108   : > { %v1223_v59 = vsel %vm995_vm1, %v1061_v52, 0.0 }
 0x109   : > { %v5323_v61 = vpack.c.bf16 %v1223_v59, %v1060_v55  ;;  %v638_v62 = vpop.f32.mrf.mxu0  ;;  %v2103_v0 = vrot.slane %v2101_v56, 1  ;;  %v5760_v1 = vsel %vm1775_vm2, %v2292_v57, %v2293_v58 }
 0x10a   : > { %v759_v2 = vmul.f32 %v5693_v37, %v638_v62 }
 0x10b   : > { %5434 = vst [vmem:[#allocation2 + $0x28] sm:$0xff] %v5323_v61   ;;  %v2104_v3 = vsel %vm1566_vm3, %v2099_v63, %v2103_v0  ;;  %v5157_v0 = vld [vmem:[%s5638_s28 + $0x88] sm:$0xff] }
 0x10c   : > { %677 = vmatmul.bf16.gmra.mxu0 %v5154_v60  ;;  %2648 = vmatmul.bf16.gmra.mxu2 %v2104_v3  ;;  %v817_v4 = vadd.f32 %v5704_v40, %v759_v2 }
 0x10e   : > { %v1062_v9 = vmax.f32 %v817_v4, 0.0 }
 0x110   : > { %v1224_v17 = vsel %vm936_vm0, %v1062_v9, 0.0 }
 0x111   : > { %v640_v5 = vpop.f32.mrf.mxu0 }
 0x112   : > { %v760_v6 = vmul.f32 %v5693_v37, %v640_v5  ;;  %v5217_v7 = vld [vmem:[#allocation2 + $0x24] sm:$0xff]  ;;  %v1897_v8 = vld [vmem:[#allocation2 + $0x2c] sm:$0xf] }
 0x113   : > { %v2051_v10 = vunpack.c.l.b16 %v1897_v8  ;;  %2564 = vmatmul.bf16.gmra.mxu1 %v5217_v7  ;;  %v2108_v12 = vshll.u32 %v5217_v7, 16  ;;  %v2106_v15 = vshrl.u32 %v5217_v7, 16  ;;  %v2295_v20 = vrot.slane %v5217_v7, 1 }
 0x114   : > { %v818_v11 = vadd.f32 %v5704_v40, %v760_v6 }
 0x115   : > { %v2067_v13 = vpack.c.b16 %v2051_v10, %v2051_v10  ;;  %v2110_v16 = vrot.slane %v2108_v12, 1 }
 0x116   : > { %v1063_v14 = vmax.f32 %v818_v11, 0.0 }
 0x117   : > { %v2113_v19 = vshll.u32 %v2067_v13, 16  ;;  %v2296_v21 = vrot.slane %v2067_v13, 1  ;;  %v2111_v25 = vor.u32 %v2110_v16, %v2106_v15 }
 0x118   : > { %v5328_v22 = vpack.c.bf16 %v1063_v14, %v1224_v17 }
 0x119   : > { %v643_v26 = vpop.f32.mrf.mxu0  ;;  %v2115_v27 = vrot.slane %v2113_v19, 1  ;;  %v5771_v28 = vsel %vm1775_vm2, %v2295_v20, %v2296_v21 }
 0x11a   : > { %5435 = vst [vmem:[#allocation2 + $0x30] sm:$0xff] %v5328_v22   ;;  %v761_v30 = vmul.f32 %v5693_v37, %v643_v26 }
 0x11b   : > { %v2116_v29 = vsel %vm1566_vm3, %v2111_v25, %v2115_v27 }
 0x11c   : > { %682 = vmatmul.bf16.gmra.mxu0 %v5155_v23  ;;  %2653 = vmatmul.bf16.gmra.mxu2 %v2116_v29  ;;  %v819_v31 = vadd.f32 %v5704_v40, %v761_v30  ;;  %v5158_v30 = vld [vmem:[%s5638_s28 + $0x90] sm:$0xff] }
 0x11e   : > { %v1064_v35 = vmax.f32 %v819_v31, 0.0 }
 0x120   : > { %v1226_v39 = vsel %vm995_vm1, %v1064_v35, 0.0 }
 0x121   : > { %v645_v32 = vpop.f32.mrf.mxu0  ;;  %v5218_v33 = vld [vmem:[#allocation2 + $0x30] sm:$0xff] }
 0x122   : > { %v762_v34 = vmul.f32 %v5693_v37, %v645_v32  ;;  %v2120_v48 = vshll.u32 %v5218_v33, 16  ;;  %v2118_v58 = vshrl.u32 %v5218_v33, 16  ;;  %v2298_v61 = vrot.slane %v5218_v33, 1 }
 0x123   : > { %2569 = vmatmul.bf16.gmra.mxu1 %v5218_v33 }
 0x124   : > { %v820_v36 = vadd.f32 %v5704_v40, %v762_v34  ;;  %v2122_v56 = vrot.slane %v2120_v48, 1 }
 0x126   : > { %v1065_v38 = vmax.f32 %v820_v36, 0.0  ;;  %v2123_v4 = vor.u32 %v2122_v56, %v2118_v58 }
 0x128   : > { %v1227_v41 = vsel %vm936_vm0, %v1065_v38, 0.0 }
 0x129   : > { %v5333_v44 = vpack.c.bf16 %v1227_v41, %v1226_v39  ;;  %v648_v45 = vpop.f32.mrf.mxu0 }
 0x12a   : > { %v763_v46 = vmul.f32 %v5693_v37, %v648_v45 }
 0x12b   : > { %5436 = vst [vmem:[#allocation2 + $0x38] sm:$0xff] %v5333_v44  }
 0x12c   : > { %687 = vmatmul.bf16.gmra.mxu0 %v5156_v43  ;;  %v821_v51 = vadd.f32 %v5704_v40, %v763_v46 }
 0x12e   : > { %v1066_v59 = vmax.f32 %v821_v51, 0.0 }
 0x131   : > { %v650_v47 = vpop.f32.mrf.mxu0 }
 0x132   : > { %v764_v49 = vmul.f32 %v5693_v37, %v650_v47  ;;  %v1900_v50 = vld [vmem:[#allocation2 + $0x38] sm:$0xf] }
 0x133   : > { %v2052_v52 = vunpack.c.l.b16 %v1900_v50 }
 0x134   : > { %v822_v53 = vadd.f32 %v5704_v40, %v764_v49  ;;  %v5159_v49 = vld [vmem:[%s5638_s28 + $0x98] sm:$0xff] }
 0x135   : > { %v2068_v55 = vpack.c.b16 %v2052_v52, %v2052_v52 }
 0x136   : > { %v1067_v57 = vmax.f32 %v822_v53, 0.0 }
 0x137   : > { %v2125_v60 = vshll.u32 %v2068_v55, 16  ;;  %v2299_v62 = vrot.slane %v2068_v55, 1 }
 0x138   : > { %v1229_v63 = vsel %vm995_vm1, %v1067_v57, 0.0 }
 0x139   : > { %v5338_v2 = vpack.c.bf16 %v1229_v63, %v1066_v59  ;;  %v653_v3 = vpop.f32.mrf.mxu0  ;;  %v2127_v5 = vrot.slane %v2125_v60, 1  ;;  %v5791_v6 = vsel %vm1775_vm2, %v2298_v61, %v2299_v62 }
 0x13a   : > { %v765_v7 = vmul.f32 %v5693_v37, %v653_v3 }
 0x13b   : > { %5437 = vst [vmem:[#allocation2 + $0x40] sm:$0xff] %v5338_v2   ;;  %v2128_v8 = vsel %vm1566_vm3, %v2123_v4, %v2127_v5 }
 0x13c   : > { %692 = vmatmul.bf16.gmra.mxu0 %v5157_v0  ;;  %2658 = vmatmul.bf16.gmra.mxu2 %v2128_v8  ;;  %v823_v9 = vadd.f32 %v5704_v40, %v765_v7  ;;  %v5160_v8 = vld [vmem:[%s5638_s28 + $0xa0] sm:$0xff] }
 0x13e   : > { %v1068_v14 = vmax.f32 %v823_v9, 0.0 }
 0x140   : > { %v1230_v23 = vsel %vm936_vm0, %v1068_v14, 0.0 }
 0x141   : > { %v655_v10 = vpop.f32.mrf.mxu0 }
 0x142   : > { %v766_v11 = vmul.f32 %v5693_v37, %v655_v10  ;;  %v5219_v12 = vld [vmem:[#allocation2 + $0x3c] sm:$0xff]  ;;  %v1903_v13 = vld [vmem:[#allocation2 + $0x44] sm:$0xf] }
 0x143   : > { %v2053_v15 = vunpack.c.l.b16 %v1903_v13  ;;  %2574 = vmatmul.bf16.gmra.mxu1 %v5219_v12  ;;  %v2132_v17 = vshll.u32 %v5219_v12, 16  ;;  %v2130_v21 = vshrl.u32 %v5219_v12, 16  ;;  %v2301_v26 = vrot.slane %v5219_v12, 1 }
 0x144   : > { %v824_v16 = vadd.f32 %v5704_v40, %v766_v11 }
 0x145   : > { %v2069_v19 = vpack.c.b16 %v2053_v15, %v2053_v15  ;;  %v2134_v22 = vrot.slane %v2132_v17, 1 }
 0x146   : > { %v1069_v20 = vmax.f32 %v824_v16, 0.0 }
 0x147   : > { %v2137_v25 = vshll.u32 %v2069_v19, 16  ;;  %v2302_v27 = vrot.slane %v2069_v19, 1  ;;  %v2135_v31 = vor.u32 %v2134_v22, %v2130_v21 }
 0x148   : > { %v5343_v29 = vpack.c.bf16 %v1069_v20, %v1230_v23 }
 0x149   : > { %v658_v32 = vpop.f32.mrf.mxu0  ;;  %v2139_v33 = vrot.slane %v2137_v25, 1  ;;  %v5802_v34 = vsel %vm1775_vm2, %v2301_v26, %v2302_v27 }
 0x14a   : > { %5438 = vst [vmem:[#allocation2 + $0x48] sm:$0xff] %v5343_v29   ;;  %v767_v36 = vmul.f32 %v5693_v37, %v658_v32 }
 0x14b   : > { %v2140_v35 = vsel %vm1566_vm3, %v2135_v31, %v2139_v33 }
 0x14c   : > { %697 = vmatmul.bf16.gmra.mxu0 %v5158_v30  ;;  %2663 = vmatmul.bf16.gmra.mxu2 %v2140_v35  ;;  %v825_v38 = vadd.f32 %v5704_v40, %v767_v36 }
 0x14e   : > { %v1070_v44 = vmax.f32 %v825_v38, 0.0 }
 0x150   : > { %v1232_v47 = vsel %vm995_vm1, %v1070_v44, 0.0  ;;  %v5161_v44 = vld [vmem:[%s5638_s28 + $0xa8] sm:$0xff] }
 0x151   : > { %v660_v39 = vpop.f32.mrf.mxu0  ;;  %v5220_v41 = vld [vmem:[#allocation2 + $0x48] sm:$0xff] }
 0x152   : > { %v768_v43 = vmul.f32 %v5693_v37, %v660_v39  ;;  %v2144_v55 = vshll.u32 %v5220_v41, 16  ;;  %v2142_v0 = vshrl.u32 %v5220_v41, 16  ;;  %v2304_v4 = vrot.slane %v5220_v41, 1 }
 0x153   : > { %2579 = vmatmul.bf16.gmra.mxu1 %v5220_v41 }
 0x154   : > { %v826_v45 = vadd.f32 %v5704_v40, %v768_v43  ;;  %v2146_v62 = vrot.slane %v2144_v55, 1 }
 0x156   : > { %v1071_v46 = vmax.f32 %v826_v45, 0.0  ;;  %v2147_v11 = vor.u32 %v2146_v62, %v2142_v0 }
 0x158   : > { %v1233_v48 = vsel %vm936_vm0, %v1071_v46, 0.0 }
 0x159   : > { %v5348_v50 = vpack.c.bf16 %v1233_v48, %v1232_v47  ;;  %v663_v51 = vpop.f32.mrf.mxu0 }
 0x15a   : > { %v769_v52 = vmul.f32 %v5693_v37, %v663_v51 }
 0x15b   : > { %5439 = vst [vmem:[#allocation2 + $0x50] sm:$0xff] %v5348_v50  }
 0x15c   : > { %702 = vmatmul.bf16.gmra.mxu0 %v5159_v49  ;;  %v827_v58 = vadd.f32 %v5704_v40, %v769_v52 }
 0x15e   : > { %v1072_v2 = vmax.f32 %v827_v58, 0.0 }
 0x160   : > { %v2555_v16 = vpop.f32.mrf.mxu1 }
 0x161   : > { %v665_v53 = vpop.f32.mrf.mxu0 }
 0x162   : > { %v770_v56 = vmul.f32 %v5693_v37, %v665_v53  ;;  %v1906_v57 = vld [vmem:[#allocation2 + $0x50] sm:$0xf] }
 0x163   : > { %v2054_v59 = vunpack.c.l.b16 %v1906_v57 }
 0x164   : > { %v828_v60 = vadd.f32 %v5704_v40, %v770_v56 }
 0x165   : > { %v2070_v61 = vpack.c.b16 %v2054_v59, %v2054_v59 }
 0x166   : > { %v1073_v63 = vmax.f32 %v828_v60, 0.0 }
 0x167   : > { %v2149_v3 = vshll.u32 %v2070_v61, 16  ;;  %v2305_v5 = vrot.slane %v2070_v61, 1 }
 0x168   : > { %v1235_v7 = vsel %vm995_vm1, %v1073_v63, 0.0  ;;  %v5841_v56 = vpop.f32.mrf.mxu1  ;;  %v5162_v63 = vld [vmem:[%s5638_s28 + $0xb0] sm:$0xff] }
 0x169   : > { %v5353_v9 = vpack.c.bf16 %v1235_v7, %v1072_v2  ;;  %v668_v10 = vpop.f32.mrf.mxu0  ;;  %v2151_v12 = vrot.slane %v2149_v3, 1  ;;  %v5822_v13 = vsel %vm1775_vm2, %v2304_v4, %v2305_v5  ;;  %7130 = vst [vmem:[#allocation3_spill] sm:$0xff] %v5841_v56 }
 0x16a   : > { %v771_v14 = vmul.f32 %v5693_v37, %v668_v10 }
 0x16b   : > { %5440 = vst [vmem:[#allocation2 + $0x58] sm:$0xff] %v5353_v9   ;;  %v2152_v15 = vsel %vm1566_vm3, %v2147_v11, %v2151_v12 }
 0x16c   : > { %707 = vmatmul.bf16.gmra.mxu0 %v5160_v8  ;;  %2668 = vmatmul.bf16.gmra.mxu2 %v2152_v15  ;;  %v829_v17 = vadd.f32 %v5704_v40, %v771_v14 }
 0x16e   : > { %v1074_v26 = vmax.f32 %v829_v17, 0.0 }
 0x16f   : > { %v2644_v19 = vpop.f32.mrf.mxu2 }
 0x170   : > { %v5827_v20 = vadd.f32 %v2644_v19, %v2555_v16  ;;  %v1236_v36 = vsel %vm936_vm0, %v1074_v26, 0.0  ;;  %v2560_v3 = vpop.f32.mrf.mxu1 }
 0x171   : > { %v670_v21 = vpop.f32.mrf.mxu0 }
 0x172   : > { %v772_v22 = vmul.f32 %v5693_v37, %v670_v21  ;;  %v5221_v23 = vld [vmem:[#allocation2 + $0x54] sm:$0xff]  ;;  %v1909_v25 = vld [vmem:[#allocation2 + $0x5c] sm:$0xf] }
 0x173   : > { %v2055_v27 = vunpack.c.l.b16 %v1909_v25  ;;  %2584 = vmatmul.bf16.gmra.mxu1 %v5221_v23  ;;  %v2156_v30 = vshll.u32 %v5221_v23, 16  ;;  %v2154_v33 = vshrl.u32 %v5221_v23, 16  ;;  %v2307_v39 = vrot.slane %v5221_v23, 1 }
 0x174   : > { %v830_v29 = vadd.f32 %v5704_v40, %v772_v22 }
 0x175   : > { %v2071_v31 = vpack.c.b16 %v2055_v27, %v2055_v27  ;;  %v2158_v35 = vrot.slane %v2156_v30, 1 }
 0x176   : > { %v1075_v32 = vmax.f32 %v830_v29, 0.0 }
 0x177   : > { %v2161_v38 = vshll.u32 %v2071_v31, 16  ;;  %v2308_v41 = vrot.slane %v2071_v31, 1  ;;  %v2159_v45 = vor.u32 %v2158_v35, %v2154_v33  ;;  %v5844_v60 = vpop.f32.mrf.mxu2  ;;  %v5163_v31 = vld [vmem:[%s5638_s28 + $0xb8] sm:$0xff] }
 0x178   : > { %v5358_v43 = vpack.c.bf16 %v1075_v32, %v1236_v36  ;;  %7131 = vst [vmem:[#allocation4_spill] sm:$0xff] %v5844_v60  ;;  %v5857_v22 = vpop.f32.mrf.mxu1 }
 0x179   : > { %v673_v46 = vpop.f32.mrf.mxu0  ;;  %v2163_v47 = vrot.slane %v2161_v38, 1  ;;  %v5835_v48 = vsel %vm1775_vm2, %v2307_v39, %v2308_v41  ;;  %7132 = vst [vmem:[#allocation5_spill] sm:$0xff] %v5857_v22 }
 0x17a   : > { %5441 = vst [vmem:[#allocation2 + $0x60] sm:$0xff] %v5358_v43   ;;  %v773_v50 = vmul.f32 %v5693_v37, %v673_v46  ;;  %v5278_v43 = vld [vmem:[%s7111_s4 + $0x1b8] sm:$0xff] }
 0x17b   : > { %v2164_v49 = vsel %vm1566_vm3, %v2159_v45, %v2163_v47  ;;  %3882 = vmatpush.bf16.msrb.mxu0 %v5278_v43  ;;  %v5277_v47 = vld [vmem:[%s7111_s4 + $0x1b0] sm:$0xff]  ;;  %v5204_v43 = vld [vmem:[%s7111_s4 + $0x68] sm:$0xff] }
 0x17c   : > { %712 = vmatmul.bf16.gmra.mxu0 %v5161_v44  ;;  %2673 = vmatmul.bf16.gmra.mxu2 %v2164_v49  ;;  %v831_v51 = vadd.f32 %v5704_v40, %v773_v50 }
 0x17e   : > { %v1076_v57 = vmax.f32 %v831_v51, 0.0 }
 0x17f   : > { %3883 = vmatpush.bf16.msrb.mxu0 %v5277_v47 }
 0x180   : > { %v1238_v61 = vsel %vm995_vm1, %v1076_v57, 0.0 }
 0x181   : > { %v675_v52 = vpop.f32.mrf.mxu0  ;;  %v5222_v53 = vld [vmem:[#allocation2 + $0x60] sm:$0xff] }
 0x182   : > { %v774_v55 = vmul.f32 %v5693_v37, %v675_v52  ;;  %v2168_v9 = vshll.u32 %v5222_v53, 16  ;;  %v2166_v21 = vshrl.u32 %v5222_v53, 16  ;;  %v2310_v27 = vrot.slane %v5222_v53, 1 }
 0x183   : > { %2589 = vmatmul.bf16.gmra.mxu1 %v5222_v53 }
 0x184   : > { %v832_v58 = vadd.f32 %v5704_v40, %v774_v55  ;;  %v2170_v17 = vrot.slane %v2168_v9, 1  ;;  %v5197_v9 = vld [vmem:[%s7111_s4 + $0x30] sm:$0xff] }
 0x186   : > { %v1077_v59 = vmax.f32 %v832_v58, 0.0  ;;  %v2171_v35 = vor.u32 %v2170_v17, %v2166_v21  ;;  %v5276_v58 = vld [vmem:[%s7111_s4 + $0x1a8] sm:$0xff] }
 0x187   : > { %3884 = vmatpush.bf16.msrb.mxu0 %v5276_v58 }
 0x188   : > { %v1239_v62 = vsel %vm936_vm0, %v1077_v59, 0.0  ;;  %v5198_v59 = vld [vmem:[%s7111_s4 + $0x38] sm:$0xff] }
 0x189   : > { %v5363_v0 = vpack.c.bf16 %v1239_v62, %v1238_v61  ;;  %v678_v2 = vpop.f32.mrf.mxu0  ;;  %2957 = vmatpush.bf16.msrb.mxu1 %v5198_v59  ;;  %v5165_v59 = vld [vmem:[%s5638_s28 + $0xc8] sm:$0xff] }
 0x18a   : > { %v775_v4 = vmul.f32 %v5693_v37, %v678_v2 }
 0x18b   : > { %5442 = vst [vmem:[#allocation2 + $0x68] sm:$0xff] %v5363_v0  }
 0x18c   : > { %717 = vmatmul.bf16.gmra.mxu0 %v5162_v63  ;;  %v833_v12 = vadd.f32 %v5704_v40, %v775_v4 }
 0x18d   : > { %2958 = vmatpush.bf16.msrb.mxu1 %v5197_v9 }
 0x18e   : > { %v1078_v23 = vmax.f32 %v833_v12, 0.0 }
 0x18f   : > { %v2649_v5 = vpop.f32.mrf.mxu2 }
 0x190   : > { %v5852_v7 = vadd.f32 %v2649_v5, %v2560_v3  ;;  %v2565_v44 = vpop.f32.mrf.mxu1 }
 0x191   : > { %v680_v8 = vpop.f32.mrf.mxu0 }
 0x192   : > { %v776_v10 = vmul.f32 %v5693_v37, %v680_v8  ;;  %v1912_v11 = vld [vmem:[#allocation2 + $0x68] sm:$0xf]  ;;  %v5275_v8 = vld [vmem:[%s7111_s4 + $0x1a0] sm:$0xff] }
 0x193   : > { %v2056_v14 = vunpack.c.l.b16 %v1912_v11  ;;  %3885 = vmatpush.bf16.msrb.mxu0 %v5275_v8  ;;  %v5191_v8 = vld [vmem:[%s7111_s4] sm:$0xff] }
 0x194   : > { %v834_v15 = vadd.f32 %v5704_v40, %v776_v10 }
 0x195   : > { %v2072_v16 = vpack.c.b16 %v2056_v14, %v2056_v14  ;;  %v5164_v14 = vld [vmem:[%s5638_s28 + $0xc0] sm:$0xff] }
 0x196   : > { %v1079_v19 = vmax.f32 %v834_v15, 0.0 }
 0x197   : > { %v5859_v25 = vpop.f32.mrf.mxu2  ;;  %v2173_v26 = vshll.u32 %v2072_v16, 16  ;;  %v2311_v29 = vrot.slane %v2072_v16, 1 }
 0x198   : > { %7133 = vst [vmem:[#allocation6_spill] sm:$0xff] %v5859_v25  ;;  %v1241_v30 = vsel %vm995_vm1, %v1079_v19, 0.0  ;;  %v1394_v25 = vld [vmem:[#allocation2 + $0x50] sm:$0xf] }
 0x199   : > { %v5368_v32 = vpack.c.bf16 %v1241_v30, %v1078_v23  ;;  %v683_v33 = vpop.f32.mrf.mxu0  ;;  %v2175_v36 = vrot.slane %v2173_v26, 1  ;;  %v5865_v38 = vsel %vm1775_vm2, %v2310_v27, %v2311_v29  ;;  %v5206_v23 = vld [vmem:[%s7111_s4 + $0x78] sm:$0xff]  ;;  %v5196_v27 = vld [vmem:[%s7111_s4 + $0x28] sm:$0xff]  ;;  %v5205_v30 = vld [vmem:[%s7111_s4 + $0x70] sm:$0xff]  ;;  %v1540_v42 = vunpack.c.l.b16 %v1394_v25 }
 0x19a   : > { %v777_v39 = vmul.f32 %v5693_v37, %v683_v33  ;;  %v5274_v26 = vld [vmem:[%s7111_s4 + $0x198] sm:$0xff]  ;;  %3046 = vmatpush.bf16.msrb.mxu2 %v5206_v23  ;;  %2959 = vmatpush.bf16.msrb.mxu1 %v5196_v27 }
 0x19b   : > { %5443 = vst [vmem:[#allocation2 + $0x70] sm:$0xff] %v5368_v32   ;;  %v2176_v41 = vsel %vm1566_vm3, %v2171_v35, %v2175_v36  ;;  %3886 = vmatpush.bf16.msrb.mxu0 %v5274_v26  ;;  %v5195_v32 = vld [vmem:[%s7111_s4 + $0x20] sm:$0xff] }
 0x19c   : > { %722 = vmatmul.bf16.gmra.mxu0 %v5163_v31  ;;  %2678 = vmatmul.bf16.gmra.mxu2 %v2176_v41  ;;  %v835_v45 = vadd.f32 %v5704_v40, %v777_v39  ;;  %v5273_v31 = vld [vmem:[%s7111_s4 + $0x190] sm:$0xff]  ;;  %v5922_v41 = vpop.f32.mrf.mxu1 }
 0x19d   : > { %7134 = vst [vmem:[#allocation7_spill] sm:$0xff] %v5922_v41 }
 0x19e   : > { %v1080_v55 = vmax.f32 %v835_v45, 0.0  ;;  %3047 = vmatpush.bf16.msrb.mxu2 %v5205_v30  ;;  %2960 = vmatpush.bf16.msrb.mxu1 %v5195_v32  ;;  %v5194_v45 = vld [vmem:[%s7111_s4 + $0x18] sm:$0xff] }
 0x19f   : > { %v2654_v46 = vpop.f32.mrf.mxu2  ;;  %3887 = vmatpush.bf16.msrb.mxu0 %v5273_v31 }
 0x1a0   : > { %v5876_v49 = vadd.f32 %v2654_v46, %v2565_v44  ;;  %v1242_v4 = vsel %vm936_vm0, %v1080_v55, 0.0  ;;  %v5272_v44 = vld [vmem:[%s7111_s4 + $0x188] sm:$0xff]  ;;  %v5193_v55 = vld [vmem:[%s7111_s4 + $0x10] sm:$0xff] }
 0x1a1   : > { %v685_v50 = vpop.f32.mrf.mxu0 }
 0x1a2   : > { %v778_v51 = vmul.f32 %v5693_v37, %v685_v50  ;;  %v5223_v52 = vld [vmem:[#allocation2 + $0x6c] sm:$0xff]  ;;  %v1915_v53 = vld [vmem:[#allocation2 + $0x74] sm:$0xf]  ;;  %3048 = vmatpush.bf16.msrb.mxu2 %v5204_v43  ;;  %2961 = vmatpush.bf16.msrb.mxu1 %v5194_v45 }
 0x1a3   : > { %v2057_v57 = vunpack.c.l.b16 %v1915_v53  ;;  %2594 = vmatmul.bf16.gmra.mxu1 %v5223_v52  ;;  %v2180_v62 = vshll.u32 %v5223_v52, 16  ;;  %v2178_v2 = vshrl.u32 %v5223_v52, 16  ;;  %v2313_v10 = vrot.slane %v5223_v52, 1  ;;  %3888 = vmatpush.bf16.msrb.mxu0 %v5272_v44  ;;  %v5203_v52 = vld [vmem:[%s7111_s4 + $0x60] sm:$0xff]  ;;  %v5166_v45 = vld [vmem:[%s5638_s28 + $0xd0] sm:$0xff] }
 0x1a4   : > { %v836_v61 = vadd.f32 %v5704_v40, %v778_v51  ;;  %v5271_v53 = vld [vmem:[%s7111_s4 + $0x180] sm:$0xff] }
 0x1a5   : > { %v2073_v63 = vpack.c.b16 %v2057_v57, %v2057_v57  ;;  %v2182_v3 = vrot.slane %v2180_v62, 1 }
 0x1a6   : > { %v1081_v0 = vmax.f32 %v836_v61, 0.0  ;;  %3049 = vmatpush.bf16.msrb.mxu2 %v5203_v52  ;;  %2962 = vmatpush.bf16.msrb.mxu1 %v5193_v55 }
 0x1a7   : > { %v2185_v5 = vshll.u32 %v2073_v63, 16  ;;  %v2314_v11 = vrot.slane %v2073_v63, 1  ;;  %v2183_v15 = vor.u32 %v2182_v3, %v2178_v2  ;;  %v5935_v51 = vpop.f32.mrf.mxu2  ;;  %3889 = vmatpush.bf16.msrb.mxu0 %v5271_v53  ;;  %v5202_v63 = vld [vmem:[%s7111_s4 + $0x58] sm:$0xff]  ;;  %v2570_v2 = vpop.f32.mrf.mxu1 }
 0x1a8   : > { %v5373_v12 = vpack.c.bf16 %v1081_v0, %v1242_v4  ;;  %7135 = vst [vmem:[#allocation8_spill] sm:$0xff] %v5935_v51  ;;  %v5192_v0 = vld [vmem:[%s7111_s4 + $0x8] sm:$0xff] }
 0x1a9   : > { %v688_v16 = vpop.f32.mrf.mxu0  ;;  %v2187_v17 = vrot.slane %v2185_v5, 1  ;;  %v5896_v19 = vsel %vm1775_vm2, %v2313_v10, %v2314_v11  ;;  %v5201_v5 = vld [vmem:[%s7111_s4 + $0x50] sm:$0xff] }
 0x1aa   : > { %5444 = vst [vmem:[#allocation2 + $0x78] sm:$0xff] %v5373_v12   ;;  %v779_v29 = vmul.f32 %v5693_v37, %v688_v16  ;;  %3050 = vmatpush.bf16.msrb.mxu2 %v5202_v63  ;;  %2963 = vmatpush.bf16.msrb.mxu1 %v5192_v0 }
 0x1ab   : > { %v2188_v21 = vsel %vm1566_vm3, %v2183_v15, %v2187_v17  ;;  %v5200_v17 = vld [vmem:[%s7111_s4 + $0x48] sm:$0xff] }
 0x1ac   : > { %727 = vmatmul.bf16.gmra.mxu0 %v5164_v14  ;;  %2683 = vmatmul.bf16.gmra.mxu2 %v2188_v21  ;;  %v837_v33 = vadd.f32 %v5704_v40, %v779_v29 }
 0x1ae   : > { %v1082_v46 = vmax.f32 %v837_v33, 0.0  ;;  %3051 = vmatpush.bf16.msrb.mxu2 %v5201_v5  ;;  %2964 = vmatpush.bf16.msrb.mxu1 %v5191_v8 }
 0x1af   : > { %v5974_v30 = vpop.f32.mrf.mxu1 }
 0x1b0   : > { %v1244_v57 = vsel %vm995_vm1, %v1082_v46, 0.0  ;;  %7136 = vst [vmem:[#allocation9_spill] sm:$0xff] %v5974_v30 }
 0x1b1   : > { %v690_v35 = vpop.f32.mrf.mxu0  ;;  %v5919_v36 = vld [vmem:[#allocation2 + $0x78] sm:$0xff] }
 0x1b2   : > { %v780_v39 = vmul.f32 %v5693_v37, %v690_v35  ;;  %v2192_v11 = vshll.u32 %v5919_v36, 16  ;;  %3052 = vmatpush.bf16.msrb.mxu2 %v5200_v17  ;;  %v2190_v29 = vshrl.u32 %v5919_v36, 16  ;;  %v5199_v35 = vld [vmem:[%s7111_s4 + $0x40] sm:$0xff] }
 0x1b3   : > { %2599 = vmatmul.bf16.gmra.mxu1 %v5919_v36 }
 0x1b4   : > { %v838_v47 = vadd.f32 %v5704_v40, %v780_v39  ;;  %v2194_v26 = vrot.slane %v2192_v11, 1  ;;  %v2316_v39 = vrot.slane %v5919_v36, 1 }
 0x1b6   : > { %v1083_v50 = vmax.f32 %v838_v47, 0.0  ;;  %3053 = vmatpush.bf16.msrb.mxu2 %v5199_v35  ;;  %v5255_v35 = vld [vmem:[#allocation2 + $0x18] sm:$0xff] }
 0x1b8   : > { %v1245_v58 = vsel %vm936_vm0, %v1083_v50, 0.0  ;;  %v2195_v50 = vor.u32 %v2194_v26, %v2190_v29 }
 0x1b9   : > { %v5378_v61 = vpack.c.bf16 %v1245_v58, %v1244_v57  ;;  %v693_v62 = vpop.f32.mrf.mxu0 }
 0x1ba   : > { %v781_v3 = vmul.f32 %v5693_v37, %v693_v62 }
 0x1bb   : > { %5445 = vst [vmem:[#allocation2 + $0x80] sm:$0xff] %v5378_v61  }
 0x1bc   : > { %732 = vmatmul.bf16.gmra.mxu0 %v5165_v59  ;;  %v839_v15 = vadd.f32 %v5704_v40, %v781_v3 }
 0x1be   : > { %v1084_v31 = vmax.f32 %v839_v15, 0.0 }
 0x1bf   : > { %v2659_v4 = vpop.f32.mrf.mxu2 }
 0x1c0   : > { %v5964_v9 = vadd.f32 %v2659_v4, %v2570_v2  ;;  %v2575_v36 = vpop.f32.mrf.mxu1 }
 0x1c1   : > { %v695_v10 = vpop.f32.mrf.mxu0 }
 0x1c2   : > { %v782_v12 = vmul.f32 %v5693_v37, %v695_v10  ;;  %v1918_v14 = vld [vmem:[#allocation2 + $0x80] sm:$0xf] }
 0x1c3   : > { %v2058_v16 = vunpack.c.l.b16 %v1918_v14 }
 0x1c4   : > { %v840_v21 = vadd.f32 %v5704_v40, %v782_v12 }
 0x1c5   : > { %v2074_v23 = vpack.c.b16 %v2058_v16, %v2058_v16 }
 0x1c6   : > { %v1085_v27 = vmax.f32 %v840_v21, 0.0 }
 0x1c7   : > { %v5976_v32 = vpop.f32.mrf.mxu2  ;;  %v2197_v33 = vshll.u32 %v2074_v23, 16  ;;  %v2317_v43 = vrot.slane %v2074_v23, 1 }
 0x1c8   : > { %7137 = vst [vmem:[#allocation10_spill] sm:$0xff] %v5976_v32  ;;  %v1247_v44 = vsel %vm995_vm1, %v1085_v27, 0.0  ;;  %v1376_v27 = vld [vmem:[#allocation2 + $0x8] sm:$0xf] }
 0x1c9   : > { %v5383_v46 = vpack.c.bf16 %v1247_v44, %v1084_v31  ;;  %v698_v47 = vpop.f32.mrf.mxu0  ;;  %v2199_v52 = vrot.slane %v2197_v33, 1  ;;  %v5986_v53 = vsel %vm1775_vm2, %v2316_v39, %v2317_v43  ;;  %v5175_v43 = vld [vmem:[#allocation2] sm:$0xff]  ;;  %v1534_v44 = vunpack.c.l.b16 %v1376_v27 }
 0x1ca   : > { %v783_v55 = vmul.f32 %v5693_v37, %v698_v47  ;;  %v1570_v47 = vshll.u32 %v5175_v43, 16 }
 0x1cb   : > { %5446 = vst [vmem:[#allocation2 + $0x88] sm:$0xff] %v5383_v46   ;;  %v2200_v57 = vsel %vm1566_vm3, %v2195_v50, %v2199_v52  ;;  %v6002_v46 = vpack.c.b16 %v1534_v44, %v1534_v44 }
 0x1cc   : > { %737 = vmatmul.bf16.gmra.mxu0 %v5166_v45  ;;  %2688 = vmatmul.bf16.gmra.mxu2 %v2200_v57  ;;  %v841_v58 = vadd.f32 %v5704_v40, %v783_v55  ;;  %v6010_v57 = vld [vmem:[%s7109_s2] ss:$0 sm:$0xff] }
 0x1ce   : > { %v1086_v3 = vmax.f32 %v841_v58, 0.0  ;;  %v6013_v58 = vpop.f32.mrf.mxu1 }
 0x1cf   : > { %v2664_v59 = vpop.f32.mrf.mxu2  ;;  %7138 = vst [vmem:[#allocation11_spill] sm:$0xff] %v6013_v58 }
 0x1d0   : > { %v5991_v61 = vadd.f32 %v2664_v59, %v2575_v36  ;;  %v1248_v15 = vsel %vm936_vm0, %v1086_v3, 0.0  ;;  %v1572_v59 = vrot.slane %v1570_v47, 1 }
 0x1d1   : > { %v700_v62 = vpop.f32.mrf.mxu0 }
 0x1d2   : > { %v784_v63 = vmul.f32 %v5693_v37, %v700_v62  ;;  %v5225_v0 = vld [vmem:[#allocation2 + $0x84] sm:$0xff]  ;;  %v1921_v2 = vld [vmem:[#allocation2 + $0x8c] sm:$0xf]  ;;  %v1575_v62 = vshll.u32 %v6002_v46, 16 }
 0x1d3   : > { %v2059_v4 = vunpack.c.l.b16 %v1921_v2  ;;  %2604 = vmatmul.bf16.gmra.mxu1 %v5225_v0  ;;  %v2204_v8 = vshll.u32 %v5225_v0, 16  ;;  %v2202_v12 = vshrl.u32 %v5225_v0, 16  ;;  %v2319_v17 = vrot.slane %v5225_v0, 1 }
 0x1d4   : > { %v842_v5 = vadd.f32 %v5704_v40, %v784_v63 }
 0x1d5   : > { %v2075_v10 = vpack.c.b16 %v2059_v4, %v2059_v4  ;;  %v2206_v14 = vrot.slane %v2204_v8, 1 }
 0x1d6   : > { %v1087_v11 = vmax.f32 %v842_v5, 0.0  ;;  %v1577_v5 = vrot.slane %v1575_v62, 1 }
 0x1d7   : > { %v2209_v16 = vshll.u32 %v2075_v10, 16  ;;  %v2320_v21 = vrot.slane %v2075_v10, 1  ;;  %v2207_v26 = vor.u32 %v2206_v14, %v2202_v12  ;;  %v6023_v3 = vpop.f32.mrf.mxu2 }
 0x1d8   : > { %v5388_v23 = vpack.c.bf16 %v1087_v11, %v1248_v15  ;;  %7139 = vst [vmem:[#allocation12_spill] sm:$0xff] %v6023_v3  ;;  %v1379_v11 = vld [vmem:[#allocation2 + $0x14] sm:$0xf]  ;;  %v5256_v15 = vld [vmem:[#allocation2 + $0x24] sm:$0xff] }
 0x1d9   : > { %v703_v29 = vpop.f32.mrf.mxu0  ;;  %v2211_v31 = vrot.slane %v2209_v16, 1  ;;  %v5998_v33 = vsel %vm1775_vm2, %v2319_v17, %v2320_v21  ;;  %v5176_v16 = vld [vmem:[#allocation2 + $0xc] sm:$0xff]  ;;  %v1535_v21 = vunpack.c.l.b16 %v1379_v11 }
 0x1da   : > { %5447 = vst [vmem:[#allocation2 + $0x90] sm:$0xff] %v5388_v23   ;;  %v785_v45 = vmul.f32 %v5693_v37, %v703_v29  ;;  %v1568_v37 = vshrl.u32 %v5175_v43, 16  ;;  %v2580_v23 = vpop.f32.mrf.mxu1 }
 0x1db   : > { %v2212_v39 = vsel %vm1566_vm3, %v2207_v26, %v2211_v31  ;;  %v1582_v26 = vshll.u32 %v5176_v16, 16  ;;  %v6031_v31 = vpack.c.b16 %v1535_v21, %v1535_v21 }
 0x1dc   : > { %2693 = vmatmul.bf16.gmra.mxu2 %v2212_v39  ;;  %3890 = vmatmul.bf16.vlgmr.msrb.gmra.mxu0 %v5255_v35  ;;  %v843_v50 = vadd.f32 %v5704_v40, %v785_v45  ;;  %v6020_v40 = vld [vmem:[%s7110_s3] ss:$0 sm:$0xff]  ;;  %v1573_v4 = vor.u32 %v1572_v59, %v1568_v37  ;;  %v1580_v37 = vshrl.u32 %v5176_v16, 16 }
 0x1dd   : > { %v1584_v44 = vrot.slane %v1582_v26, 1 }
 0x1de   : > { %v1088_v63 = vmax.f32 %v843_v50, 0.0  ;;  %v1578_v17 = vsel %vm1566_vm3, %v1573_v4, %v1577_v5  ;;  %v1587_v50 = vshll.u32 %v6031_v31, 16 }
 0x1e0   : > { %v1250_v8 = vsel %vm995_vm1, %v1088_v63, 0.0  ;;  %v1585_v63 = vor.u32 %v1584_v44, %v1580_v37  ;;  %v1589_v5 = vrot.slane %v1587_v50, 1 }
 0x1e1   : > { %v705_v52 = vpop.f32.mrf.mxu0  ;;  %v6005_v55 = vld [vmem:[#allocation2 + $0x90] sm:$0xff] }
 0x1e2   : > { %v786_v36 = vmul.f32 %v6010_v57, %v705_v52  ;;  %2609 = vmatmul.bf16.vlgmr.msra.gmra.mxu3 %v6005_v55  ;;  %v2214_v56 = vshrl.u32 %v6005_v55, 16 }
 0x1e3   : > { %2965 = vmatmul.bf16.vlgmr.msrb.gmra.mxu1 %v5175_v43 }
 0x1e4   : > { %v844_v0 = vadd.f32 %v6020_v40, %v786_v36 }
 0x1e6   : > { %v1089_v2 = vmax.f32 %v844_v0, 0.0  ;;  %v6041_v0 = vpop.f32.mrf.mxu1 }
 0x1e7   : > { %7140 = vst [vmem:[#allocation13_spill] sm:$0xff] %v6041_v0 }
 0x1e8   : > { %v1251_v10 = vsel %vm936_vm0, %v1089_v2, 0.0 }
 0x1e9   : > { %v5393_v12 = vpack.c.bf16 %v1251_v10, %v1250_v8  ;;  %v708_v14 = vpop.f32.mrf.mxu0  ;;  %v2322_v8 = vrot.slane %v6005_v55, 1 }
 0x1ea   : > { %v787_v27 = vmul.f32 %v6010_v57, %v708_v14 }
 0x1eb   : > { %5448 = vst [vmem:[#allocation2 + $0x98] sm:$0xff] %v5393_v12   ;;  %v1382_v12 = vld [vmem:[#allocation2 + $0x20] sm:$0xf] }
 0x1ec   : > { %3054 = vmatmul.bf16.vlgmr.msrb.gmra.mxu2 %v1578_v17  ;;  %3895 = vmatmul.bf16.gmra.mxu0 %v5256_v15  ;;  %v845_v47 = vadd.f32 %v6020_v40, %v787_v27  ;;  %v5257_v17 = vld [vmem:[#allocation2 + $0x30] sm:$0xff]  ;;  %v1536_v26 = vunpack.c.l.b16 %v1382_v12  ;;  %v5177_v27 = vld [vmem:[#allocation2 + $0x18] sm:$0xff] }
 0x1ed   : > { %v1594_v50 = vshll.u32 %v5177_v27, 16  ;;  %v1592_v12 = vshrl.u32 %v5177_v27, 16 }
 0x1ee   : > { %v1090_v2 = vmax.f32 %v845_v47, 0.0  ;;  %v6055_v44 = vpack.c.b16 %v1536_v26, %v1536_v26  ;;  %v1385_v26 = vld [vmem:[#allocation2 + $0x2c] sm:$0xf] }
 0x1ef   : > { %v2669_v29 = vpop.f32.mrf.mxu2 }
 0x1f0   : > { %v6033_v35 = vadd.f32 %v2669_v29, %v2580_v23  ;;  %v1590_v23 = vsel %vm1566_vm3, %v1585_v63, %v1589_v5  ;;  %v2585_v29 = vpop.f32.mrf.mxu1  ;;  %v1599_v63 = vshll.u32 %v6055_v44, 16 }
 0x1f1   : > { %v710_v39 = vpop.f32.mrf.mxu0 }
 0x1f2   : > { %v788_v43 = vmul.f32 %v6010_v57, %v710_v39  ;;  %v1924_v45 = vld [vmem:[#allocation2 + $0x98] sm:$0xf] }
 0x1f3   : > { %v2060_v52 = vunpack.c.l.b16 %v1924_v45  ;;  %2970 = vmatmul.bf16.gmra.mxu1 %v5176_v16 }
 0x1f4   : > { %v846_v36 = vadd.f32 %v6020_v40, %v788_v43 }
 0x1f5   : > { %v6039_v59 = vpack.c.b16 %v2060_v52, %v2060_v52 }
 0x1f6   : > { %v1091_v62 = vmax.f32 %v846_v36, 0.0 }
 0x1f7   : > { %v6043_v4 = vpop.f32.mrf.mxu2  ;;  %v2323_v10 = vrot.slane %v6039_v59, 1 }
 0x1f8   : > { %7141 = vst [vmem:[#allocation14_spill] sm:$0xff] %v6043_v4  ;;  %v1253_v11 = vsel %vm995_vm1, %v1091_v62, 0.0 }
 0x1f9   : > { %v5398_v14 = vpack.c.bf16 %v1253_v11, %v1090_v2  ;;  %v713_v15 = vpop.f32.mrf.mxu0  ;;  %v6050_v16 = vsel %vm1775_vm2, %v2322_v8, %v2323_v10  ;;  %v1596_v8 = vrot.slane %v1594_v50, 1  ;;  %v5178_v50 = vld [vmem:[#allocation2 + $0x24] sm:$0xff] }
 0x1fa   : > { %v789_v21 = vmul.f32 %v6010_v57, %v713_v15  ;;  %v1601_v15 = vrot.slane %v1599_v63, 1 }
 0x1fb   : > { %5449 = vst [vmem:[#allocation2 + $0xa0] sm:$0xff] %v5398_v14  }
 0x1fc   : > { %3059 = vmatmul.bf16.gmra.mxu2 %v1590_v23  ;;  %3900 = vmatmul.bf16.gmra.mxu0 %v5257_v17  ;;  %v847_v39 = vadd.f32 %v6020_v40, %v789_v21 }
 0x1fe   : > { %v1092_v62 = vmax.f32 %v847_v39, 0.0  ;;  %v1597_v39 = vor.u32 %v1596_v8, %v1592_v12 }
 0x1ff   : > { %v2674_v43 = vpop.f32.mrf.mxu2 }
 0x200   : > { %v6057_v45 = vadd.f32 %v2674_v43, %v2585_v29  ;;  %v1254_v14 = vsel %vm936_vm0, %v1092_v62, 0.0  ;;  %v6079_v62 = vpop.f32.mrf.mxu1 }
 0x201   : > { %v715_v47 = vpop.f32.mrf.mxu0  ;;  %7142 = vst [vmem:[#allocation15_spill] sm:$0xff] %v6079_v62 }
 0x202   : > { %v790_v52 = vmul.f32 %v6010_v57, %v715_v47  ;;  %v6060_v36 = vld [vmem:[#allocation2 + $0x9c] sm:$0xff]  ;;  %v1927_v37 = vld [vmem:[#allocation2 + $0xa4] sm:$0xf] }
 0x203   : > { %v2061_v2 = vunpack.c.l.b16 %v1927_v37  ;;  %2614 = vmatmul.bf16.gmra.mxu3 %v6060_v36  ;;  %2975 = vmatmul.bf16.gmra.mxu1 %v5177_v27  ;;  %v2325_v17 = vrot.slane %v6060_v36, 1  ;;  %v6074_v47 = vld [vmem:[#allocation2 + $0x3c] sm:$0xff]  ;;  %v1602_v27 = vsel %vm1566_vm3, %v1597_v39, %v1601_v15 }
 0x204   : > { %v848_v5 = vadd.f32 %v6020_v40, %v790_v52  ;;  %v1537_v52 = vunpack.c.l.b16 %v1385_v26 }
 0x205   : > { %v6065_v10 = vpack.c.b16 %v2061_v2, %v2061_v2  ;;  %v1606_v2 = vshll.u32 %v5178_v50, 16 }
 0x206   : > { %v1093_v11 = vmax.f32 %v848_v5, 0.0  ;;  %v6081_v63 = vpack.c.b16 %v1537_v52, %v1537_v52 }
 0x207   : > { %v2326_v21 = vrot.slane %v6065_v10, 1 }
 0x208   : > { %v5403_v23 = vpack.c.bf16 %v1093_v11, %v1254_v14  ;;  %7143 = vst [vmem:[#allocation16_spill] sm:$0xff] %v6081_v63  ;;  %v1608_v14 = vrot.slane %v1606_v2, 1  ;;  %v1611_v15 = vshll.u32 %v6081_v63, 16  ;;  %v1388_v2 = vld [vmem:[#allocation2 + $0x38] sm:$0xf] }
 0x209   : > { %v718_v29 = vpop.f32.mrf.mxu0  ;;  %v6072_v43 = vsel %vm1775_vm2, %v2325_v17, %v2326_v21 }
 0x20a   : > { %5450 = vst [vmem:[#allocation2 + $0xa8] sm:$0xff] %v5403_v23   ;;  %v791_v37 = vmul.f32 %v6010_v57, %v718_v29  ;;  %v1604_v23 = vshrl.u32 %v5178_v50, 16  ;;  %v6090_v29 = vpop.f32.mrf.mxu2 }
 0x20b   : > { %7144 = vst [vmem:[#allocation17_spill] sm:$0xff] %v6090_v29 }
 0x20c   : > { %3064 = vmatmul.bf16.gmra.mxu2 %v1602_v27  ;;  %3905 = vmatmul.bf16.gmra.mxu0 %v6074_v47  ;;  %v849_v5 = vadd.f32 %v6020_v40, %v791_v37  ;;  %v1609_v39 = vor.u32 %v1608_v14, %v1604_v23  ;;  %v1613_v27 = vrot.slane %v1611_v15, 1  ;;  %v5179_v14 = vld [vmem:[#allocation2 + $0x30] sm:$0xff] }
 0x20e   : > { %v1094_v17 = vmax.f32 %v849_v5, 0.0 }
 0x210   : > { %v1256_v52 = vsel %vm995_vm1, %v1094_v17, 0.0 }
 0x211   : > { %v720_v8 = vpop.f32.mrf.mxu0  ;;  %v6084_v11 = vld [vmem:[#allocation2 + $0xa8] sm:$0xff] }
 0x212   : > { %v792_v12 = vmul.f32 %v6010_v57, %v720_v8  ;;  %v2590_v8 = vpop.f32.mrf.mxu1  ;;  %v2328_v58 = vrot.slane %v6084_v11, 1 }
 0x213   : > { %2619 = vmatmul.bf16.gmra.mxu3 %v6084_v11  ;;  %2980 = vmatmul.bf16.gmra.mxu1 %v5178_v50  ;;  %v1614_v50 = vsel %vm1566_vm3, %v1609_v39, %v1613_v27 }
 0x214   : > { %v850_v21 = vadd.f32 %v6020_v40, %v792_v12  ;;  %v6096_v12 = vld [vmem:[#allocation2 + $0x48] sm:$0xff] }
 0x216   : > { %v1095_v26 = vmax.f32 %v850_v21, 0.0  ;;  %v1538_v21 = vunpack.c.l.b16 %v1388_v2 }
 0x218   : > { %v1257_v37 = vsel %vm936_vm0, %v1095_v26, 0.0  ;;  %v6101_v23 = vpack.c.b16 %v1538_v21, %v1538_v21 }
 0x219   : > { %v5408_v5 = vpack.c.bf16 %v1257_v37, %v1256_v52  ;;  %v723_v62 = vpop.f32.mrf.mxu0  ;;  %v1618_v52 = vshll.u32 %v5179_v14, 16 }
 0x21a   : > { %v793_v15 = vmul.f32 %v6010_v57, %v723_v62  ;;  %7145 = vst [vmem:[#allocation18_spill] sm:$0xff] %v6101_v23  ;;  %v1623_v27 = vshll.u32 %v6101_v23, 16 }
 0x21b   : > { %5451 = vst [vmem:[#allocation2 + $0xb0] sm:$0xff] %v5408_v5   ;;  %v6106_v5 = vpop.f32.mrf.mxu1  ;;  %v1620_v62 = vrot.slane %v1618_v52, 1 }
 0x21c   : > { %3069 = vmatmul.bf16.gmra.mxu2 %v1614_v50  ;;  %3910 = vmatmul.bf16.gmra.mxu0 %v6096_v12  ;;  %7146 = vst [vmem:[#allocation19_spill] sm:$0xff] %v6106_v5  ;;  %v851_v39 = vadd.f32 %v6020_v40, %v793_v15 }
 0x21e   : > { %v1096_v0 = vmax.f32 %v851_v39, 0.0 }
 0x21f   : > { %v2679_v17 = vpop.f32.mrf.mxu2 }
 0x220   : > { %v6103_v26 = vadd.f32 %v2679_v17, %v2590_v8  ;;  %v1616_v17 = vshrl.u32 %v5179_v14, 16 }
 0x221   : > { %v725_v29 = vpop.f32.mrf.mxu0 }
 0x222   : > { %v794_v37 = vmul.f32 %v6010_v57, %v725_v29  ;;  %v1930_v4 = vld [vmem:[#allocation2 + $0xb0] sm:$0xf]  ;;  %v1625_v29 = vrot.slane %v1623_v27, 1  ;;  %v1621_v30 = vor.u32 %v1620_v62, %v1616_v17 }
 0x223   : > { %v2062_v2 = vunpack.c.l.b16 %v1930_v4  ;;  %2985 = vmatmul.bf16.gmra.mxu1 %v5179_v14  ;;  %v1391_v4 = vld [vmem:[#allocation2 + $0x44] sm:$0xf]  ;;  %v5180_v14 = vld [vmem:[#allocation2 + $0x3c] sm:$0xff]  ;;  %v2595_v39 = vpop.f32.mrf.mxu1 }
 0x224   : > { %v852_v50 = vadd.f32 %v6020_v40, %v794_v37 }
 0x225   : > { %v6111_v21 = vpack.c.b16 %v2062_v2, %v2062_v2  ;;  %v6122_v2 = vld [vmem:[#allocation2 + $0x54] sm:$0xff] }
 0x226   : > { %v1097_v8 = vmax.f32 %v852_v50, 0.0  ;;  %v1626_v50 = vsel %vm1566_vm3, %v1621_v30, %v1625_v29 }
 0x227   : > { %v6113_v3 = vpop.f32.mrf.mxu2  ;;  %v2329_v5 = vrot.slane %v6111_v21, 1 }
 0x228   : > { %7147 = vst [vmem:[#allocation20_spill] sm:$0xff] %v6113_v3  ;;  %v1259_v15 = vsel %vm995_vm1, %v1097_v8, 0.0  ;;  %v1539_v3 = vunpack.c.l.b16 %v1391_v4  ;;  %v1630_v8 = vshll.u32 %v5180_v14, 16 }
 0x229   : > { %v5413_v32 = vpack.c.bf16 %v1259_v15, %v1096_v0  ;;  %v728_v37 = vpop.f32.mrf.mxu0  ;;  %v6120_v52 = vsel %vm1775_vm2, %v2328_v58, %v2329_v5 }
 0x22a   : > { %v795_v27 = vmul.f32 %v6010_v57, %v728_v37  ;;  %v6128_v17 = vpack.c.b16 %v1539_v3, %v1539_v3  ;;  %v1632_v37 = vrot.slane %v1630_v8, 1  ;;  %v1628_v3 = vshrl.u32 %v5180_v14, 16 }
 0x22b   : > { %5452 = vst [vmem:[#allocation2 + $0xb8] sm:$0xff] %v5413_v32  }
 0x22c   : > { %3074 = vmatmul.bf16.gmra.mxu2 %v1626_v50  ;;  %3915 = vmatmul.bf16.gmra.mxu0 %v6122_v2  ;;  %v853_v0 = vadd.f32 %v6020_v40, %v795_v27  ;;  %7148 = vst [vmem:[#allocation21_spill] sm:$0xff] %v6128_v17  ;;  %v1635_v29 = vshll.u32 %v6128_v17, 16  ;;  %v6141_v27 = vpop.f32.mrf.mxu1  ;;  %v1400_v17 = vld [vmem:[#allocation2 + $0x68] sm:$0xf] }
 0x22d   : > { %7149 = vst [vmem:[#allocation22_spill] sm:$0xff] %v6141_v27 }
 0x22e   : > { %v1098_v30 = vmax.f32 %v853_v0, 0.0  ;;  %v1637_v0 = vrot.slane %v1635_v29, 1  ;;  %v5181_v29 = vld [vmem:[#allocation2 + $0x48] sm:$0xff] }
 0x22f   : > { %v2684_v62 = vpop.f32.mrf.mxu2 }
 0x230   : > { %v6130_v58 = vadd.f32 %v2684_v62, %v2595_v39  ;;  %v5254_v39 = vld [vmem:[%s7111_s4 + $0x178] sm:$0xff] }
 0x231   : > { %v730_v5 = vpop.f32.mrf.mxu0  ;;  %2724 = vmatpush.bf16.msra.mxu3 %v5254_v39 }
 0x232   : > { %v796_v32 = vmul.f32 %v6010_v57, %v730_v5  ;;  %v6133_v15 = vld [vmem:[#allocation2 + $0xb4] sm:$0xff]  ;;  %v1933_v51 = vld [vmem:[#allocation2 + $0xbc] sm:$0xf]  ;;  %v1633_v5 = vor.u32 %v1632_v37, %v1628_v3 }
 0x233   : > { %v2063_v4 = vunpack.c.l.b16 %v1933_v51  ;;  %2624 = vmatmul.bf16.gmra.mxu3 %v6133_v15  ;;  %2990 = vmatmul.bf16.gmra.mxu1 %v5180_v14  ;;  %v1260_v51 = vsel %vm936_vm0, %v1098_v30, 0.0 }
 0x234   : > { %v854_v50 = vadd.f32 %v6020_v40, %v796_v32  ;;  %v2331_v32 = vrot.slane %v6133_v15, 1  ;;  %v1638_v37 = vsel %vm1566_vm3, %v1633_v5, %v1637_v0  ;;  %v2600_v39 = vpop.f32.mrf.mxu1 }
 0x235   : > { %v6143_v62 = vpack.c.b16 %v2063_v4, %v2063_v4 }
 0x236   : > { %v1099_v8 = vmax.f32 %v854_v50, 0.0  ;;  %v6153_v50 = vld [vmem:[#allocation2 + $0x60] sm:$0xff] }
 0x237   : > { %v2332_v41 = vrot.slane %v6143_v62, 1  ;;  %v6170_v54 = vpop.f32.mrf.mxu2 }
 0x238   : > { %v5418_v14 = vpack.c.bf16 %v1099_v8, %v1260_v51  ;;  %v6158_v8 = vpack.c.b16 %v1540_v42, %v1540_v42  ;;  %7151 = vst [vmem:[#allocation24_spill] sm:$0xff] %v6170_v54 }
 0x239   : > { %v733_v22 = vpop.f32.mrf.mxu0  ;;  %v6150_v60 = vsel %vm1775_vm2, %v2331_v32, %v2332_v41  ;;  %v1640_v32 = vshrl.u32 %v5181_v29, 16 }
 0x23a   : > { %5453 = vst [vmem:[#allocation2 + $0xc0] sm:$0xff] %v5418_v14   ;;  %v797_v4 = vmul.f32 %v6010_v57, %v733_v22  ;;  %v5253_v22 = vld [vmem:[%s7111_s4 + $0x170] sm:$0xff]  ;;  %v1647_v51 = vshll.u32 %v6158_v8, 16 }
 0x23b   : > { %7150 = vst [vmem:[#allocation23_spill] sm:$0xff] %v6158_v8  ;;  %2725 = vmatpush.bf16.msra.mxu3 %v5253_v22  ;;  %v5182_v22 = vld [vmem:[#allocation2 + $0x54] sm:$0xff] }
 0x23c   : > { %v855_v30 = vadd.f32 %v6020_v40, %v797_v4  ;;  %3079 = vmatmul.bf16.gmra.mxu2 %v1638_v37  ;;  %3920 = vmatmul.bf16.gmra.mxu0 %v6153_v50  ;;  %v1642_v40 = vshll.u32 %v5181_v29, 16  ;;  %v1649_v14 = vrot.slane %v1647_v51, 1  ;;  %v1397_v4 = vld [vmem:[#allocation2 + $0x5c] sm:$0xf]  ;;  %v2602_v37 = vpop.f32.mrf.mxu1 }
 0x23e   : > { %v1100_v3 = vmax.f32 %v855_v30, 0.0  ;;  %v1644_v0 = vrot.slane %v1642_v40, 1 }
 0x240   : > { %v1262_v41 = vsel %vm995_vm1, %v1100_v3, 0.0  ;;  %v1645_v30 = vor.u32 %v1644_v0, %v1640_v32  ;;  %v2216_v3 = vshll.u32 %v6005_v55, 16  ;;  %v1654_v32 = vshll.u32 %v5182_v22, 16 }
 0x241   : > { %v5423_v57 = vpack.c.bf16 %v5651_v18, %v1262_v41  ;;  %v735_v25 = vpop.f32.mrf.mxu0  ;;  %v6166_v5 = vld [vmem:[#allocation2 + $0xc0] sm:$0xff]  ;;  %v5252_v18 = vld [vmem:[%s7111_s4 + $0x168] sm:$0xff] }
 0x242   : > { %v6176_v41 = vld [vmem:[#allocation2 + $0x6c] sm:$0xff]  ;;  %2726 = vmatpush.bf16.msra.mxu3 %v5252_v18  ;;  %v1650_v40 = vsel %vm1566_vm3, %v1645_v30, %v1649_v14  ;;  %v2218_v54 = vrot.slane %v2216_v3, 1  ;;  %v2334_v18 = vrot.slane %v6166_v5, 1  ;;  %v5251_v3 = vld [vmem:[%s7111_s4 + $0x160] sm:$0xff]  ;;  %v1656_v55 = vrot.slane %v1654_v32, 1 }
 0x243   : > { %5454 = vst [vmem:[#allocation2 + $0xc8] sm:$0xff] %v5423_v57   ;;  %2629 = vmatmul.bf16.gmra.mxu3 %v6166_v5  ;;  %2995 = vmatmul.bf16.gmra.mxu1 %v5181_v29  ;;  %v1541_v57 = vunpack.c.l.b16 %v1397_v4  ;;  %v2221_v29 = vshll.u32 %v6039_v59, 16 }
 0x245   : > { %v6183_v0 = vpack.c.b16 %v1541_v57, %v1541_v57  ;;  %v2223_v4 = vrot.slane %v2221_v29, 1 }
 0x246   : > { %2727 = vmatpush.bf16.msra.mxu3 %v5251_v3  ;;  %v5183_v3 = vld [vmem:[#allocation2 + $0x60] sm:$0xff] }
 0x247   : > { %7152 = vst [vmem:[#allocation25_spill] sm:$0xff] %v6183_v0  ;;  %v1659_v29 = vshll.u32 %v6183_v0, 16 }
 0x249   : > { %v738_v42 = vpop.f32.mrf.mxu0  ;;  %v1661_v8 = vrot.slane %v1659_v29, 1 }
 0x24a   : > { %v1936_v25 = vld [vmem:[#allocation2 + $0xc8] sm:$0xf] }
 0x24b   : > { %v2064_v51 = vunpack.c.l.b16 %v1936_v25 }
 0x24c   : > { %3084 = vmatmul.bf16.gmra.mxu2 %v1650_v40  ;;  %3925 = vmatmul.bf16.gmra.mxu0 %v6176_v41  ;;  %v2219_v40 = vor.u32 %v2218_v54, %v2214_v56  ;;  %v2228_v56 = vshll.u32 %v6060_v36, 16 }
 0x24d   : > { %v6181_v27 = vpack.c.b16 %v2064_v51, %v2064_v51 }
 0x24e   : > { %v2224_v51 = vsel %vm1566_vm3, %v2219_v40, %v2223_v4  ;;  %v2230_v32 = vrot.slane %v2228_v56, 1  ;;  %v1542_v40 = vunpack.c.l.b16 %v1400_v17  ;;  %v1666_v17 = vshll.u32 %v5183_v3, 16 }
 0x24f   : > { %v2689_v42 = vpop.f32.mrf.mxu2  ;;  %v2335_v14 = vrot.slane %v6181_v27, 1 }
 0x250   : > { %v6188_v30 = vadd.f32 %v2689_v42, %v2600_v39  ;;  %v2605_v25 = vpop.f32.mrf.mxu1  ;;  %v1652_v39 = vshrl.u32 %v5182_v22, 16  ;;  %v1668_v56 = vrot.slane %v1666_v17, 1 }
 0x251   : > { %v740_v59 = vpop.f32.mrf.mxu0  ;;  %v6194_v57 = vsel %vm1775_vm2, %v2334_v18, %v2335_v14  ;;  %v6201_v18 = vld [vmem:[#allocation2 + $0x78] sm:$0xff]  ;;  %v2233_v14 = vshll.u32 %v6065_v10, 16 }
 0x252   : > { %v1657_v59 = vor.u32 %v1656_v55, %v1652_v39  ;;  %v6210_v39 = vpack.c.b16 %v1542_v40, %v1542_v40  ;;  %v1403_v40 = vld [vmem:[#allocation2 + $0x74] sm:$0xf] }
 0x253   : > { %2698 = vmatmul.bf16.vlgmr.msrb.gmra.mxu3 %v2224_v51  ;;  %3000 = vmatmul.bf16.gmra.mxu1 %v5182_v22  ;;  %v5250_v22 = vld [vmem:[%s7111_s4 + $0x158] sm:$0xff]  ;;  %v2235_v29 = vrot.slane %v2233_v14, 1  ;;  %v1543_v17 = vunpack.c.l.b16 %v1403_v40 }
 0x254   : > { %v1662_v4 = vsel %vm1566_vm3, %v1657_v59, %v1661_v8  ;;  %2728 = vmatpush.bf16.msra.mxu3 %v5250_v22  ;;  %7154 = vst [vmem:[#allocation27_spill] sm:$0xff] %v6210_v39  ;;  %v1671_v59 = vshll.u32 %v6210_v39, 16 }
 0x256   : > { %v1673_v14 = vrot.slane %v1671_v59, 1  ;;  %v2238_v59 = vshrl.u32 %v6084_v11, 16 }
 0x257   : > { %v2691_v42 = vpop.f32.mrf.mxu2 }
 0x258   : > { %v6199_v54 = vadd.f32 %v2691_v42, %v2602_v37  ;;  %v2607_v23 = vpop.f32.mrf.mxu1  ;;  %v2226_v37 = vshrl.u32 %v6060_v36, 16  ;;  %v5249_v36 = vld [vmem:[%s7111_s4 + $0x150] sm:$0xff] }
 0x259   : > { %2729 = vmatpush.bf16.msra.mxu3 %v5249_v36 }
 0x25a   : > { %7153 = vst [vmem:[#allocation26_spill] sm:$0xff] %v6199_v54  ;;  %v2231_v55 = vor.u32 %v2230_v32, %v2226_v37  ;;  %v1664_v32 = vshrl.u32 %v5183_v3, 16  ;;  %v3230_v54 = vld [vmem:[#allocation2 + $0x2c] sm:$0xf] }
 0x25c   : > { %3089 = vmatmul.bf16.gmra.mxu2 %v1662_v4  ;;  %3930 = vmatmul.bf16.gmra.mxu0 %v6201_v18  ;;  %v2236_v42 = vsel %vm1566_vm3, %v2231_v55, %v2235_v29  ;;  %v1669_v37 = vor.u32 %v1668_v56, %v1664_v32  ;;  %v6226_v55 = vld [vmem:[#allocation2 + $0x84] sm:$0xff]  ;;  %v6234_v56 = vpack.c.b16 %v1543_v17, %v1543_v17 }
 0x25d   : > { %v5248_v32 = vld [vmem:[%s7111_s4 + $0x148] sm:$0xff] }
 0x25e   : > { %v1674_v29 = vsel %vm1566_vm3, %v1669_v37, %v1673_v14  ;;  %7160 = vst [vmem:[#allocation33_spill] sm:$0xff] %v6234_v56  ;;  %2730 = vmatpush.bf16.msra.mxu3 %v5248_v32 }
 0x25f   : > { %v2694_v51 = vpop.f32.mrf.mxu2 }
 0x260   : > { %v6212_v8 = vadd.f32 %v2694_v51, %v2605_v25  ;;  %v6214_v10 = vpop.f32.mrf.mxu1  ;;  %v2240_v51 = vshll.u32 %v6084_v11, 16 }
 0x261   : > { %7156 = vst [vmem:[#allocation29_spill] sm:$0xff] %v6214_v10  ;;  %v5184_v10 = vld [vmem:[#allocation2 + $0x6c] sm:$0xff] }
 0x262   : > { %7155 = vst [vmem:[#allocation28_spill] sm:$0xff] %v6212_v8  ;;  %v1676_v11 = vshrl.u32 %v5184_v10, 16  ;;  %v5504_v8 = vld [vmem:[#allocation2 + $0x18] sm:$0xff] }
 0x263   : > { %2703 = vmatmul.bf16.gmra.mxu3 %v2236_v42  ;;  %3005 = vmatmul.bf16.gmra.mxu1 %v5183_v3  ;;  %v2245_v42 = vshll.u32 %v6111_v21, 16  ;;  %v2242_v3 = vrot.slane %v2240_v51, 1  ;;  %v1683_v51 = vshll.u32 %v6234_v56, 16 }
 0x265   : > { %v2247_v36 = vrot.slane %v2245_v42, 1  ;;  %v2243_v21 = vor.u32 %v2242_v3, %v2238_v59  ;;  %v1685_v17 = vrot.slane %v1683_v51, 1  ;;  %v5247_v3 = vld [vmem:[%s7111_s4 + $0x140] sm:$0xff]  ;;  %v6251_v59 = vld [vmem:[#allocation2 + $0x90] sm:$0xff] }
 0x266   : > { %2731 = vmatpush.bf16.msra.mxu3 %v5247_v3 }
 0x267   : > { %v2696_v4 = vpop.f32.mrf.mxu2  ;;  %v2248_v40 = vsel %vm1566_vm3, %v2243_v21, %v2247_v36  ;;  %v2250_v21 = vshrl.u32 %v6133_v15, 16 }
 0x268   : > { %v6221_v25 = vadd.f32 %v2696_v4, %v2607_v23  ;;  %v6223_v22 = vpop.f32.mrf.mxu1  ;;  %v1678_v4 = vshll.u32 %v5184_v10, 16 }
 0x269   : > { %7158 = vst [vmem:[#allocation31_spill] sm:$0xff] %v6223_v22  ;;  %v2252_v22 = vshll.u32 %v6133_v15, 16  ;;  %v5214_v15 = vld [vmem:[%s7111_s4 + $0xb8] sm:$0xff] }
 0x26a   : > { %7157 = vst [vmem:[#allocation30_spill] sm:$0xff] %v6221_v25  ;;  %v1680_v37 = vrot.slane %v1678_v4, 1  ;;  %3135 = vmatpush.bf16.msrb.mxu3 %v5214_v15 }
 0x26b   : > { %v2254_v4 = vrot.slane %v2252_v22, 1 }
 0x26c   : > { %3094 = vmatmul.bf16.gmra.mxu2 %v1674_v29  ;;  %3935 = vmatmul.bf16.gmra.mxu0 %v6226_v55  ;;  %v1681_v42 = vor.u32 %v1680_v37, %v1676_v11  ;;  %v6257_v37 = vpop.f32.mrf.mxu3 }
 0x26d   : > { %7164 = vst [vmem:[#allocation37_spill] sm:$0xff] %v6257_v37  ;;  %v2255_v11 = vor.u32 %v2254_v4, %v2250_v21  ;;  %v6425_v37 = vld [vmem:[#allocation2 + $0xcc] sm:$0xff] }
 0x26e   : > { %v1686_v36 = vsel %vm1566_vm3, %v1681_v42, %v1685_v17  ;;  %v5294_v17 = vld [vmem:[%s7111_s4 + $0x238] sm:$0xff]  ;;  %7198 = vst [vmem:[#allocation71_spill] sm:$0xff] %v6425_v37 }
 0x26f   : > { %v6231_v23 = vpop.f32.mrf.mxu2  ;;  %4060 = vmatpush.bf16.msra.mxu2 %v5294_v17  ;;  %v2269_v17 = vshll.u32 %v6181_v27, 16 }
 0x270   : > { %7159 = vst [vmem:[#allocation32_spill] sm:$0xff] %v6231_v23  ;;  %v6239_v14 = vpop.f32.mrf.mxu1  ;;  %v1406_v23 = vld [vmem:[#allocation2 + $0x80] sm:$0xf] }
 0x271   : > { %7161 = vst [vmem:[#allocation34_spill] sm:$0xff] %v6239_v14  ;;  %v1544_v32 = vunpack.c.l.b16 %v1406_v23 }
 0x273   : > { %2708 = vmatmul.bf16.gmra.mxu3 %v2248_v40  ;;  %3010 = vmatmul.bf16.gmra.mxu1 %v5184_v10  ;;  %v2257_v10 = vshll.u32 %v6143_v62, 16  ;;  %v5185_v40 = vld [vmem:[#allocation2 + $0x78] sm:$0xff]  ;;  %v6261_v14 = vpack.c.b16 %v1544_v32, %v1544_v32  ;;  %v1409_v32 = vld [vmem:[#allocation2 + $0x8c] sm:$0xf] }
 0x274   : > { %v1690_v22 = vshll.u32 %v5185_v40, 16  ;;  %v6277_v21 = vpop.f32.mrf.mxu3 }
 0x275   : > { %7166 = vst [vmem:[#allocation39_spill] sm:$0xff] %v6261_v14  ;;  %v1695_v23 = vshll.u32 %v6261_v14, 16  ;;  %v6285_v14 = vld [vmem:[#allocation2 + $0x9c] sm:$0xff] }
 0x276   : > { %v1692_v3 = vrot.slane %v1690_v22, 1  ;;  %7169 = vst [vmem:[#allocation42_spill] sm:$0xff] %v6277_v21  ;;  %v5286_v22 = vld [vmem:[%s7111_s4 + $0x1f8] sm:$0xff] }
 0x277   : > { %v6243_v29 = vpop.f32.mrf.mxu2  ;;  %3971 = vmatpush.bf16.msra.mxu1 %v5286_v22 }
 0x278   : > { %7162 = vst [vmem:[#allocation35_spill] sm:$0xff] %v6243_v29  ;;  %v6246_v39 = vpop.f32.mrf.mxu1 }
 0x279   : > { %7163 = vst [vmem:[#allocation36_spill] sm:$0xff] %v6246_v39  ;;  %v2259_v39 = vrot.slane %v2257_v10, 1  ;;  %v1697_v10 = vrot.slane %v1695_v23, 1  ;;  %v1545_v23 = vunpack.c.l.b16 %v1409_v32 }
 0x27b   : > { %v2260_v62 = vsel %vm1566_vm3, %v2255_v11, %v2259_v39  ;;  %v1688_v39 = vshrl.u32 %v5185_v40, 16 }
 0x27c   : > { %3099 = vmatmul.bf16.gmra.mxu2 %v1686_v36  ;;  %3940 = vmatmul.bf16.gmra.mxu0 %v6251_v59  ;;  %v6273_v36 = vpop.f32.mrf.mxu0 }
 0x27f   : > { %v6259_v51 = vpop.f32.mrf.mxu2 }
 0x280   : > { %7165 = vst [vmem:[#allocation38_spill] sm:$0xff] %v6259_v51  ;;  %v6263_v42 = vpop.f32.mrf.mxu1  ;;  %v6293_v51 = vpack.c.b16 %v1545_v23, %v1545_v23 }
 0x281   : > { %7167 = vst [vmem:[#allocation40_spill] sm:$0xff] %v6263_v42  ;;  %v2264_v42 = vshll.u32 %v6166_v5, 16 }
 0x282   : > { %7172 = vst [vmem:[#allocation45_spill] sm:$0xff] %v6293_v51 }
 0x283   : > { %2713 = vmatmul.bf16.gmra.mxu3 %v2260_v62  ;;  %3015 = vmatmul.bf16.gmra.mxu1 %v5185_v40  ;;  %v1693_v62 = vor.u32 %v1692_v3, %v1688_v39  ;;  %v5186_v40 = vld [vmem:[#allocation2 + $0x84] sm:$0xff]  ;;  %v2262_v39 = vshrl.u32 %v6166_v5, 16 }
 0x284   : > { %v1702_v56 = vshll.u32 %v5186_v40, 16  ;;  %v6295_v29 = vpop.f32.mrf.mxu0 }
 0x285   : > { %v1698_v15 = vsel %vm1566_vm3, %v1693_v62, %v1697_v10 }
 0x286   : > { %v6297_v10 = vpop.f32.mrf.mxu3  ;;  %v1704_v22 = vrot.slane %v1702_v56, 1 }
 0x287   : > { %v6275_v4 = vpop.f32.mrf.mxu2  ;;  %7173 = vst [vmem:[#allocation46_spill] sm:$0xff] %v6297_v10  ;;  %v6309_v10 = vld [vmem:[#allocation2 + $0xa8] sm:$0xff] }
 0x288   : > { %7168 = vst [vmem:[#allocation41_spill] sm:$0xff] %v6275_v4  ;;  %v6279_v11 = vpop.f32.mrf.mxu1  ;;  %v2271_v4 = vrot.slane %v2269_v17, 1 }
 0x289   : > { %7170 = vst [vmem:[#allocation43_spill] sm:$0xff] %v6279_v11  ;;  %v2266_v11 = vrot.slane %v2264_v42, 1  ;;  %v1707_v42 = vshll.u32 %v6293_v51, 16  ;;  %v6340_v51 = vld [vmem:[#allocation2 + $0xb4] sm:$0xff] }
 0x28b   : > { %v2267_v32 = vor.u32 %v2266_v11, %v2262_v39  ;;  %v1709_v23 = vrot.slane %v1707_v42, 1 }
 0x28c   : > { %3104 = vmatmul.bf16.gmra.mxu2 %v1698_v15  ;;  %3945 = vmatmul.bf16.gmra.mxu0 %v6285_v14  ;;  %v1700_v15 = vshrl.u32 %v5186_v40, 16  ;;  %v6307_v21 = vpop.f32.mrf.mxu0 }
 0x28d   : > { %v2272_v62 = vsel %vm1566_vm3, %v2267_v32, %v2271_v4 }
 0x28e   : > { %v1705_v17 = vor.u32 %v1704_v22, %v1700_v15  ;;  %v6311_v11 = vpop.f32.mrf.mxu3 }
 0x28f   : > { %v6290_v3 = vpop.f32.mrf.mxu2  ;;  %7177 = vst [vmem:[#allocation50_spill] sm:$0xff] %v6311_v11  ;;  %v5287_v11 = vld [vmem:[%s7111_s4 + $0x200] sm:$0xff] }
 0x290   : > { %7171 = vst [vmem:[#allocation44_spill] sm:$0xff] %v6290_v3  ;;  %v6299_v27 = vpop.f32.mrf.mxu1  ;;  %v1412_v3 = vld [vmem:[#allocation2 + $0x98] sm:$0xf]  ;;  %v1710_v56 = vsel %vm1566_vm3, %v1705_v17, %v1709_v23  ;;  %v5293_v17 = vld [vmem:[%s7111_s4 + $0x230] sm:$0xff] }
 0x291   : > { %7174 = vst [vmem:[#allocation47_spill] sm:$0xff] %v6299_v27  ;;  %v1546_v4 = vunpack.c.l.b16 %v1412_v3  ;;  %v5213_v3 = vld [vmem:[%s7111_s4 + $0xb0] sm:$0xff]  ;;  %4061 = vmatpush.bf16.msra.mxu2 %v5293_v17 }
 0x292   : > { %3136 = vmatpush.bf16.msrb.mxu3 %v5213_v3  ;;  %v5285_v27 = vld [vmem:[%s7111_s4 + $0x1f0] sm:$0xff] }
 0x293   : > { %2718 = vmatmul.bf16.gmra.mxu3 %v2272_v62  ;;  %3020 = vmatmul.bf16.gmra.mxu1 %v5186_v40  ;;  %v5187_v40 = vld [vmem:[#allocation2 + $0x90] sm:$0xff]  ;;  %v6317_v32 = vpack.c.b16 %v1546_v4, %v1546_v4 }
 0x294   : > { %v1714_v22 = vshll.u32 %v5187_v40, 16  ;;  %v6322_v15 = vpop.f32.mrf.mxu0  ;;  %3972 = vmatpush.bf16.msra.mxu1 %v5285_v27 }
 0x295   : > { %7179 = vst [vmem:[#allocation52_spill] sm:$0xff] %v6317_v32  ;;  %v1719_v42 = vshll.u32 %v6317_v32, 16 }
 0x296   : > { %v6331_v23 = vpop.f32.mrf.mxu3 }
 0x297   : > { %v6303_v5 = vpop.f32.mrf.mxu2  ;;  %7181 = vst [vmem:[#allocation54_spill] sm:$0xff] %v6331_v23  ;;  %v1721_v32 = vrot.slane %v1719_v42, 1  ;;  %v5188_v23 = vld [vmem:[#allocation2 + $0x9c] sm:$0xff] }
 0x298   : > { %7175 = vst [vmem:[#allocation48_spill] sm:$0xff] %v6303_v5  ;;  %v6305_v0 = vpop.f32.mrf.mxu1 }
 0x299   : > { %7176 = vst [vmem:[#allocation49_spill] sm:$0xff] %v6305_v0  ;;  %v1415_v0 = vld [vmem:[#allocation2 + $0xa4] sm:$0xf] }
 0x29c   : > { %3109 = vmatmul.bf16.gmra.mxu2 %v1710_v56  ;;  %3950 = vmatmul.bf16.gmra.mxu0 %v6309_v10  ;;  %v1716_v56 = vrot.slane %v1714_v22, 1  ;;  %v1547_v22 = vunpack.c.l.b16 %v1415_v0  ;;  %v6347_v42 = vpop.f32.mrf.mxu0  ;;  %v5283_v0 = vld [vmem:[%s7111_s4 + $0x1e0] sm:$0xff] }
 0x29e   : > { %v6353_v17 = vpack.c.b16 %v1547_v22, %v1547_v22  ;;  %v5282_v22 = vld [vmem:[%s7111_s4 + $0x1d8] sm:$0xff] }
 0x29f   : > { %v6315_v39 = vpop.f32.mrf.mxu2 }
 0x2a0   : > { %7178 = vst [vmem:[#allocation51_spill] sm:$0xff] %v6315_v39  ;;  %v6319_v62 = vpop.f32.mrf.mxu1 }
 0x2a1   : > { %7180 = vst [vmem:[#allocation53_spill] sm:$0xff] %v6319_v62  ;;  %v1712_v62 = vshrl.u32 %v5187_v40, 16 }
 0x2a2   : > { %7186 = vst [vmem:[#allocation59_spill] sm:$0xff] %v6353_v17 }
 0x2a3   : > { %2732 = vmatmul.bf16.vlgmr.msra.gmra.mxu3 %v5740_v24  ;;  %3025 = vmatmul.bf16.gmra.mxu1 %v5187_v40  ;;  %v1717_v39 = vor.u32 %v1716_v56, %v1712_v62  ;;  %v5284_v40 = vld [vmem:[%s7111_s4 + $0x1e8] sm:$0xff]  ;;  %v6349_v62 = vpop.f32.mrf.mxu3  ;;  %v1726_v56 = vshll.u32 %v5188_v23, 16 }
 0x2a4   : > { %7184 = vst [vmem:[#allocation57_spill] sm:$0xff] %v6349_v62  ;;  %3973 = vmatpush.bf16.msra.mxu1 %v5284_v40  ;;  %v1724_v40 = vshrl.u32 %v5188_v23, 16 }
 0x2a5   : > { %v1722_v5 = vsel %vm1566_vm3, %v1717_v39, %v1721_v32  ;;  %v1728_v27 = vrot.slane %v1726_v56, 1  ;;  %v5292_v32 = vld [vmem:[%s7111_s4 + $0x228] sm:$0xff] }
 0x2a6   : > { %4062 = vmatpush.bf16.msra.mxu2 %v5292_v32  ;;  %v6382_v32 = vld [vmem:[#allocation2 + $0xc0] sm:$0xff] }
 0x2a7   : > { %v6333_v4 = vpop.f32.mrf.mxu2  ;;  %v1729_v56 = vor.u32 %v1728_v27, %v1724_v40  ;;  %v5189_v40 = vld [vmem:[#allocation2 + $0xa8] sm:$0xff] }
 0x2a8   : > { %7182 = vst [vmem:[#allocation55_spill] sm:$0xff] %v6333_v4  ;;  %v6335_v24 = vpop.f32.mrf.mxu1  ;;  %3974 = vmatpush.bf16.msra.mxu1 %v5283_v0  ;;  %v6372_v0 = vpop.f32.mrf.mxu0  ;;  %v5291_v4 = vld [vmem:[%s7111_s4 + $0x220] sm:$0xff] }
 0x2a9   : > { %7183 = vst [vmem:[#allocation56_spill] sm:$0xff] %v6335_v24 }
 0x2aa   : > { %4063 = vmatpush.bf16.msra.mxu2 %v5291_v4 }
 0x2ac   : > { %3114 = vmatmul.bf16.gmra.mxu2 %v1722_v5  ;;  %3955 = vmatmul.bf16.gmra.mxu0 %v6340_v51  ;;  %v1731_v5 = vshll.u32 %v6353_v17, 16 }
 0x2ad   : > { %3975 = vmatpush.bf16.msra.mxu1 %v5282_v22  ;;  %v5280_v22 = vld [vmem:[%s7111_s4 + $0x1c8] sm:$0xff] }
 0x2ae   : > { %v1733_v17 = vrot.slane %v1731_v5, 1  ;;  %v5290_v5 = vld [vmem:[%s7111_s4 + $0x218] sm:$0xff] }
 0x2af   : > { %v6351_v3 = vpop.f32.mrf.mxu2  ;;  %4064 = vmatpush.bf16.msra.mxu2 %v5290_v5  ;;  %v5288_v5 = vld [vmem:[%s7111_s4 + $0x208] sm:$0xff] }
 0x2b0   : > { %7185 = vst [vmem:[#allocation58_spill] sm:$0xff] %v6351_v3  ;;  %v6355_v39 = vpop.f32.mrf.mxu1 }
 0x2b1   : > { %7187 = vst [vmem:[#allocation60_spill] sm:$0xff] %v6355_v39 }
 0x2b3   : > { %2737 = vmatmul.bf16.gmra.mxu3 %v5760_v1  ;;  %3030 = vmatmul.bf16.gmra.mxu1 %v5188_v23  ;;  %v1418_v1 = vld [vmem:[#allocation2 + $0xb0] sm:$0xf] }
 0x2b4   : > { %v5281_v23 = vld [vmem:[%s7111_s4 + $0x1d0] sm:$0xff]  ;;  %v1548_v27 = vunpack.c.l.b16 %v1418_v1  ;;  %v5279_v1 = vld [vmem:[%s7111_s4 + $0x1c0] sm:$0xff] }
 0x2b5   : > { %3976 = vmatpush.bf16.msra.mxu1 %v5281_v23  ;;  %v6406_v23 = vpop.f32.mrf.mxu0 }
 0x2b6   : > { %v6370_v24 = vpop.f32.mrf.mxu3 }
 0x2b7   : > { %v6368_v39 = vpop.f32.mrf.mxu2  ;;  %7189 = vst [vmem:[#allocation62_spill] sm:$0xff] %v6370_v24 }
 0x2b8   : > { %7188 = vst [vmem:[#allocation61_spill] sm:$0xff] %v6368_v39  ;;  %v6374_v3 = vpop.f32.mrf.mxu1  ;;  %v1734_v39 = vsel %vm1566_vm3, %v1729_v56, %v1733_v17  ;;  %v6396_v17 = vpack.c.b16 %v1548_v27, %v1548_v27  ;;  %v5289_v56 = vld [vmem:[%s7111_s4 + $0x210] sm:$0xff]  ;;  %v5212_v27 = vld [vmem:[%s7111_s4 + $0xa8] sm:$0xff] }
 0x2b9   : > { %7190 = vst [vmem:[#allocation63_spill] sm:$0xff] %v6374_v3  ;;  %3977 = vmatpush.bf16.msra.mxu1 %v5280_v22  ;;  %4065 = vmatpush.bf16.msra.mxu2 %v5289_v56 }
 0x2ba   : > { %7193 = vst [vmem:[#allocation66_spill] sm:$0xff] %v6396_v17  ;;  %3137 = vmatpush.bf16.msrb.mxu3 %v5212_v27  ;;  %v5190_v27 = vld [vmem:[#allocation2 + $0xb4] sm:$0xff] }
 0x2bc   : > { %3119 = vmatmul.bf16.gmra.mxu2 %v1734_v39  ;;  %3960 = vmatmul.bf16.gmra.mxu0 %v6382_v32  ;;  %v1738_v39 = vshll.u32 %v5189_v40, 16 }
 0x2bd   : > { %3978 = vmatpush.bf16.msra.mxu1 %v5279_v1  ;;  %4066 = vmatpush.bf16.msra.mxu2 %v5288_v5  ;;  %v1421_v1 = vld [vmem:[#allocation2 + $0xbc] sm:$0xf]  ;;  %v1750_v5 = vshll.u32 %v5190_v27, 16 }
 0x2be   : > { %v6394_v24 = vpop.f32.mrf.mxu3  ;;  %v1740_v22 = vrot.slane %v1738_v39, 1  ;;  %v1549_v25 = vunpack.c.l.b16 %v1421_v1 }
 0x2bf   : > { %v6392_v3 = vpop.f32.mrf.mxu2  ;;  %7192 = vst [vmem:[#allocation65_spill] sm:$0xff] %v6394_v24 }
 0x2c0   : > { %7191 = vst [vmem:[#allocation64_spill] sm:$0xff] %v6392_v3  ;;  %v6398_v4 = vpop.f32.mrf.mxu1  ;;  %v1743_v3 = vshll.u32 %v6396_v17, 16  ;;  %v1736_v17 = vshrl.u32 %v5189_v40, 16 }
 0x2c1   : > { %7194 = vst [vmem:[#allocation67_spill] sm:$0xff] %v6398_v4  ;;  %4067 = vmatpush.bf16.msra.mxu2 %v5287_v11  ;;  %v1748_v11 = vshrl.u32 %v5190_v27, 16 }
 0x2c2   : > { %v1745_v56 = vrot.slane %v1743_v3, 1  ;;  %v1741_v62 = vor.u32 %v1740_v22, %v1736_v17  ;;  %v6435_v17 = vpack.c.b16 %v1549_v25, %v1549_v25  ;;  %v3227_v22 = vld [vmem:[#allocation2 + $0x20] sm:$0xf] }
 0x2c3   : > { %2742 = vmatmul.bf16.gmra.mxu3 %v5771_v28  ;;  %3035 = vmatmul.bf16.gmra.mxu1 %v5189_v40 }
 0x2c4   : > { %v1746_v39 = vsel %vm1566_vm3, %v1741_v62, %v1745_v56  ;;  %7201 = vst [vmem:[#allocation74_spill] sm:$0xff] %v6435_v17  ;;  %v1755_v62 = vshll.u32 %v6435_v17, 16  ;;  %v3385_v56 = vunpack.c.l.b16 %v3227_v22 }
 0x2c6   : > { %v6418_v24 = vpop.f32.mrf.mxu3  ;;  %v3401_v25 = vpack.c.b16 %v3385_v56, %v3385_v56  ;;  %v3386_v56 = vunpack.c.l.b16 %v3230_v54 }
 0x2c7   : > { %v6416_v4 = vpop.f32.mrf.mxu2  ;;  %7196 = vst [vmem:[#allocation69_spill] sm:$0xff] %v6418_v24  ;;  %v1752_v24 = vrot.slane %v1750_v5, 1 }
 0x2c8   : > { %7195 = vst [vmem:[#allocation68_spill] sm:$0xff] %v6416_v4  ;;  %v6420_v28 = vpop.f32.mrf.mxu1  ;;  %v6428_v4 = vpop.f32.mrf.mxu0 }
 0x2c9   : > { %7197 = vst [vmem:[#allocation70_spill] sm:$0xff] %v6420_v28 }
 0x2cc   : > { %3124 = vmatmul.bf16.gmra.mxu2 %v1746_v39  ;;  %3965 = vmatmul.bf16.gmra.mxu0 %v6425_v37  ;;  %v3420_v37 = vshll.u32 %v5504_v8, 16 }
 0x2ce   : > { %v6433_v40 = vpop.f32.mrf.mxu3  ;;  %v3422_v22 = vrot.slane %v3420_v37, 1  ;;  %v5211_v37 = vld [vmem:[%s7111_s4 + $0xa0] sm:$0xff] }
 0x2cf   : > { %v6431_v3 = vpop.f32.mrf.mxu2  ;;  %7200 = vst [vmem:[#allocation73_spill] sm:$0xff] %v6433_v40  ;;  %v1757_v40 = vrot.slane %v1755_v62, 1  ;;  %3138 = vmatpush.bf16.msrb.mxu3 %v5211_v37 }
 0x2d0   : > { %7199 = vst [vmem:[#allocation72_spill] sm:$0xff] %v6431_v3  ;;  %v6437_v28 = vpop.f32.mrf.mxu1  ;;  %v1753_v3 = vor.u32 %v1752_v24, %v1748_v11  ;;  %v3402_v11 = vpack.c.b16 %v3386_v56, %v3386_v56 }
 0x2d1   : > { %7202 = vst [vmem:[#allocation75_spill] sm:$0xff] %v6437_v28  ;;  %v3425_v28 = vshll.u32 %v3401_v25, 16 }
 0x2d2   : > { %v1758_v5 = vsel %vm1566_vm3, %v1753_v3, %v1757_v40 }
 0x2d3   : > { %2747 = vmatmul.bf16.gmra.mxu3 %v5791_v6  ;;  %3040 = vmatmul.bf16.gmra.mxu1 %v5190_v27  ;;  %v3418_v27 = vshrl.u32 %v5504_v8, 16 }
 0x2d5   : > { %v3423_v24 = vor.u32 %v3422_v22, %v3418_v27  ;;  %v3437_v27 = vshll.u32 %v3402_v11, 16 }
 0x2d6   : > { %v6443_v39 = vpop.f32.mrf.mxu3 }
 0x2d7   : > { %v6441_v1 = vpop.f32.mrf.mxu2  ;;  %7204 = vst [vmem:[#allocation77_spill] sm:$0xff] %v6443_v39 }
 0x2d8   : > { %7203 = vst [vmem:[#allocation76_spill] sm:$0xff] %v6441_v1  ;;  %v6445_v63 = vpop.f32.mrf.mxu1  ;;  %v3427_v1 = vrot.slane %v3425_v28, 1  ;;  %v3626_v28 = vrot.slane %v3401_v25, 1 }
 0x2d9   : > { %7205 = vst [vmem:[#allocation78_spill] sm:$0xff] %v6445_v63  ;;  %v3439_v63 = vrot.slane %v3437_v27, 1 }
 0x2da   : > { %v3428_v62 = vsel %vm1566_vm3, %v3423_v24, %v3427_v1  ;;  %v3625_v1 = vrot.slane %v5504_v8, 1 }
 0x2dc   : > { %3129 = vmatmul.bf16.gmra.mxu2 %v1758_v5  ;;  %v5505_v5 = vld [vmem:[#allocation2 + $0x24] sm:$0xff]  ;;  %v3627_v54 = vsel %vm1775_vm2, %v3625_v1, %v3626_v28  ;;  %v3629_v28 = vrot.slane %v3402_v11, 1 }
 0x2dd   : > { %v3430_v24 = vshrl.u32 %v5505_v5, 16 }
 0x2de   : > { %v6450_v6 = vpop.f32.mrf.mxu3 }
 0x2df   : > { %v6448_v17 = vpop.f32.mrf.mxu2 }
 0x2e0   : > { %7206 = vst [vmem:[#allocation79_spill] sm:$0xff] %v6448_v17  ;;  %v6452_v39 = vpop.f32.mrf.mxu1  ;;  %v3233_v17 = vld [vmem:[#allocation2 + $0x38] sm:$0xf] }
 0x2e1   : > { %7207 = vst [vmem:[#allocation80_spill] sm:$0xff] %v6452_v39  ;;  %v3432_v39 = vshll.u32 %v5505_v5, 16 }
 0x2e3   : > { %2752 = vmatmul.bf16.gmra.mxu3 %v5802_v34  ;;  %3979 = vmatmul.bf16.vlgmr.msra.gmra.mxu1 %v3428_v62  ;;  %v3434_v34 = vrot.slane %v3432_v39, 1 }
 0x2e6   : > { %v6461_v40 = vpop.f32.mrf.mxu3 }
 0x2e7   : > { %v6459_v3 = vpop.f32.mrf.mxu2  ;;  %7209 = vst [vmem:[#allocation82_spill] sm:$0xff] %v6461_v40  ;;  %v3387_v40 = vunpack.c.l.b16 %v3233_v17 }
 0x2e8   : > { %7208 = vst [vmem:[#allocation81_spill] sm:$0xff] %v6459_v3  ;;  %v6463_v22 = vpop.f32.mrf.mxu1  ;;  %v3435_v3 = vor.u32 %v3434_v34, %v3430_v24  ;;  %v5506_v34 = vld [vmem:[#allocation2 + $0x30] sm:$0xff] }
 0x2e9   : > { %7210 = vst [vmem:[#allocation83_spill] sm:$0xff] %v6463_v22  ;;  %v3403_v1 = vpack.c.b16 %v3387_v40, %v3387_v40  ;;  %v3628_v22 = vrot.slane %v5505_v5, 1  ;;  %v3444_v27 = vshll.u32 %v5506_v34, 16 }
 0x2ea   : > { %v3440_v56 = vsel %vm1566_vm3, %v3435_v3, %v3439_v63  ;;  %v3442_v3 = vshrl.u32 %v5506_v34, 16 }
 0x2eb   : > { %v3630_v24 = vsel %vm1775_vm2, %v3628_v22, %v3629_v28  ;;  %v3446_v63 = vrot.slane %v3444_v27, 1  ;;  %v5210_v22 = vld [vmem:[%s7111_s4 + $0x98] sm:$0xff] }
 0x2ec   : > { %4068 = vmatmul.bf16.vlgmr.msra.gmra.mxu2 %v3627_v54  ;;  %3139 = vmatpush.bf16.msrb.mxu3 %v5210_v22 }
 0x2ed   : > { %v3447_v40 = vor.u32 %v3446_v63, %v3442_v3  ;;  %v3631_v3 = vrot.slane %v5506_v34, 1 }
 0x2ee   : > { %v6468_v37 = vpop.f32.mrf.mxu3 }
 0x2ef   : > { %v6466_v62 = vpop.f32.mrf.mxu2 }
 0x2f0   : > { %7211 = vst [vmem:[#allocation84_spill] sm:$0xff] %v6466_v62  ;;  %v6470_v25 = vpop.f32.mrf.mxu1 }
 0x2f1   : > { %7212 = vst [vmem:[#allocation85_spill] sm:$0xff] %v6470_v25  ;;  %v3449_v25 = vshll.u32 %v3403_v1, 16 }
 0x2f3   : > { %2757 = vmatmul.bf16.gmra.mxu3 %v5822_v13  ;;  %3984 = vmatmul.bf16.gmra.mxu1 %v3440_v56  ;;  %v3451_v56 = vrot.slane %v3449_v25, 1  ;;  %v3632_v25 = vrot.slane %v3403_v1, 1  ;;  %v3239_v1 = vld [vmem:[#allocation2 + $0x50] sm:$0xf] }
 0x2f5   : > { %v3452_v11 = vsel %vm1566_vm3, %v3447_v40, %v3451_v56  ;;  %v3454_v40 = vshrl.u32 %v6074_v47, 16 }
 0x2f6   : > { %v6476_v39 = vpop.f32.mrf.mxu3 }
 0x2f7   : > { %v6474_v8 = vpop.f32.mrf.mxu2 }
 0x2f8   : > { %7213 = vst [vmem:[#allocation86_spill] sm:$0xff] %v6474_v8  ;;  %v6478_v54 = vpop.f32.mrf.mxu1  ;;  %v3236_v8 = vld [vmem:[#allocation2 + $0x44] sm:$0xf] }
 0x2f9   : > { %7214 = vst [vmem:[#allocation87_spill] sm:$0xff] %v6478_v54  ;;  %v3388_v5 = vunpack.c.l.b16 %v3236_v8  ;;  %v3633_v8 = vsel %vm1775_vm2, %v3631_v3, %v3632_v25 }
 0x2fc   : > { %4073 = vmatmul.bf16.gmra.mxu2 %v3630_v24  ;;  %v3404_v24 = vpack.c.b16 %v3388_v5, %v3388_v5 }
 0x2fe   : > { %v6483_v13 = vpop.f32.mrf.mxu3  ;;  %v3461_v56 = vshll.u32 %v3404_v24, 16 }
 0x2ff   : > { %v6481_v17 = vpop.f32.mrf.mxu2 }
 0x300   : > { %7215 = vst [vmem:[#allocation88_spill] sm:$0xff] %v6481_v17  ;;  %v6485_v62 = vpop.f32.mrf.mxu1  ;;  %v3463_v54 = vrot.slane %v3461_v56, 1  ;;  %v3468_v56 = vshll.u32 %v6096_v12, 16 }
 0x301   : > { %7216 = vst [vmem:[#allocation89_spill] sm:$0xff] %v6485_v62  ;;  %v3456_v62 = vshll.u32 %v6074_v47, 16  ;;  %v3635_v47 = vrot.slane %v3404_v24, 1  ;;  %v3242_v24 = vld [vmem:[#allocation2 + $0x5c] sm:$0xf] }
 0x303   : > { %2762 = vmatmul.bf16.gmra.mxu3 %v5835_v48  ;;  %3989 = vmatmul.bf16.gmra.mxu1 %v3452_v11  ;;  %v3458_v48 = vrot.slane %v3456_v62, 1 }
 0x306   : > { %v6494_v27 = vpop.f32.mrf.mxu3 }
 0x307   : > { %v6492_v28 = vpop.f32.mrf.mxu2 }
 0x308   : > { %7217 = vst [vmem:[#allocation90_spill] sm:$0xff] %v6492_v28  ;;  %v6497_v63 = vpop.f32.mrf.mxu1  ;;  %v3459_v28 = vor.u32 %v3458_v48, %v3454_v40 }
 0x309   : > { %7218 = vst [vmem:[#allocation91_spill] sm:$0xff] %v6497_v63  ;;  %v3389_v63 = vunpack.c.l.b16 %v3239_v1 }
 0x30a   : > { %v3464_v17 = vsel %vm1566_vm3, %v3459_v28, %v3463_v54  ;;  %v3470_v54 = vrot.slane %v3468_v56, 1 }
 0x30b   : > { %v3405_v25 = vpack.c.b16 %v3389_v63, %v3389_v63 }
 0x30c   : > { %4078 = vmatmul.bf16.gmra.mxu2 %v3633_v8  ;;  %v5507_v8 = vld [vmem:[#allocation2 + $0x3c] sm:$0xff] }
 0x30d   : > { %v3634_v48 = vrot.slane %v5507_v8, 1 }
 0x30e   : > { %v6503_v22 = vpop.f32.mrf.mxu3 }
 0x30f   : > { %v6501_v11 = vpop.f32.mrf.mxu2  ;;  %v3636_v40 = vsel %vm1775_vm2, %v3634_v48, %v3635_v47  ;;  %v5209_v47 = vld [vmem:[%s7111_s4 + $0x90] sm:$0xff] }
 0x310   : > { %v6505_v5 = vpop.f32.mrf.mxu1  ;;  %3140 = vmatpush.bf16.msrb.mxu3 %v5209_v47  ;;  %v3478_v47 = vshrl.u32 %v6122_v2, 16 }
 0x311   : > { %7219 = vst [vmem:[#allocation92_spill] sm:$0xff] %v6505_v5  ;;  %v3473_v5 = vshll.u32 %v3405_v25, 16 }
 0x313   : > { %2767 = vmatmul.bf16.gmra.mxu3 %v5865_v38  ;;  %3994 = vmatmul.bf16.gmra.mxu1 %v3464_v17  ;;  %v3466_v17 = vshrl.u32 %v6096_v12, 16  ;;  %v3475_v1 = vrot.slane %v3473_v5, 1  ;;  %v3638_v12 = vrot.slane %v3405_v25, 1 }
 0x316   : > { %v6511_v34 = vpop.f32.mrf.mxu3 }
 0x317   : > { %v6509_v62 = vpop.f32.mrf.mxu2 }
 0x318   : > { %7220 = vst [vmem:[#allocation93_spill] sm:$0xff] %v6509_v62  ;;  %v6513_v3 = vpop.f32.mrf.mxu1  ;;  %v3390_v62 = vunpack.c.l.b16 %v3242_v24 }
 0x319   : > { %7221 = vst [vmem:[#allocation94_spill] sm:$0xff] %v6513_v3  ;;  %v3471_v3 = vor.u32 %v3470_v54, %v3466_v17  ;;  %v5508_v17 = vld [vmem:[#allocation2 + $0x48] sm:$0xff] }
 0x31a   : > { %v3406_v5 = vpack.c.b16 %v3390_v62, %v3390_v62 }
 0x31b   : > { %v3476_v8 = vsel %vm1566_vm3, %v3471_v3, %v3475_v1 }
 0x31c   : > { %4083 = vmatmul.bf16.gmra.mxu2 %v3636_v40  ;;  %v3480_v40 = vshll.u32 %v6122_v2, 16 }
 0x31e   : > { %v6519_v38 = vpop.f32.mrf.mxu3  ;;  %v3482_v24 = vrot.slane %v3480_v40, 1 }
 0x31f   : > { %v6517_v28 = vpop.f32.mrf.mxu2 }
 0x320   : > { %7222 = vst [vmem:[#allocation95_spill] sm:$0xff] %v6517_v28  ;;  %v6522_v63 = vpop.f32.mrf.mxu1  ;;  %v3483_v62 = vor.u32 %v3482_v24, %v3478_v47  ;;  %v3245_v28 = vld [vmem:[#allocation2 + $0x68] sm:$0xf]  ;;  %v3640_v24 = vrot.slane %v6122_v2, 1 }
 0x321   : > { %7223 = vst [vmem:[#allocation96_spill] sm:$0xff] %v6522_v63 }
 0x323   : > { %2772 = vmatmul.bf16.gmra.mxu3 %v5896_v19  ;;  %3999 = vmatmul.bf16.gmra.mxu1 %v3476_v8  ;;  %v3637_v19 = vrot.slane %v5508_v17, 1  ;;  %v3485_v8 = vshll.u32 %v3406_v5, 16  ;;  %v3641_v17 = vrot.slane %v3406_v5, 1  ;;  %v3490_v5 = vshrl.u32 %v6153_v50, 16 }
 0x325   : > { %v3639_v1 = vsel %vm1775_vm2, %v3637_v19, %v3638_v12 }
 0x326   : > { %v2733_v56 = vpop.f32.mrf.mxu3 }
 0x327   : > { %v6529_v48 = vpop.f32.mrf.mxu2  ;;  %v6533_v54 = vadd.f32 %v2733_v56, %v5827_v20 }
 0x328   : > { %7224 = vst [vmem:[#allocation97_spill] sm:$0xff] %v6529_v48  ;;  %v6535_v3 = vpop.f32.mrf.mxu1  ;;  %v3487_v48 = vrot.slane %v3485_v8, 1  ;;  %v3492_v8 = vshll.u32 %v6153_v50, 16 }
 0x329   : > { %7225 = vst [vmem:[#allocation98_spill] sm:$0xff] %v6535_v3  ;;  %v3391_v3 = vunpack.c.l.b16 %v3245_v28 }
 0x32a   : > { %v3488_v56 = vsel %vm1566_vm3, %v3483_v62, %v3487_v48  ;;  %v3642_v48 = vsel %vm1775_vm2, %v3640_v24, %v3641_v17  ;;  %v5208_v17 = vld [vmem:[%s7111_s4 + $0x88] sm:$0xff] }
 0x32b   : > { %v3407_v19 = vpack.c.b16 %v3391_v3, %v3391_v3  ;;  %3141 = vmatpush.bf16.msrb.mxu3 %v5208_v17 }
 0x32c   : > { %4088 = vmatmul.bf16.gmra.mxu2 %v3639_v1 }
 0x32d   : > { %v3497_v28 = vshll.u32 %v3407_v19, 16 }
 0x32e   : > { %v6541_v25 = vpop.f32.mrf.mxu3 }
 0x32f   : > { %v6539_v63 = vpop.f32.mrf.mxu2  ;;  %v3499_v3 = vrot.slane %v3497_v28, 1 }
 0x330   : > { %7226 = vst [vmem:[#allocation99_spill] sm:$0xff] %v6539_v63  ;;  %v6543_v20 = vpop.f32.mrf.mxu1 }
 0x331   : > { %7227 = vst [vmem:[#allocation100_spill] sm:$0xff] %v6543_v20 }
 0x333   : > { %2777 = vmatmul.bf16.gmra.mxu3 %v5986_v53  ;;  %4004 = vmatmul.bf16.gmra.mxu1 %v3488_v56  ;;  %v3494_v53 = vrot.slane %v3492_v8, 1 }
 0x336   : > { %v2738_v40 = vpop.f32.mrf.mxu3 }
 0x337   : > { %v6547_v12 = vpop.f32.mrf.mxu2  ;;  %v6550_v1 = vadd.f32 %v2738_v40, %v5852_v7  ;;  %v3248_v7 = vld [vmem:[#allocation2 + $0x74] sm:$0xf]  ;;  %v3495_v40 = vor.u32 %v3494_v53, %v3490_v5 }
 0x338   : > { %v6552_v63 = vpop.f32.mrf.mxu1 }
 0x339   : > { %7228 = vst [vmem:[#allocation101_spill] sm:$0xff] %v6552_v63  ;;  %v3500_v2 = vsel %vm1566_vm3, %v3495_v40, %v3499_v3  ;;  %v3392_v63 = vunpack.c.l.b16 %v3248_v7 }
 0x33b   : > { %v3408_v28 = vpack.c.b16 %v3392_v63, %v3392_v63 }
 0x33c   : > { %4093 = vmatmul.bf16.gmra.mxu2 %v3642_v48  ;;  %v3644_v48 = vrot.slane %v3407_v19, 1 }
 0x33d   : > { %v3509_v40 = vshll.u32 %v3408_v28, 16 }
 0x33e   : > { %v6559_v62 = vpop.f32.mrf.mxu3 }
 0x33f   : > { %v6557_v47 = vpop.f32.mrf.mxu2 }
 0x340   : > { %7229 = vst [vmem:[#allocation102_spill] sm:$0xff] %v6557_v47  ;;  %v6562_v56 = vpop.f32.mrf.mxu1  ;;  %v3504_v47 = vshll.u32 %v6176_v41, 16 }
 0x341   : > { %7230 = vst [vmem:[#allocation103_spill] sm:$0xff] %v6562_v56  ;;  %v3511_v56 = vrot.slane %v3509_v40, 1  ;;  %v3516_v40 = vshll.u32 %v6201_v18, 16 }
 0x342   : > { %v3506_v7 = vrot.slane %v3504_v47, 1 }
 0x343   : > { %2782 = vmatmul.bf16.gmra.mxu3 %v5998_v33  ;;  %4009 = vmatmul.bf16.gmra.mxu1 %v3500_v2  ;;  %v3643_v33 = vrot.slane %v6153_v50, 1  ;;  %v3502_v2 = vshrl.u32 %v6176_v41, 16 }
 0x345   : > { %v3645_v3 = vsel %vm1775_vm2, %v3643_v33, %v3644_v48  ;;  %v3507_v63 = vor.u32 %v3506_v7, %v3502_v2  ;;  %v3647_v48 = vrot.slane %v3408_v28, 1  ;;  %v3646_v7 = vrot.slane %v6176_v41, 1 }
 0x346   : > { %v2743_v8 = vpop.f32.mrf.mxu3  ;;  %v3514_v28 = vshrl.u32 %v6201_v18, 16 }
 0x347   : > { %v6569_v24 = vpop.f32.mrf.mxu2  ;;  %v6573_v53 = vadd.f32 %v2743_v8, %v5876_v49  ;;  %v3512_v8 = vsel %vm1566_vm3, %v3507_v63, %v3511_v56  ;;  %v3648_v56 = vsel %vm1775_vm2, %v3646_v7, %v3647_v48  ;;  %v5207_v48 = vld [vmem:[%s7111_s4 + $0x80] sm:$0xff] }
 0x348   : > { %7231 = vst [vmem:[#allocation104_spill] sm:$0xff] %v6569_v24  ;;  %v6575_v5 = vpop.f32.mrf.mxu1  ;;  %v3251_v24 = vld [vmem:[#allocation2 + $0x80] sm:$0xf]  ;;  %3142 = vmatpush.bf16.msrb.mxu3 %v5207_v48 }
 0x349   : > { %7232 = vst [vmem:[#allocation105_spill] sm:$0xff] %v6575_v5  ;;  %v3393_v5 = vunpack.c.l.b16 %v3251_v24 }
 0x34b   : > { %v3409_v33 = vpack.c.b16 %v3393_v5, %v3393_v5 }
 0x34c   : > { %4098 = vmatmul.bf16.gmra.mxu2 %v3645_v3 }
 0x34d   : > { %v3521_v24 = vshll.u32 %v3409_v33, 16 }
 0x34e   : > { %v6582_v19 = vpop.f32.mrf.mxu3 }
 0x34f   : > { %v6580_v17 = vpop.f32.mrf.mxu2  ;;  %v3523_v5 = vrot.slane %v3521_v24, 1  ;;  %v3528_v24 = vshll.u32 %v6226_v55, 16 }
 0x350   : > { %7233 = vst [vmem:[#allocation106_spill] sm:$0xff] %v6580_v17  ;;  %v6584_v49 = vpop.f32.mrf.mxu1 }
 0x351   : > { %7234 = vst [vmem:[#allocation107_spill] sm:$0xff] %v6584_v49 }
 0x353   : > { %2787 = vmatmul.bf16.gmra.mxu3 %v6050_v16  ;;  %4014 = vmatmul.bf16.gmra.mxu1 %v3512_v8  ;;  %v3518_v16 = vrot.slane %v3516_v40, 1 }
 0x356   : > { %v2748_v47 = vpop.f32.mrf.mxu3 }
 0x357   : > { %v6588_v50 = vpop.f32.mrf.mxu2  ;;  %v6591_v3 = vadd.f32 %v2748_v47, %v5964_v9  ;;  %v3254_v9 = vld [vmem:[#allocation2 + $0x8c] sm:$0xf]  ;;  %v3519_v47 = vor.u32 %v3518_v16, %v3514_v28 }
 0x358   : > { %7235 = vst [vmem:[#allocation108_spill] sm:$0xff] %v6588_v50  ;;  %v6593_v17 = vpop.f32.mrf.mxu1  ;;  %v3394_v41 = vunpack.c.l.b16 %v3254_v9 }
 0x359   : > { %7236 = vst [vmem:[#allocation109_spill] sm:$0xff] %v6593_v17  ;;  %v3524_v17 = vsel %vm1566_vm3, %v3519_v47, %v3523_v5  ;;  %v3649_v5 = vrot.slane %v6201_v18, 1  ;;  %v3526_v47 = vshrl.u32 %v6226_v55, 16 }
 0x35c   : > { %4103 = vmatmul.bf16.gmra.mxu2 %v3648_v56  ;;  %v3650_v56 = vrot.slane %v3409_v33, 1 }
 0x35e   : > { %v6600_v63 = vpop.f32.mrf.mxu3 }
 0x35f   : > { %v6598_v2 = vpop.f32.mrf.mxu2 }
 0x360   : > { %7237 = vst [vmem:[#allocation110_spill] sm:$0xff] %v6598_v2  ;;  %v3980_v8 = vpop.f32.mrf.mxu1  ;;  %v3410_v2 = vpack.c.b16 %v3394_v41, %v3394_v41 }
 0x361   : > { %v3981_v48 = vadd.f32 %v3980_v8, %v6273_v36 }
 0x362   : > { %v3533_v9 = vshll.u32 %v3410_v2, 16  ;;  %v3653_v36 = vrot.slane %v3410_v2, 1 }
 0x363   : > { %2792 = vmatmul.bf16.gmra.mxu3 %v6072_v43  ;;  %4019 = vmatmul.bf16.gmra.mxu1 %v3524_v17  ;;  %v3651_v43 = vsel %vm1775_vm2, %v3649_v5, %v3650_v56  ;;  %v3530_v17 = vrot.slane %v3528_v24, 1 }
 0x364   : > { %v3535_v49 = vrot.slane %v3533_v9, 1  ;;  %v3540_v9 = vshll.u32 %v6251_v59, 16 }
 0x365   : > { %v3531_v41 = vor.u32 %v3530_v17, %v3526_v47 }
 0x366   : > { %v2753_v40 = vpop.f32.mrf.mxu3 }
 0x367   : > { %v6608_v7 = vpop.f32.mrf.mxu2  ;;  %v6612_v16 = vadd.f32 %v2753_v40, %v5991_v61  ;;  %v3257_v61 = vld [vmem:[#allocation2 + $0x98] sm:$0xf]  ;;  %v3536_v18 = vsel %vm1566_vm3, %v3531_v41, %v3535_v49 }
 0x368   : > { %7238 = vst [vmem:[#allocation111_spill] sm:$0xff] %v6608_v7  ;;  %v3982_v28 = vpop.f32.mrf.mxu1  ;;  %v3395_v20 = vunpack.c.l.b16 %v3257_v61  ;;  %v3260_v61 = vld [vmem:[#allocation2 + $0xa4] sm:$0xf] }
 0x369   : > { %v3983_v56 = vadd.f32 %v3982_v28, %v6295_v29 }
 0x36a   : > { %v3411_v8 = vpack.c.b16 %v3395_v20, %v3395_v20  ;;  %v3538_v20 = vshrl.u32 %v6251_v59, 16 }
 0x36c   : > { %4108 = vmatmul.bf16.gmra.mxu2 %v3651_v43 }
 0x36e   : > { %v6618_v33 = vpop.f32.mrf.mxu3 }
 0x36f   : > { %v4069_v7 = vpop.f32.mrf.mxu2 }
 0x370   : > { %v6620_v50 = vadd.f32 %v4069_v7, %v3981_v48  ;;  %v3985_v40 = vpop.f32.mrf.mxu1  ;;  %v3652_v7 = vrot.slane %v6226_v55, 1  ;;  %v3542_v48 = vrot.slane %v3540_v9, 1  ;;  %v3552_v9 = vshll.u32 %v6285_v14, 16 }
 0x371   : > { %v3986_v29 = vadd.f32 %v3985_v40, %v6307_v21 }
 0x372   : > { %v3654_v47 = vsel %vm1775_vm2, %v3652_v7, %v3653_v36  ;;  %v3543_v55 = vor.u32 %v3542_v48, %v3538_v20  ;;  %v3656_v36 = vrot.slane %v3411_v8, 1  ;;  %v3655_v48 = vrot.slane %v6251_v59, 1 }
 0x373   : > { %2797 = vmatmul.bf16.gmra.mxu3 %v6120_v52  ;;  %4024 = vmatmul.bf16.gmra.mxu1 %v3536_v18  ;;  %v3545_v52 = vshll.u32 %v3411_v8, 16 }
 0x375   : > { %v3547_v41 = vrot.slane %v3545_v52, 1 }
 0x376   : > { %v2758_v5 = vpop.f32.mrf.mxu3 }
 0x377   : > { %v4071_v24 = vpop.f32.mrf.mxu2  ;;  %v6628_v17 = vadd.f32 %v2758_v5, %v6033_v35  ;;  %v3548_v18 = vsel %vm1566_vm3, %v3543_v55, %v3547_v41 }
 0x378   : > { %v6625_v43 = vadd.f32 %v4071_v24, %v3983_v56  ;;  %v3987_v49 = vpop.f32.mrf.mxu1  ;;  %v3396_v56 = vunpack.c.l.b16 %v3260_v61 }
 0x379   : > { %v3988_v5 = vadd.f32 %v3987_v49, %v6322_v15  ;;  %v3550_v15 = vshrl.u32 %v6285_v14, 16 }
 0x37a   : > { %v3412_v7 = vpack.c.b16 %v3396_v56, %v3396_v56 }
 0x37c   : > { %4113 = vmatmul.bf16.gmra.mxu2 %v3654_v47 }
 0x37e   : > { %v6634_v2 = vpop.f32.mrf.mxu3 }
 0x37f   : > { %v4074_v28 = vpop.f32.mrf.mxu2 }
 0x380   : > { %v6637_v35 = vadd.f32 %v4074_v28, %v3986_v29  ;;  %v3990_v24 = vpop.f32.mrf.mxu1  ;;  %v3657_v29 = vsel %vm1775_vm2, %v3655_v48, %v3656_v36  ;;  %v3554_v28 = vrot.slane %v3552_v9, 1 }
 0x381   : > { %v3991_v49 = vadd.f32 %v3990_v24, %v6347_v42  ;;  %v3659_v42 = vrot.slane %v3412_v7, 1 }
 0x382   : > { %v3555_v61 = vor.u32 %v3554_v28, %v3550_v15  ;;  %v3564_v28 = vshll.u32 %v6309_v10, 16 }
 0x383   : > { %2802 = vmatmul.bf16.gmra.mxu3 %v6150_v60  ;;  %4029 = vmatmul.bf16.gmra.mxu1 %v3548_v18  ;;  %v3557_v60 = vshll.u32 %v3412_v7, 16 }
 0x384   : > { %v3566_v15 = vrot.slane %v3564_v28, 1  ;;  %v3576_v28 = vshll.u32 %v6340_v51, 16 }
 0x385   : > { %v3559_v55 = vrot.slane %v3557_v60, 1 }
 0x386   : > { %v2763_v40 = vpop.f32.mrf.mxu3 }
 0x387   : > { %v4076_v21 = vpop.f32.mrf.mxu2  ;;  %v6646_v52 = vadd.f32 %v2763_v40, %v6057_v45  ;;  %v3263_v45 = vld [vmem:[#allocation2 + $0xb0] sm:$0xf]  ;;  %v3560_v59 = vsel %vm1566_vm3, %v3555_v61, %v3559_v55  ;;  %v3562_v61 = vshrl.u32 %v6309_v10, 16 }
 0x388   : > { %v6643_v47 = vadd.f32 %v4076_v21, %v3988_v5  ;;  %v3992_v8 = vpop.f32.mrf.mxu1  ;;  %v3397_v56 = vunpack.c.l.b16 %v3263_v45  ;;  %v3266_v45 = vld [vmem:[#allocation2 + $0xbc] sm:$0xf] }
 0x389   : > { %v3993_v5 = vadd.f32 %v3992_v8, %v6372_v0  ;;  %v5509_v8 = vld [vmem:[#allocation2] sm:$0xff] }
 0x38a   : > { %v3413_v24 = vpack.c.b16 %v3397_v56, %v3397_v56 }
 0x38c   : > { %4118 = vmatmul.bf16.gmra.mxu2 %v3657_v29  ;;  %v3658_v29 = vrot.slane %v6285_v14, 1 }
 0x38e   : > { %v6652_v41 = vpop.f32.mrf.mxu3  ;;  %v3660_v60 = vsel %vm1775_vm2, %v3658_v29, %v3659_v42 }
 0x38f   : > { %v4079_v20 = vpop.f32.mrf.mxu2 }
 0x390   : > { %v6654_v18 = vadd.f32 %v4079_v20, %v3991_v49  ;;  %v3995_v48 = vpop.f32.mrf.mxu1  ;;  %v1776_v20 = vrot.slane %v5509_v8, 1 }
 0x391   : > { %v3996_v0 = vadd.f32 %v3995_v48, %v6406_v23  ;;  %v3398_v23 = vunpack.c.l.b16 %v3266_v45  ;;  %v5510_v45 = vld [vmem:[#allocation2 + $0xc] sm:$0xff] }
 0x393   : > { %2807 = vmatmul.bf16.gmra.mxu3 %v6194_v57  ;;  %4034 = vmatmul.bf16.gmra.mxu1 %v3560_v59  ;;  %v3569_v57 = vshll.u32 %v3413_v24, 16  ;;  %v3567_v59 = vor.u32 %v3566_v15, %v3562_v61  ;;  %v3414_v29 = vpack.c.b16 %v3398_v23, %v3398_v23  ;;  %v3661_v15 = vrot.slane %v6309_v10, 1 }
 0x395   : > { %v3571_v55 = vrot.slane %v3569_v57, 1  ;;  %v3581_v8 = vshll.u32 %v3414_v29, 16 }
 0x396   : > { %v2768_v40 = vpop.f32.mrf.mxu3 }
 0x397   : > { %v4081_v21 = vpop.f32.mrf.mxu2  ;;  %v6662_v9 = vadd.f32 %v2768_v40, %v6103_v26  ;;  %v1777_v26 = vrot.slane %v6002_v46, 1  ;;  %v3662_v46 = vrot.slane %v3413_v24, 1  ;;  %v1780_v24 = vrot.slane %v6031_v31, 1 }
 0x398   : > { %v6659_v36 = vadd.f32 %v4081_v21, %v3993_v5  ;;  %v3997_v56 = vpop.f32.mrf.mxu1  ;;  %v3572_v21 = vsel %vm1566_vm3, %v3567_v59, %v3571_v55  ;;  %v3583_v61 = vrot.slane %v3581_v8, 1  ;;  %v3269_v55 = vld [vmem:[#allocation2 + $0xc8] sm:$0xf]  ;;  %v1779_v59 = vrot.slane %v5510_v45, 1 }
 0x399   : > { %v1778_v5 = vsel %vm1775_vm2, %v1776_v20, %v1777_v26  ;;  %v3998_v40 = vadd.f32 %v3997_v56, %v6428_v4  ;;  %v3574_v4 = vshrl.u32 %v6340_v51, 16  ;;  %v3399_v56 = vunpack.c.l.b16 %v3269_v55 }
 0x39a   : > { %v3664_v31 = vrot.slane %v6340_v51, 1 }
 0x39b   : > { %v3415_v23 = vpack.c.b16 %v3399_v56, %v3399_v56 }
 0x39c   : > { %4123 = vmatmul.bf16.gmra.mxu2 %v3660_v60 }
 0x39e   : > { %v6668_v7 = vpop.f32.mrf.mxu3 }
 0x39f   : > { %v4084_v49 = vpop.f32.mrf.mxu2 }
 0x3a0   : > { %v6672_v14 = vadd.f32 %v4084_v49, %v3996_v0  ;;  %v3663_v0 = vsel %vm1775_vm2, %v3661_v15, %v3662_v46  ;;  %v3578_v49 = vrot.slane %v3576_v28, 1  ;;  %v3593_v46 = vshll.u32 %v3415_v23, 16 }
 0x3a2   : > { %v3579_v26 = vor.u32 %v3578_v49, %v3574_v4  ;;  %v3586_v49 = vshrl.u32 %v6382_v32, 16  ;;  %v3595_v8 = vrot.slane %v3593_v46, 1 }
 0x3a3   : > { %3143 = vmatmul.bf16.vlgmr.msrb.gmra.mxu3 %v1778_v5  ;;  %4039 = vmatmul.bf16.gmra.mxu1 %v3572_v21  ;;  %v3665_v21 = vrot.slane %v3414_v29, 1  ;;  %v7239_v29 = vld [vmem:[#allocation26_spill] sm:$0xff] }
 0x3a4   : > { %v3584_v10 = vsel %vm1566_vm3, %v3579_v26, %v3583_v61 }
 0x3a6   : > { %v2773_v48 = vpop.f32.mrf.mxu3 }
 0x3a7   : > { %v4086_v42 = vpop.f32.mrf.mxu2  ;;  %v6681_v57 = vadd.f32 %v2773_v48, %v6130_v58  ;;  %v1781_v58 = vsel %vm1775_vm2, %v1779_v59, %v1780_v24  ;;  %v3666_v48 = vsel %vm1775_vm2, %v3664_v31, %v3665_v21  ;;  %v5511_v24 = vld [vmem:[#allocation2 + $0x18] sm:$0xff]  ;;  %v3667_v31 = vrot.slane %v6382_v32, 1 }
 0x3a8   : > { %v6678_v60 = vadd.f32 %v4086_v42, %v3998_v40  ;;  %v3588_v42 = vshll.u32 %v6382_v32, 16  ;;  %v1782_v26 = vrot.slane %v5511_v24, 1  ;;  %v5512_v24 = vld [vmem:[#allocation2 + $0x24] sm:$0xff] }
 0x3aa   : > { %v3590_v28 = vrot.slane %v3588_v42, 1 }
 0x3ac   : > { %4128 = vmatmul.bf16.gmra.mxu2 %v3663_v0  ;;  %v1783_v0 = vrot.slane %v6055_v44, 1  ;;  %v3591_v51 = vor.u32 %v3590_v28, %v3586_v49 }
 0x3ae   : > { %v6686_v20 = vpop.f32.mrf.mxu3  ;;  %v1784_v61 = vsel %vm1775_vm2, %v1782_v26, %v1783_v0  ;;  %v3596_v55 = vsel %vm1566_vm3, %v3591_v51, %v3595_v8  ;;  %v7242_v0 = vld [vmem:[#allocation16_spill] sm:$0xff]  ;;  %v1785_v26 = vrot.slane %v5512_v24, 1 }
 0x3af   : > { %v1786_v49 = vrot.slane %v7242_v0, 1 }
 0x3b1   : > { %v1787_v51 = vsel %vm1775_vm2, %v1785_v26, %v1786_v49  ;;  %v5513_v49 = vld [vmem:[#allocation2 + $0x30] sm:$0xff] }
 0x3b3   : > { %3148 = vmatmul.bf16.gmra.mxu3 %v1781_v58  ;;  %4044 = vmatmul.bf16.gmra.mxu1 %v3584_v10  ;;  %v3668_v58 = vrot.slane %v3415_v23, 1  ;;  %v7240_v10 = vld [vmem:[#allocation71_spill] sm:$0xff] }
 0x3b4   : > { %v3600_v56 = vshll.u32 %v7240_v10, 16 }
 0x3b5   : > { %v3669_v42 = vsel %vm1775_vm2, %v3667_v31, %v3668_v58  ;;  %v3670_v58 = vrot.slane %v7240_v10, 1 }
 0x3b6   : > { %v2778_v5 = vpop.f32.mrf.mxu3  ;;  %v3602_v46 = vrot.slane %v3600_v56, 1 }
 0x3b7   : > { %v6692_v40 = vadd.f32 %v2778_v5, %v6188_v30  ;;  %v3272_v30 = vld [vmem:[#allocation2 + $0xd4] sm:$0xf]  ;;  %v7241_v5 = vld [vmem:[#allocation28_spill] sm:$0xff] }
 0x3b8   : > { %v3400_v45 = vunpack.c.l.b16 %v3272_v30 }
 0x3ba   : > { %v3416_v44 = vpack.c.b16 %v3400_v45, %v3400_v45 }
 0x3bc   : > { %4133 = vmatmul.bf16.gmra.mxu2 %v3666_v48  ;;  %v3598_v48 = vshrl.u32 %v7240_v10, 16  ;;  %v3605_v28 = vshll.u32 %v3416_v44, 16  ;;  %v3671_v56 = vrot.slane %v3416_v44, 1  ;;  %v7248_v10 = vld [vmem:[#allocation46_spill] sm:$0xff] }
 0x3bd   : > { %v7249_v44 = vld [vmem:[#allocation82_spill] sm:$0xff] }
 0x3be   : > { %v2780_v15 = vpop.f32.mrf.mxu3  ;;  %v3603_v8 = vor.u32 %v3602_v46, %v3598_v48  ;;  %v3607_v23 = vrot.slane %v3605_v28, 1  ;;  %v3672_v31 = vsel %vm1775_vm2, %v3670_v58, %v3671_v56  ;;  %v7247_v28 = vld [vmem:[#allocation18_spill] sm:$0xff] }
 0x3bf   : > { %v6700_v4 = vadd.f32 %v2780_v15, %v7239_v29  ;;  %v7243_v29 = vld [vmem:[#allocation30_spill] sm:$0xff] }
 0x3c0   : > { %v3608_v32 = vsel %vm1566_vm3, %v3603_v8, %v3607_v23  ;;  %v1788_v8 = vrot.slane %v5513_v49, 1  ;;  %v7254_v49 = vld [vmem:[#allocation23_spill] sm:$0xff] }
 0x3c3   : > { %3153 = vmatmul.bf16.gmra.mxu3 %v1784_v61  ;;  %4049 = vmatmul.bf16.gmra.mxu1 %v3596_v55  ;;  %v7244_v61 = vld [vmem:[#allocation37_spill] sm:$0xff] }
 0x3c4   : > { %v7245_v55 = vld [vmem:[#allocation77_spill] sm:$0xff] }
 0x3c5   : > { %v2700_v45 = vadd.f32 %v7245_v55, %v7244_v61  ;;  %v7251_v61 = vld [vmem:[#allocation21_spill] sm:$0xff] }
 0x3c6   : > { %v2783_v59 = vpop.f32.mrf.mxu3  ;;  %v1792_v55 = vrot.slane %v7251_v61, 1 }
 0x3c7   : > { %v6706_v21 = vadd.f32 %v2783_v59, %v7241_v5 }
 0x3cc   : > { %4138 = vmatmul.bf16.gmra.mxu2 %v3669_v42  ;;  %v7246_v42 = vld [vmem:[#allocation42_spill] sm:$0xff] }
 0x3cd   : > { %v2702_v48 = vadd.f32 %v6450_v6, %v7246_v42 }
 0x3ce   : > { %v2785_v15 = vpop.f32.mrf.mxu3 }
 0x3cf   : > { %v6713_v30 = vadd.f32 %v2785_v15, %v7243_v29  ;;  %v1789_v15 = vrot.slane %v7247_v28, 1  ;;  %v2705_v29 = vadd.f32 %v7249_v44, %v7248_v10  ;;  %v7253_v28 = vld [vmem:[#allocation57_spill] sm:$0xff] }
 0x3d0   : > { %v5515_v10 = vld [vmem:[#allocation2 + $0x48] sm:$0xff] }
 0x3d1   : > { %v1790_v23 = vsel %vm1775_vm2, %v1788_v8, %v1789_v15  ;;  %v2712_v15 = vadd.f32 %v6483_v13, %v7253_v28  ;;  %v1795_v8 = vrot.slane %v7254_v49, 1  ;;  %v1794_v44 = vrot.slane %v5515_v10, 1 }
 0x3d3   : > { %3158 = vmatmul.bf16.gmra.mxu3 %v1787_v51  ;;  %4054 = vmatmul.bf16.gmra.mxu1 %v3608_v32  ;;  %v7250_v51 = vld [vmem:[#allocation50_spill] sm:$0xff] }
 0x3d4   : > { %v2707_v32 = vadd.f32 %v6468_v37, %v7250_v51 }
 0x3d6   : > { %v2788_v59 = vpop.f32.mrf.mxu3 }
 0x3d7   : > { %v6720_v5 = vadd.f32 %v2788_v59, %v2700_v45  ;;  %v5514_v59 = vld [vmem:[#allocation2 + $0x3c] sm:$0xff] }
 0x3d8   : > { %v1791_v58 = vrot.slane %v5514_v59, 1 }
 0x3da   : > { %v1793_v56 = vsel %vm1775_vm2, %v1791_v58, %v1792_v55  ;;  %v7257_v55 = vld [vmem:[#allocation25_spill] sm:$0xff] }
 0x3db   : > { %v1798_v59 = vrot.slane %v7257_v55, 1 }
 0x3dc   : > { %4143 = vmatmul.bf16.gmra.mxu2 %v3672_v31  ;;  %v7252_v31 = vld [vmem:[#allocation54_spill] sm:$0xff] }
 0x3dd   : > { %v2710_v42 = vadd.f32 %v6476_v39, %v7252_v31 }
 0x3de   : > { %v2790_v46 = vpop.f32.mrf.mxu3 }
 0x3df   : > { %v6726_v0 = vadd.f32 %v2790_v46, %v2702_v48 }
 0x3e3   : > { %3163 = vmatmul.bf16.gmra.mxu3 %v1790_v23 }
 0x3e6   : > { %v2793_v24 = vpop.f32.mrf.mxu3 }
 0x3e7   : > { %v6731_v26 = vadd.f32 %v2793_v24, %v2705_v29  ;;  %v1796_v29 = vsel %vm1775_vm2, %v1794_v44, %v1795_v8  ;;  %v7255_v24 = vld [vmem:[#allocation62_spill] sm:$0xff]  ;;  %v7260_v8 = vld [vmem:[#allocation27_spill] sm:$0xff] }
 0x3e8   : > { %v2715_v51 = vadd.f32 %v6494_v27, %v7255_v24  ;;  %v1801_v10 = vrot.slane %v7260_v8, 1 }
 0x3ee   : > { %v2795_v6 = vpop.f32.mrf.mxu3 }
 0x3ef   : > { %v6736_v45 = vadd.f32 %v2795_v6, %v2707_v32  ;;  %v7256_v6 = vld [vmem:[#allocation65_spill] sm:$0xff] }
 0x3f0   : > { %v2717_v61 = vadd.f32 %v6503_v22, %v7256_v6 }
 0x3f3   : > { %3168 = vmatmul.bf16.gmra.mxu3 %v1793_v56  ;;  %v5516_v56 = vld [vmem:[#allocation2 + $0x54] sm:$0xff] }
 0x3f4   : > { %v1797_v31 = vrot.slane %v5516_v56, 1 }
 0x3f6   : > { %v2798_v48 = vpop.f32.mrf.mxu3 }
 0x3f7   : > { %v6741_v46 = vadd.f32 %v2798_v48, %v2710_v42  ;;  %v1799_v42 = vsel %vm1775_vm2, %v1797_v31, %v1798_v59  ;;  %v7258_v48 = vld [vmem:[#allocation69_spill] sm:$0xff] }
 0x3f8   : > { %v2720_v28 = vadd.f32 %v6511_v34, %v7258_v48  ;;  %v7262_v34 = vld [vmem:[#allocation3_spill] sm:$0xff] }
 0x3f9   : > { %v7265_v48 = vld [vmem:[#allocation31_spill] sm:$0xff] }
 0x3fe   : > { %v2800_v37 = vpop.f32.mrf.mxu3 }
 0x3ff   : > { %v6746_v23 = vadd.f32 %v2800_v37, %v2712_v15  ;;  %v7259_v37 = vld [vmem:[#allocation73_spill] sm:$0xff] }
 0x400   : > { %v2722_v49 = vadd.f32 %v6519_v38, %v7259_v37  ;;  %v7264_v38 = vld [vmem:[#allocation32_spill] sm:$0xff] }
 0x403   : > { %3173 = vmatmul.bf16.gmra.mxu3 %v1796_v29  ;;  %v5517_v29 = vld [vmem:[#allocation2 + $0x60] sm:$0xff] }
 0x404   : > { %v1800_v24 = vrot.slane %v5517_v29, 1 }
 0x406   : > { %v2803_v39 = vpop.f32.mrf.mxu3  ;;  %v1802_v6 = vsel %vm1775_vm2, %v1800_v24, %v1801_v10 }
 0x407   : > { %v6751_v32 = vadd.f32 %v2803_v39, %v2715_v51  ;;  %v7261_v51 = vld [vmem:[#allocation29_spill] sm:$0xff] }
 0x408   : > { %v2967_v39 = vadd.f32 %v7261_v51, %v6533_v54  ;;  %v5518_v51 = vld [vmem:[#allocation2 + $0x6c] sm:$0xff] }
 0x40a   : > { %v3056_v59 = vadd.f32 %v7264_v38, %v2967_v39  ;;  %v1803_v39 = vrot.slane %v5518_v51, 1  ;;  %v7270_v38 = vld [vmem:[#allocation6_spill] sm:$0xff] }
 0x40e   : > { %v2805_v13 = vpop.f32.mrf.mxu3 }
 0x40f   : > { %v6756_v58 = vadd.f32 %v2805_v13, %v2717_v61  ;;  %v7263_v61 = vld [vmem:[#allocation4_spill] sm:$0xff] }
 0x410   : > { %v2647_v13 = vadd.f32 %v7263_v61, %v7262_v34 }
 0x412   : > { %v2736_v55 = vadd.f32 %v6541_v25, %v2647_v13 }
 0x413   : > { %3178 = vmatmul.bf16.gmra.mxu3 %v1799_v42  ;;  %v6778_v42 = vld [vmem:[%s7112_s5] ss:$0 sm:$0xff] }
 0x416   : > { %v2808_v27 = vpop.f32.mrf.mxu3 }
 0x417   : > { %v6761_v15 = vadd.f32 %v2808_v27, %v2720_v28  ;;  %v2969_v28 = vadd.f32 %v7265_v48, %v2736_v55  ;;  %v6785_v27 = vld [vmem:[%s7113_s6] ss:$0 sm:$0xff]  ;;  %v7269_v55 = vld [vmem:[#allocation5_spill] sm:$0xff]  ;;  %v6807_v48 = vpop.f32.mrf.mxu0 }
 0x41e   : > { %v2810_v22 = vpop.f32.mrf.mxu3 }
 0x41f   : > { %v6766_v44 = vadd.f32 %v2810_v22, %v2722_v49  ;;  %v7266_v49 = vld [vmem:[#allocation35_spill] sm:$0xff] }
 0x420   : > { %v3058_v22 = vadd.f32 %v7266_v49, %v2969_v28 }
 0x423   : > { %3183 = vmatmul.bf16.gmra.mxu3 %v1802_v6  ;;  %v7268_v6 = vld [vmem:[#allocation34_spill] sm:$0xff] }
 0x424   : > { %v2972_v34 = vadd.f32 %v7268_v6, %v6550_v1 }
 0x426   : > { %v3144_v56 = vpop.f32.mrf.mxu3 }
 0x427   : > { %v3145_v31 = vadd.f32 %v3144_v56, %v3056_v59  ;;  %v2652_v59 = vadd.f32 %v7270_v38, %v7269_v55 }
 0x429   : > { %v4149_v54 = vadd.f32 %v6620_v50, %v3145_v31  ;;  %v7267_v50 = vld [vmem:[#allocation33_spill] sm:$0xff]  ;;  %v6805_v31 = vpop.f32.mrf.mxu1  ;;  %v2741_v28 = vadd.f32 %v6559_v62, %v2652_v59 }
 0x42a   : > { %v1804_v10 = vrot.slane %v7267_v50, 1  ;;  %v7273_v62 = vld [vmem:[#allocation41_spill] sm:$0xff] }
 0x42b   : > { %v4185_v25 = vmul.f32 %v6778_v42, %v4149_v54  ;;  %v7271_v54 = vld [vmem:[#allocation38_spill] sm:$0xff] }
 0x42c   : > { %v1805_v13 = vsel %vm1775_vm2, %v1803_v39, %v1804_v10 }
 0x42d   : > { %v4221_v37 = vadd.f32 %v6785_v27, %v4185_v25  ;;  %v3061_v25 = vadd.f32 %v7271_v54, %v2972_v34  ;;  %v7274_v34 = vld [vmem:[#allocation39_spill] sm:$0xff] }
 0x42e   : > { %v3146_v8 = vpop.f32.mrf.mxu3 }
 0x42f   : > { %v4253_v29 = vmax.f32 %v4221_v37, 0.0  ;;  %v3147_v24 = vadd.f32 %v3146_v8, %v3058_v22  ;;  %v6812_v37 = vpop.f32.mrf.mxu2  ;;  %v7272_v8 = vld [vmem:[#allocation36_spill] sm:$0xff] }
 0x430   : > { %v2974_v50 = vadd.f32 %v7272_v8, %v2741_v28 }
 0x431   : > { %4285 = vst [vmem:[%s6794_s17] sm:$0xff] %v4253_v29  ;;  %v4150_v61 = vadd.f32 %v6625_v43, %v3147_v24  ;;  %v6820_v39 = vpop.f32.mrf.mxu1 }
 0x432   : > { %v3063_v51 = vadd.f32 %v7273_v62, %v2974_v50 }
 0x433   : > { %v4186_v56 = vmul.f32 %v6778_v42, %v4150_v61  ;;  %3188 = vmatmul.bf16.gmra.mxu3 %v1805_v13  ;;  %v1807_v61 = vrot.slane %v7274_v34, 1  ;;  %v6823_v13 = vpop.f32.mrf.mxu0  ;;  %v7279_v34 = vld [vmem:[#allocation43_spill] sm:$0xff] }
 0x435   : > { %v4222_v1 = vadd.f32 %v6785_v27, %v4186_v56  ;;  %v5519_v56 = vld [vmem:[#allocation2 + $0x78] sm:$0xff] }
 0x436   : > { %v3149_v43 = vpop.f32.mrf.mxu3  ;;  %v1806_v28 = vrot.slane %v5519_v56, 1 }
 0x437   : > { %v4254_v49 = vmax.f32 %v4222_v1, 0.0  ;;  %v3150_v22 = vadd.f32 %v3149_v43, %v3061_v25  ;;  %v6825_v59 = vpop.f32.mrf.mxu2  ;;  %v7276_v43 = vld [vmem:[#allocation7_spill] sm:$0xff] }
 0x438   : > { %v1808_v25 = vsel %vm1775_vm2, %v1806_v28, %v1807_v61  ;;  %v7280_v28 = vld [vmem:[#allocation48_spill] sm:$0xff] }
 0x439   : > { %4286 = vst [vmem:[%s6794_s17 + $0x8] sm:$0xff] %v4254_v49  ;;  %v4151_v10 = vadd.f32 %v6637_v35, %v3150_v22  ;;  %v7275_v35 = vld [vmem:[#allocation40_spill] sm:$0xff] }
 0x43a   : > { %v2977_v1 = vadd.f32 %v7275_v35, %v6573_v53  ;;  %v7277_v49 = vld [vmem:[#allocation8_spill] sm:$0xff] }
 0x43b   : > { %v4187_v29 = vmul.f32 %v6778_v42, %v4151_v10  ;;  %v2657_v22 = vadd.f32 %v7277_v49, %v7276_v43 }
 0x43d   : > { %v4223_v24 = vadd.f32 %v6785_v27, %v4187_v29  ;;  %v2746_v50 = vadd.f32 %v6582_v19, %v2657_v22  ;;  %v7278_v29 = vld [vmem:[#allocation44_spill] sm:$0xff] }
 0x43e   : > { %v3151_v6 = vpop.f32.mrf.mxu3  ;;  %v5520_v22 = vld [vmem:[#allocation2 + $0x84] sm:$0xff] }
 0x43f   : > { %v4255_v55 = vmax.f32 %v4223_v24, 0.0  ;;  %v3152_v38 = vadd.f32 %v3151_v6, %v3063_v51  ;;  %v3066_v24 = vadd.f32 %v7278_v29, %v2977_v1  ;;  %v6838_v6 = vpop.f32.mrf.mxu1  ;;  %v2979_v61 = vadd.f32 %v7279_v34, %v2746_v50  ;;  %v7282_v50 = vld [vmem:[#allocation47_spill] sm:$0xff] }
 0x441   : > { %4287 = vst [vmem:[%s6794_s17 + $0x10] sm:$0xff] %v4255_v55  ;;  %v4152_v54 = vadd.f32 %v6643_v47, %v3152_v38  ;;  %v6840_v47 = vpop.f32.mrf.mxu0  ;;  %v6845_v38 = vpop.f32.mrf.mxu2  ;;  %v3068_v35 = vadd.f32 %v7280_v28, %v2979_v61 }
 0x443   : > { %v4188_v8 = vmul.f32 %v6778_v42, %v4152_v54  ;;  %3193 = vmatmul.bf16.gmra.mxu3 %v1808_v25  ;;  %v7281_v54 = vld [vmem:[#allocation45_spill] sm:$0xff] }
 0x444   : > { %v1810_v25 = vrot.slane %v7281_v54, 1  ;;  %v7286_v54 = vld [vmem:[#allocation49_spill] sm:$0xff] }
 0x445   : > { %v4224_v10 = vadd.f32 %v6785_v27, %v4188_v8  ;;  %v1809_v8 = vrot.slane %v5520_v22, 1 }
 0x446   : > { %v3154_v62 = vpop.f32.mrf.mxu3 }
 0x447   : > { %v4256_v53 = vmax.f32 %v4224_v10, 0.0  ;;  %v3155_v51 = vadd.f32 %v3154_v62, %v3066_v24  ;;  %v2982_v10 = vadd.f32 %v7282_v50, %v6591_v3  ;;  %v6855_v29 = vpop.f32.mrf.mxu1  ;;  %v1811_v24 = vsel %vm1775_vm2, %v1809_v8, %v1810_v25  ;;  %v7283_v62 = vld [vmem:[#allocation9_spill] sm:$0xff]  ;;  %v7287_v50 = vld [vmem:[#allocation55_spill] sm:$0xff] }
 0x449   : > { %4288 = vst [vmem:[%s6794_s17 + $0x18] sm:$0xff] %v4256_v53  ;;  %v4153_v55 = vadd.f32 %v6654_v18, %v3155_v51  ;;  %v7284_v53 = vld [vmem:[#allocation10_spill] sm:$0xff]  ;;  %v6860_v34 = vpop.f32.mrf.mxu0 }
 0x44a   : > { %v2662_v51 = vadd.f32 %v7284_v53, %v7283_v62  ;;  %v7288_v62 = vld [vmem:[#allocation52_spill] sm:$0xff] }
 0x44b   : > { %v4189_v19 = vmul.f32 %v6778_v42, %v4153_v55  ;;  %v6863_v55 = vpop.f32.mrf.mxu2  ;;  %v1813_v53 = vrot.slane %v7288_v62, 1 }
 0x44c   : > { %v2751_v3 = vadd.f32 %v6600_v63, %v2662_v51 }
 0x44d   : > { %v4225_v56 = vadd.f32 %v6785_v27, %v4189_v19 }
 0x44e   : > { %v3156_v1 = vpop.f32.mrf.mxu3  ;;  %v2984_v25 = vadd.f32 %v7286_v54, %v2751_v3  ;;  %v5521_v3 = vld [vmem:[#allocation2 + $0x90] sm:$0xff] }
 0x44f   : > { %v4257_v43 = vmax.f32 %v4225_v56, 0.0  ;;  %v3157_v49 = vadd.f32 %v3156_v1, %v3068_v35  ;;  %v7285_v56 = vld [vmem:[#allocation51_spill] sm:$0xff]  ;;  %v6872_v22 = vpop.f32.mrf.mxu1 }
 0x451   : > { %4289 = vst [vmem:[%s6794_s17 + $0x20] sm:$0xff] %v4257_v43  ;;  %v4154_v18 = vadd.f32 %v6659_v36, %v3157_v49  ;;  %v3071_v36 = vadd.f32 %v7285_v56, %v2982_v10  ;;  %v6874_v8 = vpop.f32.mrf.mxu0 }
 0x453   : > { %v4190_v61 = vmul.f32 %v6778_v42, %v4154_v18  ;;  %3198 = vmatmul.bf16.gmra.mxu3 %v1811_v24  ;;  %v3073_v18 = vadd.f32 %v7287_v50, %v2984_v25  ;;  %v6878_v10 = vpop.f32.mrf.mxu2 }
 0x455   : > { %v4226_v19 = vadd.f32 %v6785_v27, %v4190_v61 }
 0x456   : > { %v3159_v28 = vpop.f32.mrf.mxu3 }
 0x457   : > { %v4258_v35 = vmax.f32 %v4226_v19, 0.0  ;;  %v3160_v1 = vadd.f32 %v3159_v28, %v3071_v36  ;;  %v1812_v19 = vrot.slane %v5521_v3, 1  ;;  %v7293_v3 = vld [vmem:[#allocation56_spill] sm:$0xff] }
 0x459   : > { %4290 = vst [vmem:[%s6794_s17 + $0x28] sm:$0xff] %v4258_v35  ;;  %v4155_v43 = vadd.f32 %v6672_v14, %v3160_v1  ;;  %v7289_v14 = vld [vmem:[#allocation53_spill] sm:$0xff]  ;;  %v1814_v28 = vsel %vm1775_vm2, %v1812_v19, %v1813_v53  ;;  %v7290_v35 = vld [vmem:[#allocation11_spill] sm:$0xff]  ;;  %v7291_v1 = vld [vmem:[#allocation12_spill] sm:$0xff]  ;;  %v4003_v19 = vadd.f32 %v6820_v39, %v6823_v13 }
 0x45a   : > { %v2987_v56 = vadd.f32 %v7289_v14, %v6612_v16  ;;  %v2667_v54 = vadd.f32 %v7291_v1, %v7290_v35  ;;  %v7292_v16 = vld [vmem:[#allocation58_spill] sm:$0xff] }
 0x45b   : > { %v4191_v49 = vmul.f32 %v6778_v42, %v4155_v43  ;;  %v4092_v1 = vadd.f32 %v6825_v59, %v4003_v19  ;;  %v7298_v59 = vld [vmem:[#allocation14_spill] sm:$0xff] }
 0x45c   : > { %v2756_v43 = vadd.f32 %v6618_v33, %v2667_v54  ;;  %v3076_v50 = vadd.f32 %v7292_v16, %v2987_v56  ;;  %v7294_v56 = vld [vmem:[#allocation61_spill] sm:$0xff] }
 0x45d   : > { %v4227_v63 = vadd.f32 %v6785_v27, %v4191_v49  ;;  %v4001_v49 = vadd.f32 %v6805_v31, %v6807_v48 }
 0x45e   : > { %v3161_v24 = vpop.f32.mrf.mxu3  ;;  %v2989_v33 = vadd.f32 %v7293_v3, %v2756_v43 }
 0x45f   : > { %v4259_v51 = vmax.f32 %v4227_v63, 0.0  ;;  %v3162_v61 = vadd.f32 %v3161_v24, %v3073_v18  ;;  %v6894_v18 = vpop.f32.mrf.mxu1  ;;  %v6896_v24 = vpop.f32.mrf.mxu0  ;;  %v4090_v62 = vadd.f32 %v6812_v37, %v4001_v49  ;;  %v7295_v37 = vld [vmem:[#allocation59_spill] sm:$0xff] }
 0x460   : > { %v1816_v35 = vrot.slane %v7295_v37, 1  ;;  %v5522_v49 = vld [vmem:[#allocation2 + $0x9c] sm:$0xff] }
 0x461   : > { %4291 = vst [vmem:[%s6794_s17 + $0x30] sm:$0xff] %v4259_v51  ;;  %v4156_v36 = vadd.f32 %v6678_v60, %v3162_v61  ;;  %v6899_v61 = vpop.f32.mrf.mxu2  ;;  %v7300_v37 = vld [vmem:[#allocation63_spill] sm:$0xff] }
 0x463   : > { %v4192_v25 = vmul.f32 %v6778_v42, %v4156_v36  ;;  %3203 = vmatmul.bf16.gmra.mxu3 %v1814_v28  ;;  %v3078_v36 = vadd.f32 %v7294_v56, %v2989_v33 }
 0x465   : > { %v4228_v63 = vadd.f32 %v6785_v27, %v4192_v25 }
 0x466   : > { %v3164_v60 = vpop.f32.mrf.mxu3 }
 0x467   : > { %v4260_v53 = vmax.f32 %v4228_v63, 0.0  ;;  %v3165_v51 = vadd.f32 %v3164_v60, %v3076_v50  ;;  %v6910_v43 = vpop.f32.mrf.mxu1  ;;  %v1815_v63 = vrot.slane %v5522_v49, 1  ;;  %v6912_v16 = vpop.f32.mrf.mxu0  ;;  %v7296_v50 = vld [vmem:[#allocation60_spill] sm:$0xff] }
 0x468   : > { %v2992_v39 = vadd.f32 %v7296_v50, %v6628_v17  ;;  %v7301_v49 = vld [vmem:[#allocation68_spill] sm:$0xff] }
 0x469   : > { %4292 = vst [vmem:[%s6794_s17 + $0x38] sm:$0xff] %v4260_v53  ;;  %v4157_v31 = vadd.f32 %v4090_v62, %v3165_v51  ;;  %v6917_v60 = vpop.f32.mrf.mxu2  ;;  %v1817_v62 = vsel %vm1775_vm2, %v1815_v63, %v1816_v35  ;;  %v7297_v53 = vld [vmem:[#allocation13_spill] sm:$0xff] }
 0x46a   : > { %v2672_v51 = vadd.f32 %v7298_v59, %v7297_v53 }
 0x46b   : > { %v4193_v48 = vmul.f32 %v6778_v42, %v4157_v31  ;;  %v4006_v31 = vadd.f32 %v6838_v6, %v6840_v47 }
 0x46c   : > { %v2761_v33 = vadd.f32 %v6634_v2, %v2672_v51  ;;  %v5523_v51 = vld [vmem:[#allocation2 + $0xa8] sm:$0xff] }
 0x46d   : > { %v4229_v14 = vadd.f32 %v6785_v27, %v4193_v48  ;;  %v7299_v48 = vld [vmem:[#allocation64_spill] sm:$0xff]  ;;  %v4095_v56 = vadd.f32 %v6845_v38, %v4006_v31 }
 0x46e   : > { %v3166_v28 = vpop.f32.mrf.mxu3  ;;  %v3081_v19 = vadd.f32 %v7299_v48, %v2992_v39  ;;  %v2994_v35 = vadd.f32 %v7300_v37, %v2761_v33  ;;  %v7302_v39 = vld [vmem:[#allocation66_spill] sm:$0xff]  ;;  %v7303_v33 = vld [vmem:[#allocation67_spill] sm:$0xff]  ;;  %v7305_v48 = vld [vmem:[#allocation17_spill] sm:$0xff] }
 0x46f   : > { %v4261_v54 = vmax.f32 %v4229_v14, 0.0  ;;  %v3167_v25 = vadd.f32 %v3166_v28, %v3078_v36  ;;  %v6933_v2 = vpop.f32.mrf.mxu0  ;;  %v2997_v31 = vadd.f32 %v7303_v33, %v6646_v52  ;;  %v4011_v52 = vadd.f32 %v6872_v22, %v6874_v8  ;;  %v7306_v37 = vld [vmem:[#allocation72_spill] sm:$0xff] }
 0x470   : > { %v3083_v63 = vadd.f32 %v7301_v49, %v2994_v35  ;;  %v4013_v22 = vadd.f32 %v6894_v18, %v6896_v24 }
 0x471   : > { %4293 = vst [vmem:[%s6794_s17 + $0x40] sm:$0xff] %v4261_v54  ;;  %v4158_v13 = vadd.f32 %v4092_v1, %v3167_v25  ;;  %v6931_v54 = vpop.f32.mrf.mxu1  ;;  %v6936_v47 = vpop.f32.mrf.mxu2  ;;  %v4008_v25 = vadd.f32 %v6855_v29, %v6860_v34  ;;  %v7304_v34 = vld [vmem:[#allocation15_spill] sm:$0xff]  ;;  %v3086_v35 = vadd.f32 %v7306_v37, %v2997_v31 }
 0x472   : > { %v4102_v33 = vadd.f32 %v6899_v61, %v4013_v22  ;;  %v7314_v22 = vld [vmem:[#allocation78_spill] sm:$0xff] }
 0x473   : > { %v4194_v3 = vmul.f32 %v6778_v42, %v4158_v13  ;;  %3208 = vmatmul.bf16.gmra.mxu3 %v1817_v62  ;;  %v1819_v13 = vrot.slane %v7302_v39, 1  ;;  %v4097_v62 = vadd.f32 %v6863_v55, %v4008_v25  ;;  %v4100_v25 = vadd.f32 %v6878_v10, %v4011_v52  ;;  %v7312_v52 = vld [vmem:[#allocation20_spill] sm:$0xff] }
 0x475   : > { %v4230_v17 = vadd.f32 %v6785_v27, %v4194_v3  ;;  %v1818_v3 = vrot.slane %v5523_v51, 1  ;;  %v7309_v51 = vld [vmem:[#allocation74_spill] sm:$0xff] }
 0x476   : > { %v3169_v14 = vpop.f32.mrf.mxu3  ;;  %v1822_v10 = vrot.slane %v7309_v51, 1 }
 0x477   : > { %v4262_v36 = vmax.f32 %v4230_v17, 0.0  ;;  %v3170_v28 = vadd.f32 %v3169_v14, %v3081_v19  ;;  %v1820_v29 = vsel %vm1775_vm2, %v1818_v3, %v1819_v13  ;;  %v2677_v19 = vadd.f32 %v7305_v48, %v7304_v34  ;;  %v6953_v55 = vpop.f32.mrf.mxu0  ;;  %v7308_v13 = vld [vmem:[#allocation76_spill] sm:$0xff]  ;;  %v5524_v34 = vld [vmem:[#allocation2 + $0xb4] sm:$0xff] }
 0x478   : > { %v1821_v48 = vrot.slane %v5524_v34, 1 }
 0x479   : > { %4294 = vst [vmem:[%s6794_s17 + $0x48] sm:$0xff] %v4262_v36  ;;  %v4159_v1 = vadd.f32 %v4095_v56, %v3170_v28  ;;  %v6951_v56 = vpop.f32.mrf.mxu1  ;;  %v2766_v36 = vadd.f32 %v6652_v41, %v2677_v19  ;;  %v7310_v19 = vld [vmem:[#allocation75_spill] sm:$0xff] }
 0x47a   : > { %v1823_v24 = vsel %vm1775_vm2, %v1821_v48, %v1822_v10 }
 0x47b   : > { %v4195_v6 = vmul.f32 %v6778_v42, %v4159_v1  ;;  %v6960_v1 = vpop.f32.mrf.mxu2 }
 0x47d   : > { %v4231_v38 = vadd.f32 %v6785_v27, %v4195_v6 }
 0x47e   : > { %v3171_v50 = vpop.f32.mrf.mxu3 }
 0x47f   : > { %v4263_v53 = vmax.f32 %v4231_v38, 0.0  ;;  %v3172_v59 = vadd.f32 %v3171_v50, %v3083_v63  ;;  %v7307_v63 = vld [vmem:[#allocation70_spill] sm:$0xff]  ;;  %v3933_v3 = vpop.f32.mrf.mxu0 }
 0x480   : > { %v2999_v50 = vadd.f32 %v7307_v63, %v2766_v36  ;;  %v7311_v36 = vld [vmem:[#allocation19_spill] sm:$0xff] }
 0x481   : > { %4295 = vst [vmem:[%s6794_s17 + $0x50] sm:$0xff] %v4263_v53  ;;  %v4160_v17 = vadd.f32 %v4097_v62, %v3172_v59  ;;  %v4022_v53 = vpop.f32.mrf.mxu1 }
 0x482   : > { %v3088_v62 = vadd.f32 %v7308_v13, %v2999_v50 }
 0x483   : > { %v4196_v14 = vmul.f32 %v6778_v42, %v4160_v17  ;;  %3213 = vmatmul.bf16.gmra.mxu3 %v1820_v29  ;;  %v4111_v29 = vpop.f32.mrf.mxu2 }
 0x485   : > { %v4232_v28 = vadd.f32 %v6785_v27, %v4196_v14  ;;  %v3002_v14 = vadd.f32 %v7310_v19, %v6662_v9 }
 0x486   : > { %v3174_v6 = vpop.f32.mrf.mxu3 }
 0x487   : > { %v4264_v38 = vmax.f32 %v4232_v28, 0.0  ;;  %v3175_v49 = vadd.f32 %v3174_v6, %v3086_v35  ;;  %v2682_v28 = vadd.f32 %v7312_v52, %v7311_v36  ;;  %v4016_v35 = vadd.f32 %v6910_v43, %v6912_v16 }
 0x488   : > { %v4018_v43 = vadd.f32 %v6931_v54, %v6933_v2 }
 0x489   : > { %4296 = vst [vmem:[%s6794_s17 + $0x58] sm:$0xff] %v4264_v38  ;;  %v4161_v39 = vadd.f32 %v4100_v25, %v3175_v49  ;;  %v2771_v61 = vadd.f32 %v6668_v7, %v2682_v28  ;;  %v7313_v25 = vld [vmem:[#allocation79_spill] sm:$0xff]  ;;  %v4105_v49 = vadd.f32 %v6917_v60, %v4016_v35 }
 0x48a   : > { %v3091_v9 = vadd.f32 %v7313_v25, %v3002_v14  ;;  %v4107_v10 = vadd.f32 %v6936_v47, %v4018_v43  ;;  %v7317_v14 = vld [vmem:[#allocation22_spill] sm:$0xff]  ;;  %v4021_v47 = vadd.f32 %v6951_v56, %v6953_v55 }
 0x48b   : > { %v4197_v41 = vmul.f32 %v6778_v42, %v4161_v39  ;;  %v4025_v39 = vpop.f32.mrf.mxu1  ;;  %v4114_v7 = vpop.f32.mrf.mxu2  ;;  %v7321_v55 = vld [vmem:[#allocation86_spill] sm:$0xff] }
 0x48c   : > { %v4110_v35 = vadd.f32 %v6960_v1, %v4021_v47 }
 0x48d   : > { %v4233_v8 = vadd.f32 %v6785_v27, %v4197_v41  ;;  %v3936_v41 = vpop.f32.mrf.mxu0 }
 0x48e   : > { %v3176_v59 = vpop.f32.mrf.mxu3 }
 0x48f   : > { %v4265_v31 = vmax.f32 %v4233_v8, 0.0  ;;  %v3177_v17 = vadd.f32 %v3176_v59, %v3088_v62  ;;  %v3004_v8 = vadd.f32 %v7314_v22, %v2771_v61  ;;  %v7315_v59 = vld [vmem:[#allocation81_spill] sm:$0xff]  ;;  %v4023_v22 = vadd.f32 %v4022_v53, %v3933_v3  ;;  %v7323_v3 = vld [vmem:[#allocation88_spill] sm:$0xff] }
 0x491   : > { %4297 = vst [vmem:[%s6794_s17 + $0x60] sm:$0xff] %v4265_v31  ;;  %v4162_v18 = vadd.f32 %v4102_v33, %v3177_v17  ;;  %v3093_v51 = vadd.f32 %v7315_v59, %v3004_v8  ;;  %v7316_v17 = vld [vmem:[#allocation80_spill] sm:$0xff]  ;;  %v4112_v43 = vadd.f32 %v4111_v29, %v4023_v22  ;;  %v7322_v59 = vld [vmem:[#allocation85_spill] sm:$0xff] }
 0x492   : > { %v3007_v34 = vadd.f32 %v7316_v17, %v6681_v57 }
 0x493   : > { %v4198_v37 = vmul.f32 %v6778_v42, %v4162_v18  ;;  %3218 = vmatmul.bf16.gmra.mxu3 %v1823_v24  ;;  %v4027_v19 = vpop.f32.mrf.mxu1  ;;  %v7318_v18 = vld [vmem:[#allocation24_spill] sm:$0xff]  ;;  %v4116_v36 = vpop.f32.mrf.mxu2 }
 0x494   : > { %v2687_v24 = vadd.f32 %v7318_v18, %v7317_v14 }
 0x495   : > { %v4234_v6 = vadd.f32 %v6785_v27, %v4198_v37  ;;  %v3938_v54 = vpop.f32.mrf.mxu0  ;;  %v7319_v37 = vld [vmem:[#allocation84_spill] sm:$0xff] }
 0x496   : > { %v3179_v38 = vpop.f32.mrf.mxu3  ;;  %v2776_v52 = vadd.f32 %v6686_v20, %v2687_v24  ;;  %v3096_v57 = vadd.f32 %v7319_v37, %v3007_v34 }
 0x497   : > { %v4266_v63 = vmax.f32 %v4234_v6, 0.0  ;;  %v3180_v50 = vadd.f32 %v3179_v38, %v3091_v9  ;;  %v7320_v9 = vld [vmem:[#allocation83_spill] sm:$0xff] }
 0x498   : > { %v3009_v38 = vadd.f32 %v7320_v9, %v2776_v52  ;;  %v7326_v9 = vld [vmem:[#allocation89_spill] sm:$0xff] }
 0x499   : > { %4298 = vst [vmem:[%s6794_s17 + $0x68] sm:$0xff] %v4266_v63  ;;  %v4163_v13 = vadd.f32 %v4105_v49, %v3180_v50 }
 0x49a   : > { %v3098_v8 = vadd.f32 %v7321_v55, %v3009_v38  ;;  %v3017_v38 = vadd.f32 %v7326_v9, %v6706_v21 }
 0x49b   : > { %v4199_v62 = vmul.f32 %v6778_v42, %v4163_v13  ;;  %v4030_v20 = vpop.f32.mrf.mxu1  ;;  %v4119_v13 = vpop.f32.mrf.mxu2 }
 0x49c   : > { %v3106_v22 = vadd.f32 %v6501_v11, %v3017_v38 }
 0x49d   : > { %v4235_v16 = vadd.f32 %v6785_v27, %v4199_v62  ;;  %v3941_v50 = vpop.f32.mrf.mxu0 }
 0x49e   : > { %v3181_v60 = vpop.f32.mrf.mxu3 }
 0x49f   : > { %v4267_v33 = vmax.f32 %v4235_v16, 0.0  ;;  %v3182_v31 = vadd.f32 %v3181_v60, %v3093_v51  ;;  %v3012_v51 = vadd.f32 %v7322_v59, %v6692_v40 }
 0x4a1   : > { %4299 = vst [vmem:[%s6794_s17 + $0x70] sm:$0xff] %v4267_v33  ;;  %v4164_v48 = vadd.f32 %v4107_v10, %v3182_v31  ;;  %v4026_v33 = vadd.f32 %v4025_v39, %v3936_v41  ;;  %v3101_v31 = vadd.f32 %v7323_v3, %v3012_v51  ;;  %v4028_v39 = vadd.f32 %v4027_v19, %v3938_v54  ;;  %v7329_v3 = vld [vmem:[#allocation92_spill] sm:$0xff] }
 0x4a2   : > { %v4031_v19 = vadd.f32 %v4030_v20, %v3941_v50 }
 0x4a3   : > { %v4200_v2 = vmul.f32 %v6778_v42, %v4164_v48  ;;  %v4032_v17 = vpop.f32.mrf.mxu1  ;;  %v4115_v14 = vadd.f32 %v4114_v7, %v4026_v33  ;;  %v4121_v24 = vpop.f32.mrf.mxu2 }
 0x4a5   : > { %v4236_v28 = vadd.f32 %v6785_v27, %v4200_v2  ;;  %v3943_v48 = vpop.f32.mrf.mxu0  ;;  %v7324_v2 = vld [vmem:[#allocation87_spill] sm:$0xff] }
 0x4a6   : > { %v3184_v61 = vpop.f32.mrf.mxu3  ;;  %v3014_v40 = vadd.f32 %v7324_v2, %v6700_v4  ;;  %v4033_v20 = vadd.f32 %v4032_v17, %v3943_v48  ;;  %v7330_v48 = vld [vmem:[#allocation95_spill] sm:$0xff] }
 0x4a7   : > { %v4268_v6 = vmax.f32 %v4236_v28, 0.0  ;;  %v3185_v25 = vadd.f32 %v3184_v61, %v3096_v57  ;;  %v7325_v28 = vld [vmem:[#allocation90_spill] sm:$0xff]  ;;  %v4117_v61 = vadd.f32 %v4116_v36, %v4028_v39  ;;  %v4120_v36 = vadd.f32 %v4119_v13, %v4031_v19  ;;  %v7333_v19 = vld [vmem:[#allocation96_spill] sm:$0xff] }
 0x4a8   : > { %v3103_v37 = vadd.f32 %v7325_v28, %v3014_v40  ;;  %v4122_v13 = vadd.f32 %v4121_v24, %v4033_v20 }
 0x4a9   : > { %4300 = vst [vmem:[%s6794_s17 + $0x78] sm:$0xff] %v4268_v6  ;;  %v4165_v49 = vadd.f32 %v4110_v35, %v3185_v25 }
 0x4ab   : > { %v4201_v63 = vmul.f32 %v6778_v42, %v4165_v49  ;;  %v4035_v6 = vpop.f32.mrf.mxu1  ;;  %v4124_v49 = vpop.f32.mrf.mxu2 }
 0x4ad   : > { %v4237_v56 = vadd.f32 %v6785_v27, %v4201_v63  ;;  %v3946_v25 = vpop.f32.mrf.mxu0 }
 0x4ae   : > { %v3186_v62 = vpop.f32.mrf.mxu3 }
 0x4af   : > { %v4269_v1 = vmax.f32 %v4237_v56, 0.0  ;;  %v3187_v16 = vadd.f32 %v3186_v62, %v3098_v8  ;;  %v7327_v62 = vld [vmem:[#allocation91_spill] sm:$0xff] }
 0x4b1   : > { %4301 = vst [vmem:[%s6794_s17 + $0x80] sm:$0xff] %v4269_v1  ;;  %v4166_v60 = vadd.f32 %v4112_v43, %v3187_v16  ;;  %v3019_v43 = vadd.f32 %v7327_v62, %v6713_v30  ;;  %v3022_v30 = vadd.f32 %v7329_v3, %v6720_v5 }
 0x4b3   : > { %v4202_v10 = vmul.f32 %v6778_v42, %v4166_v60  ;;  %v4037_v1 = vpop.f32.mrf.mxu1  ;;  %v4126_v51 = vpop.f32.mrf.mxu2  ;;  %v7328_v60 = vld [vmem:[#allocation93_spill] sm:$0xff]  ;;  %v3111_v2 = vadd.f32 %v7330_v48, %v3022_v30 }
 0x4b4   : > { %v3108_v11 = vadd.f32 %v7328_v60, %v3019_v43 }
 0x4b5   : > { %v4238_v53 = vadd.f32 %v6785_v27, %v4202_v10  ;;  %v3948_v16 = vpop.f32.mrf.mxu0 }
 0x4b6   : > { %v3189_v34 = vpop.f32.mrf.mxu3 }
 0x4b7   : > { %v4270_v29 = vmax.f32 %v4238_v53, 0.0  ;;  %v3190_v18 = vadd.f32 %v3189_v34, %v3101_v31 }
 0x4b9   : > { %4302 = vst [vmem:[%s6794_s17 + $0x88] sm:$0xff] %v4270_v29  ;;  %v4167_v52 = vadd.f32 %v4115_v14, %v3190_v18  ;;  %v4036_v18 = vadd.f32 %v4035_v6, %v3946_v25 }
 0x4bb   : > { %v4203_v47 = vmul.f32 %v6778_v42, %v4167_v52  ;;  %v4040_v14 = vpop.f32.mrf.mxu1  ;;  %v4129_v40 = vpop.f32.mrf.mxu2  ;;  %v4125_v24 = vadd.f32 %v4124_v49, %v4036_v18 }
 0x4bd   : > { %v4239_v41 = vadd.f32 %v6785_v27, %v4203_v47  ;;  %v3951_v29 = vpop.f32.mrf.mxu0 }
 0x4be   : > { %v3191_v57 = vpop.f32.mrf.mxu3 }
 0x4bf   : > { %v4271_v35 = vmax.f32 %v4239_v41, 0.0  ;;  %v3192_v7 = vadd.f32 %v3191_v57, %v3103_v37  ;;  %v7331_v41 = vld [vmem:[#allocation94_spill] sm:$0xff]  ;;  %v4038_v57 = vadd.f32 %v4037_v1, %v3948_v16 }
 0x4c0   : > { %v3024_v5 = vadd.f32 %v7331_v41, %v6726_v0  ;;  %v3027_v0 = vadd.f32 %v7333_v19, %v6731_v26  ;;  %v7338_v41 = vld [vmem:[#allocation101_spill] sm:$0xff] }
 0x4c1   : > { %4303 = vst [vmem:[%s6794_s17 + $0x90] sm:$0xff] %v4271_v35  ;;  %v4168_v4 = vadd.f32 %v4117_v61, %v3192_v7  ;;  %v7332_v35 = vld [vmem:[#allocation97_spill] sm:$0xff]  ;;  %v4127_v38 = vadd.f32 %v4126_v51, %v4038_v57  ;;  %v7335_v51 = vld [vmem:[#allocation98_spill] sm:$0xff] }
 0x4c2   : > { %v3113_v7 = vadd.f32 %v7332_v35, %v3024_v5  ;;  %v3029_v20 = vadd.f32 %v7335_v51, %v6736_v45 }
 0x4c3   : > { %v4204_v63 = vmul.f32 %v6778_v42, %v4168_v4  ;;  %v4042_v6 = vpop.f32.mrf.mxu1 }
 0x4c5   : > { %v4240_v54 = vadd.f32 %v6785_v27, %v4204_v63  ;;  %v3953_v9 = vpop.f32.mrf.mxu0  ;;  %v4131_v63 = vpop.f32.mrf.mxu2 }
 0x4c6   : > { %v3194_v56 = vpop.f32.mrf.mxu3 }
 0x4c7   : > { %v4272_v55 = vmax.f32 %v4240_v54, 0.0  ;;  %v3195_v8 = vadd.f32 %v3194_v56, %v3106_v22  ;;  %v4041_v56 = vadd.f32 %v4040_v14, %v3951_v29 }
 0x4c9   : > { %4304 = vst [vmem:[%s6794_s17 + $0x98] sm:$0xff] %v4272_v55  ;;  %v4169_v21 = vadd.f32 %v4120_v36, %v3195_v8  ;;  %v7334_v55 = vld [vmem:[#allocation99_spill] sm:$0xff]  ;;  %v4130_v43 = vadd.f32 %v4129_v40, %v4041_v56  ;;  %v7337_v40 = vld [vmem:[#allocation102_spill] sm:$0xff] }
 0x4ca   : > { %v3116_v8 = vadd.f32 %v7334_v55, %v3027_v0  ;;  %v7341_v56 = vld [vmem:[#allocation106_spill] sm:$0xff] }
 0x4cb   : > { %v4205_v59 = vmul.f32 %v6778_v42, %v4169_v21  ;;  %v4045_v16 = vpop.f32.mrf.mxu1 }
 0x4cd   : > { %v4241_v50 = vadd.f32 %v6785_v27, %v4205_v59  ;;  %v3956_v59 = vpop.f32.mrf.mxu0 }
 0x4ce   : > { %v3196_v10 = vpop.f32.mrf.mxu3  ;;  %v4046_v48 = vadd.f32 %v4045_v16, %v3956_v59  ;;  %v7342_v59 = vld [vmem:[#allocation105_spill] sm:$0xff] }
 0x4cf   : > { %v4273_v33 = vmax.f32 %v4241_v50, 0.0  ;;  %v3197_v53 = vadd.f32 %v3196_v10, %v3108_v11  ;;  %v4134_v50 = vpop.f32.mrf.mxu2  ;;  %v4043_v11 = vadd.f32 %v4042_v6, %v3953_v9 }
 0x4d1   : > { %4305 = vst [vmem:[%s6794_s17 + $0xa0] sm:$0xff] %v4273_v33  ;;  %v4170_v31 = vadd.f32 %v4122_v13, %v3197_v53  ;;  %v3118_v13 = vadd.f32 %v6547_v12, %v3029_v20  ;;  %v4132_v53 = vadd.f32 %v4131_v63, %v4043_v11  ;;  %v7340_v63 = vld [vmem:[#allocation103_spill] sm:$0xff] }
 0x4d3   : > { %v4206_v34 = vmul.f32 %v6778_v42, %v4170_v31  ;;  %v7336_v31 = vld [vmem:[#allocation100_spill] sm:$0xff]  ;;  %v4047_v14 = vpop.f32.mrf.mxu1 }
 0x4d5   : > { %v4242_v17 = vadd.f32 %v6785_v27, %v4206_v34  ;;  %v3032_v34 = vadd.f32 %v7336_v31, %v6741_v46  ;;  %v3958_v29 = vpop.f32.mrf.mxu0  ;;  %v3034_v46 = vadd.f32 %v7338_v41, %v6746_v23  ;;  %v3037_v23 = vadd.f32 %v7340_v63, %v6751_v32 }
 0x4d6   : > { %v3199_v52 = vpop.f32.mrf.mxu3  ;;  %v3039_v32 = vadd.f32 %v7342_v59, %v6756_v58 }
 0x4d7   : > { %v4274_v47 = vmax.f32 %v4242_v17, 0.0  ;;  %v3200_v39 = vadd.f32 %v3199_v52, %v3111_v2  ;;  %v4136_v17 = vpop.f32.mrf.mxu2  ;;  %v3121_v12 = vadd.f32 %v7337_v40, %v3032_v34 }
 0x4d9   : > { %4306 = vst [vmem:[%s6794_s17 + $0xa8] sm:$0xff] %v4274_v47  ;;  %v4171_v28 = vadd.f32 %v4125_v24, %v3200_v39  ;;  %v4135_v24 = vadd.f32 %v4134_v50, %v4046_v48 }
 0x4db   : > { %v4207_v37 = vmul.f32 %v6778_v42, %v4171_v28 }
 0x4dd   : > { %v4243_v61 = vadd.f32 %v6785_v27, %v4207_v37  ;;  %v4050_v37 = vpop.f32.mrf.mxu1  ;;  %v3961_v57 = vpop.f32.mrf.mxu0 }
 0x4de   : > { %v3201_v25 = vpop.f32.mrf.mxu3 }
 0x4df   : > { %v4275_v4 = vmax.f32 %v4243_v61, 0.0  ;;  %v3202_v49 = vadd.f32 %v3201_v25, %v3113_v7  ;;  %v4048_v61 = vadd.f32 %v4047_v14, %v3958_v29  ;;  %v7339_v7 = vld [vmem:[#allocation104_spill] sm:$0xff]  ;;  %v4139_v25 = vpop.f32.mrf.mxu2 }
 0x4e0   : > { %v3123_v6 = vadd.f32 %v7339_v7, %v3034_v46 }
 0x4e1   : > { %4307 = vst [vmem:[%s6794_s17 + $0xb0] sm:$0xff] %v4275_v4  ;;  %v4172_v54 = vadd.f32 %v4127_v38, %v3202_v49  ;;  %v4137_v38 = vadd.f32 %v4136_v17, %v4048_v61  ;;  %v7345_v17 = vld [vmem:[#allocation110_spill] sm:$0xff] }
 0x4e3   : > { %v4208_v22 = vmul.f32 %v6778_v42, %v4172_v54  ;;  %v4051_v54 = vadd.f32 %v4050_v37, %v3961_v57  ;;  %v7347_v57 = vld [vmem:[#allocation111_spill] sm:$0xff] }
 0x4e5   : > { %v4244_v36 = vadd.f32 %v6785_v27, %v4208_v22  ;;  %v4052_v55 = vpop.f32.mrf.mxu1 }
 0x4e6   : > { %v3204_v62 = vpop.f32.mrf.mxu3 }
 0x4e7   : > { %v4276_v21 = vmax.f32 %v4244_v36, 0.0  ;;  %v3205_v1 = vadd.f32 %v3204_v62, %v3116_v8  ;;  %v3126_v36 = vadd.f32 %v7341_v56, %v3037_v23  ;;  %v4140_v62 = vadd.f32 %v4139_v25, %v4051_v54  ;;  %v4141_v16 = vpop.f32.mrf.mxu2 }
 0x4e9   : > { %4308 = vst [vmem:[%s6794_s17 + $0xb8] sm:$0xff] %v4276_v21  ;;  %v4173_v26 = vadd.f32 %v4130_v43, %v3205_v1  ;;  %v3963_v1 = vpop.f32.mrf.mxu0 }
 0x4eb   : > { %v4209_v60 = vmul.f32 %v6778_v42, %v4173_v26  ;;  %v4053_v26 = vadd.f32 %v4052_v55, %v3963_v1 }
 0x4ed   : > { %v4245_v10 = vadd.f32 %v6785_v27, %v4209_v60  ;;  %v7343_v60 = vld [vmem:[#allocation108_spill] sm:$0xff] }
 0x4ee   : > { %v3206_v33 = vpop.f32.mrf.mxu3  ;;  %v3128_v11 = vadd.f32 %v7343_v60, %v3039_v32 }
 0x4ef   : > { %v4277_v3 = vmax.f32 %v4245_v10, 0.0  ;;  %v3207_v30 = vadd.f32 %v3206_v33, %v3118_v13  ;;  %v4142_v13 = vadd.f32 %v4141_v16, %v4053_v26 }
 0x4f1   : > { %4309 = vst [vmem:[%s6794_s17 + $0xc0] sm:$0xff] %v4277_v3  ;;  %v4174_v45 = vadd.f32 %v4132_v53, %v3207_v30  ;;  %v4055_v3 = vpop.f32.mrf.mxu1  ;;  %v7344_v30 = vld [vmem:[#allocation107_spill] sm:$0xff]  ;;  %v3966_v34 = vpop.f32.mrf.mxu0 }
 0x4f2   : > { %v3042_v31 = vadd.f32 %v7344_v30, %v6761_v15  ;;  %v4056_v29 = vadd.f32 %v4055_v3, %v3966_v34 }
 0x4f3   : > { %v4210_v18 = vmul.f32 %v6778_v42, %v4174_v45  ;;  %v4144_v45 = vpop.f32.mrf.mxu2 }
 0x4f4   : > { %v3131_v48 = vadd.f32 %v7345_v17, %v3042_v31  ;;  %v4145_v40 = vadd.f32 %v4144_v45, %v4056_v29 }
 0x4f5   : > { %v4246_v2 = vadd.f32 %v6785_v27, %v4210_v18 }
 0x4f6   : > { %v3209_v52 = vpop.f32.mrf.mxu3 }
 0x4f7   : > { %v4278_v47 = vmax.f32 %v4246_v2, 0.0  ;;  %v3210_v39 = vadd.f32 %v3209_v52, %v3121_v12 }
 0x4f9   : > { %4310 = vst [vmem:[%s6794_s17 + $0xc8] sm:$0xff] %v4278_v47  ;;  %v4175_v5 = vadd.f32 %v4135_v24, %v3210_v39  ;;  %v7346_v24 = vld [vmem:[#allocation109_spill] sm:$0xff]  ;;  %v4057_v39 = vpop.f32.mrf.mxu1  ;;  %v3968_v46 = vpop.f32.mrf.mxu0 }
 0x4fa   : > { %v3044_v47 = vadd.f32 %v7346_v24, %v6766_v44 }
 0x4fb   : > { %v4211_v28 = vmul.f32 %v6778_v42, %v4175_v5  ;;  %v4146_v5 = vpop.f32.mrf.mxu2 }
 0x4fc   : > { %v3133_v61 = vadd.f32 %v7347_v57, %v3044_v47 }
 0x4fd   : > { %v4247_v35 = vadd.f32 %v6785_v27, %v4211_v28  ;;  %v4058_v28 = vadd.f32 %v4057_v39, %v3968_v46 }
 0x4fe   : > { %v3211_v9 = vpop.f32.mrf.mxu3 }
 0x4ff   : > { %v4279_v4 = vmax.f32 %v4247_v35, 0.0  ;;  %v3212_v49 = vadd.f32 %v3211_v9, %v3123_v6  ;;  %v4147_v7 = vadd.f32 %v4146_v5, %v4058_v28 }
 0x501   : > { %4311 = vst [vmem:[%s6794_s17 + $0xd0] sm:$0xff] %v4279_v4  ;;  %v4176_v19 = vadd.f32 %v4137_v38, %v3212_v49 }
 0x503   : > { %v4212_v0 = vmul.f32 %v6778_v42, %v4176_v19 }
 0x505   : > { %v4248_v22 = vadd.f32 %v6785_v27, %v4212_v0 }
 0x506   : > { %v3214_v8 = vpop.f32.mrf.mxu3 }
 0x507   : > { %v4280_v43 = vmax.f32 %v4248_v22, 0.0  ;;  %v3215_v21 = vadd.f32 %v3214_v8, %v3126_v36 }
 0x509   : > { %4312 = vst [vmem:[%s6794_s17 + $0xd8] sm:$0xff] %v4280_v43  ;;  %v4177_v51 = vadd.f32 %v4140_v62, %v3215_v21 }
 0x50b   : > { %v4213_v20 = vmul.f32 %v6778_v42, %v4177_v51 }
 0x50d   : > { %v4249_v50 = vadd.f32 %v6785_v27, %v4213_v20 }
 0x50e   : > { %v3216_v10 = vpop.f32.mrf.mxu3 }
 0x50f   : > { %v4281_v33 = vmax.f32 %v4249_v50, 0.0  ;;  %v3217_v53 = vadd.f32 %v3216_v10, %v3128_v11 }
 0x511   : > { %4313 = vst [vmem:[%s6794_s17 + $0xe0] sm:$0xff] %v4281_v33  ;;  %v4178_v58 = vadd.f32 %v4142_v13, %v3217_v53 }
 0x513   : > { %v4214_v14 = vmul.f32 %v6778_v42, %v4178_v58 }
 0x515   : > { %v4250_v18 = vadd.f32 %v6785_v27, %v4214_v14 }
 0x516   : > { %v3219_v2 = vpop.f32.mrf.mxu3 }
 0x517   : > { %v4282_v12 = vmax.f32 %v4250_v18, 0.0  ;;  %v3220_v52 = vadd.f32 %v3219_v2, %v3131_v48 }
 0x519   : > { %4314 = vst [vmem:[%s6794_s17 + $0xe8] sm:$0xff] %v4282_v12  ;;  %v4179_v15 = vadd.f32 %v4145_v40, %v3220_v52 }
 0x51b   : > { %v4215_v41 = vmul.f32 %v6778_v42, %v4179_v15 }
 0x51d   : > { %v4251_v37 = vadd.f32 %v6785_v27, %v4215_v41 }
 0x51e   : > { %v3221_v35 = vpop.f32.mrf.mxu3 }
 0x51f   : > { %v4283_v6 = vmax.f32 %v4251_v37, 0.0  ;;  %v3222_v25 = vadd.f32 %v3221_v35, %v3133_v61 }
 0x521   : > { %4315 = vst [vmem:[%s6794_s17 + $0xf0] sm:$0xff] %v4283_v6  ;;  %v4180_v9 = vadd.f32 %v4147_v7, %v3222_v25 }
 0x523   : > { %v4216_v44 = vmul.f32 %v6778_v42, %v4180_v9 }
 0x525   : > { %v4252_v38 = vadd.f32 %v6785_v27, %v4216_v44 }
 0x527   : > { %v4284_v4 = vmax.f32 %v4252_v38, 0.0 }
 0x529   : > { %4316 = vst [vmem:[%s6794_s17 + $0xf8] sm:$0xff] %v4284_v4 }
 0x52a PF: > { %s17_s26 = sadd.s32 1, %s5547_s26   ;;  %s7348_s24 = smov %s5543_s25 }
 0x52b   : > { %p14_p5 = scmp.ge.s32.totalorder %s17_s26, 4   ;;  %s7349_s25 = smov %s7351_s27 }
 0x52d   :  { %16 = sbr.rel (!%p14_p5) target bundleno = 2 (0x2), region = 82 }

</bundles_post_ra>
